<compile_context>
chip_gen: v6e
topology: v6e:2x2x1
jax: 0.10.0
libtpu: 0.0.40
codegen_flags: <defaults>
</compile_context>

<pallas_src>
import math
from functools import partial

import jax
import jax.numpy as jnp
from jax.experimental import pallas as pl
from jax.experimental.pallas import tpu as pltpu


# --------------------------------------------------------------------------
# helpers traced inside kernels
# --------------------------------------------------------------------------
def _layer_norm(x, g, b, eps):
    mu = jnp.mean(x, axis=-1, keepdims=True)
    var = jnp.mean(jnp.square(x - mu), axis=-1, keepdims=True)
    return (x - mu) * jax.lax.rsqrt(var + eps) * g + b


def _gelu(x):
    # exact (erf) GELU, matching torch.nn.GELU default.  erf is evaluated with
    # the Abramowitz-Stegun 7.1.26 polynomial (|abs err| < 1.5e-7) so only
    # Pallas-supported elementwise ops (mul/add/where/abs/exp/div) are used.
    z = x * 0.7071067811865476
    sgn = jnp.where(z >= 0.0, 1.0, -1.0)
    az = jnp.abs(z)
    t = 1.0 / (1.0 + 0.3275911 * az)
    poly = ((((1.061405429 * t - 1.453152027) * t + 1.421413741) * t
             - 0.284496736) * t + 0.254829592) * t
    erf = sgn * (1.0 - poly * jnp.exp(-az * az))
    return 0.5 * x * (1.0 + erf)


# --------------------------------------------------------------------------
# VMEM limit (generation aware): ~45% of physical VMEM, clamped.
# --------------------------------------------------------------------------
_VMEM_LIMIT_CACHE = None


def _vmem_limit():
    global _VMEM_LIMIT_CACHE
    if _VMEM_LIMIT_CACHE is None:
        try:
            cap = int(pltpu.get_tpu_info().vmem_capacity_bytes)
        except Exception:
            cap = 128 << 20
        _VMEM_LIMIT_CACHE = max(24 << 20, min(int(cap * 0.45), 100 << 20))
    return _VMEM_LIMIT_CACHE


# --------------------------------------------------------------------------
# generic (M,K)@(K,N)+bias kernel  (patch-embed projection), tiled over M
# --------------------------------------------------------------------------
def _matmul_bias_kernel(a_ref, w_ref, b_ref, o_ref):
    acc = jnp.dot(a_ref[...].astype(jnp.bfloat16), w_ref[...],
                  preferred_element_type=jnp.float32) + b_ref[...]
    o_ref[...] = acc.astype(o_ref.dtype)


def matmul_bias(a, w, b, tile_m=512):
    M, K = a.shape
    N = w.shape[1]
    tm = min(tile_m, M)
    return pl.pallas_call(
        _matmul_bias_kernel,
        out_shape=jax.ShapeDtypeStruct((M, N), jnp.bfloat16),
        grid=(pl.cdiv(M, tm),),
        in_specs=[
            pl.BlockSpec((tm, K), lambda i: (i, 0)),
            pl.BlockSpec((K, N), lambda i: (0, 0)),
            pl.BlockSpec((1, N), lambda i: (0, 0)),
        ],
        out_specs=pl.BlockSpec((tm, N), lambda i: (i, 0)),
        compiler_params=pltpu.CompilerParams(
            dimension_semantics=("parallel",)),
    )(a, w, b)


# --------------------------------------------------------------------------
# fused TransformerLayer kernel:  x(+pos) + Attn(LN1(x)) ; x + MLP(LN2(x))
# x is flattened to (B*T*N, C); each grid step processes G*N rows
# (G image-blocks), so the QKV / proj / MLP matmuls see M = G*N rows.
# --------------------------------------------------------------------------
def _transformer_layer_kernel(*refs, num_heads, G, N, has_pos, pos_reps):
    if has_pos:
        (x_ref, pos_ref, ln1g_ref, ln1b_ref, wqkv_ref, bqkv_ref, wproj_ref,
         bproj_ref, ln2g_ref, ln2b_ref, w1_ref, b1_ref, w2_ref, b2_ref,
         o_ref) = refs
    else:
        (x_ref, ln1g_ref, ln1b_ref, wqkv_ref, bqkv_ref, wproj_ref,
         bproj_ref, ln2g_ref, ln2b_ref, w1_ref, b1_ref, w2_ref, b2_ref,
         o_ref) = refs
        pos_ref = None

    C = x_ref.shape[-1]
    d = C // num_heads
    rows = G * N

    x = x_ref[...].astype(jnp.float32)                               # (G*N, C)
    if has_pos:
        if pos_reps == 1:
            x = x + pos_ref[...]
        else:
            x = (x.reshape(pos_reps, rows // pos_reps, C)
                 + pos_ref[...]).reshape(rows, C)

    # ---- multi-head self attention (fused qkv / fused proj) -------------
    h = _layer_norm(x, ln1g_ref[...], ln1b_ref[...], 1e-6).astype(jnp.bfloat16)
    # attention scale is pre-folded into the Q columns of wqkv / bqkv
    qkv = jnp.dot(h, wqkv_ref[...],
                  preferred_element_type=jnp.float32) + bqkv_ref[...]  # (G*N,3C)

    parts = []
    for hh in range(num_heads):                                       # static loop
        q = qkv[:, hh * d:(hh + 1) * d].reshape(G, N, d)
        k = qkv[:, C + hh * d:C + (hh + 1) * d].reshape(G, N, d)
        v = qkv[:, 2 * C + hh * d:2 * C + (hh + 1) * d].reshape(G, N, d)
        s = jnp.einsum("gnd,gmd->gnm",
                       q.astype(jnp.bfloat16), k.astype(jnp.bfloat16),
                       preferred_element_type=jnp.float32)            # (G, N, N)
        s = s - jnp.max(s, axis=-1, keepdims=True)
        p = jnp.exp(s)
        p = p * pl.reciprocal(jnp.sum(p, axis=-1, keepdims=True), approx=True)
        o = jnp.einsum("gnm,gmd->gnd",
                       p.astype(jnp.bfloat16), v.astype(jnp.bfloat16),
                       preferred_element_type=jnp.float32)            # (G, N, d)
        parts.append(o.reshape(rows, d))
    ctx = jnp.concatenate(parts, axis=-1).astype(jnp.bfloat16)        # (G*N, C)
    attn = jnp.dot(ctx, wproj_ref[...],
                   preferred_element_type=jnp.float32) + bproj_ref[...]
    x = x + attn

    # ---- MLP -------------------------------------------------------------
    h2 = _layer_norm(x, ln2g_ref[...], ln2b_ref[...], 1e-6).astype(jnp.bfloat16)
    m = jnp.dot(h2, w1_ref[...], preferred_element_type=jnp.float32) + b1_ref[...]
    m = _gelu(m).astype(jnp.bfloat16)
    m = jnp.dot(m, w2_ref[...], preferred_element_type=jnp.float32) + b2_ref[...]
    o_ref[...] = (x + m).astype(o_ref.dtype)


def _pick_group(B, T, N, C, vmem_limit_bytes):
    """Pick G (image blocks per grid step) so the full working set fits VMEM.

    Budget model (bytes): double-buffered bf16 weights ~ 52*C^2 (+ slack) and
    ~16*C*4 per activation row (in/out blocks + f32 intermediates).
    Constraints: G | B*T, G*N respects the (8,128) block rule, and G tiles the
    pos-embed cleanly (T % G == 0 or G % T == 0).
    """
    BT = B * T
    weight_bytes = 52 * C * C + (2 << 20)
    row_bytes = 16 * C * 4
    max_rows = (vmem_limit_bytes - weight_bytes) // row_bytes
    cands = []
    for g in range(1, BT + 1):
        if BT % g:
            continue
        if not (T % g == 0 or g % T == 0):
            continue
        if (g * N) % 8 != 0 and g != BT:
            continue
        cands.append(g)
    fitting = [g for g in cands if g * N <= max_rows]
    return max(fitting) if fitting else min(cands)


def transformer_layer(xf, p, num_heads, N, T, pos=None, vmem_limit=None):
    """xf: (B*T*N, C) bf16 -> (B*T*N, C) bf16.  pos: (1, T, N, C) f32 or None."""
    M, C = xf.shape
    B = M // (T * N)
    vmem_limit = vmem_limit or _vmem_limit()
    G = _pick_group(B, T, N, C, vmem_limit)
    rows = G * N

    weights = [
        p["ln1_g"], p["ln1_b"], p["wqkv"], p["bqkv"], p["wproj"], p["bproj"],
        p["ln2_g"], p["ln2_b"], p["w1"], p["b1"], p["w2"], p["b2"],
    ]
    w_specs = [pl.BlockSpec(w.shape, (lambda i, n=w.ndim: (0,) * n))
               for w in weights]

    in_arrays = [xf]
    in_specs = [pl.BlockSpec((rows, C), lambda i: (i, 0))]
    has_pos = pos is not None
    pos_reps = 1
    if has_pos:
        posf = pos.reshape(T * N, C)
        if G <= T:                       # slab covers G of the T blocks
            in_specs.append(
                pl.BlockSpec((rows, C), lambda i, q=T // G: (i % q, 0)))
        else:                            # slab spans whole batches: tile pos
            pos_reps = G // T
            in_specs.append(pl.BlockSpec((T * N, C), lambda i: (0, 0)))
        in_arrays.append(posf)
    in_arrays += weights
    in_specs += w_specs

    kern = partial(_transformer_layer_kernel, num_heads=num_heads, G=G, N=N,
                   has_pos=has_pos, pos_reps=pos_reps)
    return pl.pallas_call(
        kern,
        out_shape=jax.ShapeDtypeStruct((M, C), jnp.bfloat16),
        grid=(M // rows,),
        in_specs=in_specs,
        out_specs=pl.BlockSpec((rows, C), lambda i: (i, 0)),
        compiler_params=pltpu.CompilerParams(
            dimension_semantics=("parallel",),
            vmem_limit_bytes=vmem_limit),
    )(*in_arrays)


# --------------------------------------------------------------------------
# ConvPool kernel: 3x3 conv (pad 1) as 3 accumulated row-shifted matmuls
#                  -> LayerNorm(channel)
#                  -> vectorized 3x3 max-pool stride 2 pad 1 (-inf padding)
# input slab per batch: ((H+2)*W, 3*Cin) bf16, channels packed (kw, cin)
# --------------------------------------------------------------------------
def _convpool_kernel(x_ref, w_ref, b_ref, g_ref, beta_ref, o_ref, *, H, W, Ho, Wo):
    Cout = o_ref.shape[-1]
    HW = H * W
    acc = jnp.zeros((HW, Cout), jnp.float32)
    for kh in range(3):                                              # 3 matmuls
        xs = x_ref[0, kh * W:kh * W + HW, :]                         # bf16 slab
        acc = acc + jnp.dot(xs, w_ref[kh], preferred_element_type=jnp.float32)
    conv = acc + b_ref[...]
    y = _layer_norm(conv, g_ref[...], beta_ref[...], 1e-6)           # (H*W, Cout)

    # --- max pool 3x3 / stride 2 / pad 1 (PyTorch -inf padding), vectorized
    y3 = y.reshape(Ho, 2 * W, Cout)                                  # row pairs
    r_ev = y3[:, :W, :]                                              # row 2i
    r_od = y3[:, W:, :]                                              # row 2i+1
    r_pr = jnp.concatenate(
        [jnp.full((1, W, Cout), -jnp.inf, jnp.float32), r_od[:-1]], axis=0)
    rowmax = jnp.maximum(jnp.maximum(r_ev, r_od), r_pr)              # (Ho, W, C)
    c4 = rowmax.reshape(Ho, Wo, 2, Cout)
    c_ev = c4[:, :, 0, :]
    c_od = c4[:, :, 1, :]
    c_pr = jnp.concatenate(
        [jnp.full((Ho, 1, Cout), -jnp.inf, jnp.float32), c_od[:, :-1, :]], axis=1)
    pooled = jnp.maximum(jnp.maximum(c_ev, c_od), c_pr)              # (Ho, Wo, C)
    o_ref[0] = pooled.astype(o_ref.dtype)


def conv_pool(x_nhwc, p, vmem_limit=None):
    B, H, W, Cin = x_nhwc.shape
    assert H % 2 == 0 and W % 2 == 0, "BlockAggregation requires even spatial dims"
    Cout = p["w"].shape[-1]
    Ho, Wo = H // 2, W // 2
    vmem_limit = vmem_limit or _vmem_limit()
    # build 3x-wide (kw-packed) zero-padded slabs in bf16: (B, (H+2)*W, 3*Cin)
    xp = jnp.pad(x_nhwc.astype(jnp.bfloat16), ((0, 0), (1, 1), (1, 1), (0, 0)))
    xcat = jnp.concatenate([xp[:, :, kw:kw + W, :] for kw in range(3)], axis=-1)
    xcat = xcat.reshape(B, (H + 2) * W, 3 * Cin)

    return pl.pallas_call(
        partial(_convpool_kernel, H=H, W=W, Ho=Ho, Wo=Wo),
        out_shape=jax.ShapeDtypeStruct((B, Ho, Wo, Cout), jnp.bfloat16),
        grid=(B,),
        in_specs=[
            pl.BlockSpec((1, (H + 2) * W, 3 * Cin), lambda i: (i, 0, 0)),
            pl.BlockSpec(p["w"].shape, lambda i: (0, 0, 0)),
            pl.BlockSpec((1, Cout), lambda i: (0, 0)),
            pl.BlockSpec((1, Cout), lambda i: (0, 0)),
            pl.BlockSpec((1, Cout), lambda i: (0, 0)),
        ],
        out_specs=pl.BlockSpec((1, Ho, Wo, Cout), lambda i: (i, 0, 0, 0)),
        compiler_params=pltpu.CompilerParams(
            dimension_semantics=("parallel",),
            vmem_limit_bytes=vmem_limit),
    )(xcat, p["w"], p["b"], p["ln_g"], p["ln_b"])                    # NHWC bf16


# --------------------------------------------------------------------------
# final LayerNorm (eps=1e-5) -> global average pool -> classifier head
# (head columns lane-padded to a multiple of 128; sliced back outside)
# --------------------------------------------------------------------------
def _norm_pool_head_kernel(x_ref, g_ref, b_ref, w_ref, bh_ref, o_ref, *, eps):
    x = x_ref[...].astype(jnp.float32)                               # (TB, HW, C)
    xn = _layer_norm(x, g_ref[...], b_ref[...], eps)
    pooled = jnp.mean(xn, axis=1)                                    # (TB, C)
    o_ref[...] = (
        jnp.dot(pooled, w_ref[...], preferred_element_type=jnp.float32)
        + bh_ref[...]
    )


def norm_pool_head(x_nhwc, params, num_classes):
    B, Hh, Ww, C = x_nhwc.shape
    x = x_nhwc.reshape(B, Hh * Ww, C)
    ncp = ((num_classes + 127) // 128) * 128
    w, bh = params["head_w"], params["head_b"]
    if ncp != num_classes:
        w = jnp.pad(w, ((0, 0), (0, ncp - num_classes)))
        bh = jnp.pad(bh, ((0, 0), (0, ncp - num_classes)))
    tb = min(B, 8)
    out = pl.pallas_call(
        partial(_norm_pool_head_kernel, eps=1e-5),
        out_shape=jax.ShapeDtypeStruct((B, ncp), jnp.float32),
        grid=(pl.cdiv(B, tb),),
        in_specs=[
            pl.BlockSpec((tb, Hh * Ww, C), lambda i: (i, 0, 0)),
            pl.BlockSpec((1, C), lambda i: (0, 0)),
            pl.BlockSpec((1, C), lambda i: (0, 0)),
            pl.BlockSpec((C, ncp), lambda i: (0, 0)),
            pl.BlockSpec((1, ncp), lambda i: (0, 0)),
        ],
        out_specs=pl.BlockSpec((tb, ncp), lambda i: (i, 0)),
        compiler_params=pltpu.CompilerParams(
            dimension_semantics=("parallel",)),
    )(x, params["norm_g"], params["norm_b"], w, bh)
    return out[:, :num_classes]


# --------------------------------------------------------------------------
# plain-JAX glue: blockify / deblockify / patch extraction (all NHWC, bf16)
# --------------------------------------------------------------------------
def blockify(x, block_size):
    B, H, W, C = x.shape
    gh, gw = H // block_size, W // block_size
    x = x.reshape(B, gh, block_size, gw, block_size, C)
    x = jnp.transpose(x, (0, 1, 3, 2, 4, 5))
    return x.reshape(B, gh * gw, block_size * block_size, C)


def deblockify(x, block_size):
    B, T, _, C = x.shape
    g = int(math.sqrt(T))
    x = x.reshape(B, g, g, block_size, block_size, C)
    x = jnp.transpose(x, (0, 1, 3, 2, 4, 5))
    return x.reshape(B, g * block_size, g * block_size, C)


def patch_embed(x_nchw, p, patch_size):
    B, Cin, H, W = x_nchw.shape
    ps = patch_size
    gh, gw = H // ps, W // ps
    x = jnp.transpose(x_nchw, (0, 2, 3, 1))                          # NHWC
    x = x.reshape(B, gh, ps, gw, ps, Cin)
    x = jnp.transpose(x, (0, 1, 3, 2, 4, 5)).reshape(B * gh * gw, ps * ps * Cin)
    # zero-pad contraction dim to a multiple of 128 for dense MXU fill
    K = x.shape[1]
    Kp = ((K + 127) // 128) * 128
    w = p["w"]
    if Kp != K:
        x = jnp.pad(x, ((0, 0), (0, Kp - K)))
        w = jnp.pad(w, ((0, Kp - K), (0, 0)))
    E = w.shape[-1]
    out = matmul_bias(x, w, p["b"])                                  # bf16
    return out.reshape(B, gh, gw, E)                                 # NHWC bf16


def nest_level(x_nhwc, p, block_size, num_heads, vmem_limit):
    if "convpool" in p:
        x_nhwc = conv_pool(x_nhwc, p["convpool"], vmem_limit)
    x = blockify(x_nhwc, block_size)                                 # (B, T, N, C)
    B, T, N, C = x.shape
    xf = x.reshape(B * T * N, C)
    for li, lp in enumerate(p["layers"]):
        xf = transformer_layer(xf, lp, num_heads, N, T,
                               pos=p["pos_embed"] if li == 0 else None,
                               vmem_limit=vmem_limit)
    x = xf.reshape(B, T, N, C)
    return deblockify(x, block_size)                                 # NHWC bf16


def nest_forward(x, params, cfg):
    vmem_limit = _vmem_limit()
    x = patch_embed(x, params["patch_embed"], cfg["patch_size"])     # NHWC bf16
    for li in range(cfg["num_levels"]):
        x = nest_level(x, params["levels"][li], cfg["block_size"],
                       cfg["num_heads"][li], vmem_limit)
    return norm_pool_head(x, params, cfg["num_classes"])


# --------------------------------------------------------------------------
# deterministic synthetic parameters (shapes follow the PyTorch __init__).
# Matmul weights are stored bf16 and pre-fused:
#   * wqkv (C, 3C): columns [Q | K | V], each head-major (h*d + i); the
#     attention scale head_dim**-0.5 is pre-folded into the Q columns / bqkv;
#   * wproj (C, C): rows head-major (a torch proj.weight is d-major across
#     heads -- permute rows when porting a checkpoint);
#   * convpool w (3, 3*Cin, Cout): row kh, columns ordered (kw, cin)
#     (torch Conv2d weight (Cout,Cin,3,3) -> permute(2,3,1,0).reshape).
# TODO(synk): dropout / drop-path are identity (all rates 0 / inference).
# --------------------------------------------------------------------------
def _normal(key, shape, std=0.02):
    return std * jax.random.normal(key, shape, dtype=jnp.float32)


def init_params(key, cfg):
    img, ps = cfg["img_size"], cfg["patch_size"]
    in_chans, dims = cfg["in_chans"], cfg["embed_dims"]
    heads, depths = cfg["num_heads"], cfg["depths"]
    num_levels, nc = cfg["num_levels"], cfg["num_classes"]
    mlp_ratio = cfg["mlp_ratio"]

    num_blocks = [4 ** i for i in range(num_levels)][::-1]
    cfg["block_size"] = int(img // ps // math.sqrt(num_blocks[0]))
    seq_length = (img // ps) ** 2 // num_blocks[0]

    bf16 = jnp.bfloat16
    keys = iter(jax.random.split(key, 1024))
    params = {
        "patch_embed": dict(
            w=_normal(next(keys), (ps * ps * in_chans, dims[0])).astype(bf16),
            b=_normal(next(keys), (1, dims[0]), std=0.01),
        ),
        "levels": [],
    }
    prev = None
    for li in range(num_levels):
        C, H = dims[li], heads[li]
        hid = int(C * mlp_ratio)
        scale = (C // H) ** -0.5
        qscale = jnp.concatenate(
            [jnp.full((C,), scale, jnp.float32), jnp.ones((2 * C,), jnp.float32)])
        lvl = {}
        if prev is not None:
            lvl["convpool"] = dict(
                w=_normal(next(keys), (3, 3 * prev, C)).astype(bf16),
                b=_normal(next(keys), (1, C), std=0.01),
                ln_g=jnp.ones((1, C), jnp.float32),
                ln_b=jnp.zeros((1, C), jnp.float32),
            )
        lvl["pos_embed"] = _normal(next(keys), (1, num_blocks[li], seq_length, C))
        layers = []
        for _ in range(depths[li]):
            wqkv = _normal(next(keys), (C, 3 * C))
            bqkv = _normal(next(keys), (1, 3 * C), std=0.01)
            layers.append(dict(
                ln1_g=jnp.ones((1, C), jnp.float32),
                ln1_b=jnp.zeros((1, C), jnp.float32),
                wqkv=(wqkv * qscale).astype(bf16),       # scale folded into Q
                bqkv=bqkv * qscale,
                wproj=_normal(next(keys), (C, C)).astype(bf16),
                bproj=_normal(next(keys), (1, C), std=0.01),
                ln2_g=jnp.ones((1, C), jnp.float32),
                ln2_b=jnp.zeros((1, C), jnp.float32),
                w1=_normal(next(keys), (C, hid)).astype(bf16),
                b1=_normal(next(keys), (1, hid), std=0.01),
                w2=_normal(next(keys), (hid, C)).astype(bf16),
                b2=_normal(next(keys), (1, C), std=0.01),
            ))
        lvl["layers"] = layers
        params["levels"].append(lvl)
        prev = C

    Cl = dims[-1]
    params["norm_g"] = jnp.ones((1, Cl), jnp.float32)
    params["norm_b"] = jnp.zeros((1, Cl), jnp.float32)
    params["head_w"] = _normal(next(keys), (Cl, nc))
    params["head_b"] = jnp.zeros((1, nc), jnp.float32)
    return params


if __name__ == "__main__":
    cfg = dict(
        img_size=16, in_chans=3, patch_size=4, num_levels=2,
        embed_dims=(32, 64), num_heads=(2, 4), depths=(1, 1),
        num_classes=10, mlp_ratio=4.0,
    )
    key = jax.random.PRNGKey(0)
    kp, kx = jax.random.split(key)
    params = init_params(kp, cfg)          # also fills cfg["block_size"]
    x = jax.random.normal(
        kx, (2, cfg["in_chans"], cfg["img_size"], cfg["img_size"]),
        dtype=jnp.float32)

    logits = jax.jit(partial(nest_forward, cfg=cfg))(x, params)
    jax.block_until_ready(logits)
    assert logits.shape == (2, cfg["num_classes"])
    print("KERNEL_OK")
</pallas_src>

<mosaic_0001>
module attributes {stable_mosaic.version = 11 : i64} {
  func.func @_matmul_bias_kernel(%arg0: i32, %arg1: memref<32x128xf32, #tpu.memory_space<vmem>>, %arg2: memref<128x32xbf16, #tpu.memory_space<vmem>>, %arg3: memref<1x32xf32, #tpu.memory_space<vmem>>, %arg4: memref<32x32xbf16, #tpu.memory_space<vmem>>) attributes {dimension_semantics = [#tpu.dimension_semantics<parallel>], iteration_bounds = array<i64: 1>, scalar_prefetch = 0 : i64, scratch_operands = 0 : i64, tpu.core_type = #tpu.core_type<tc>, window_params = [{transform_indices = @transform_0, window_bounds = array<i64: 32, 128>}, {pipeline_mode = #tpu.pipeline_mode<synchronous>, transform_indices = @transform_1, window_bounds = array<i64: 128, 32>}, {pipeline_mode = #tpu.pipeline_mode<synchronous>, transform_indices = @transform_2, window_bounds = array<i64: 1, 32>}, {transform_indices = @transform_3, window_bounds = array<i64: 32, 32>}]} {
    %c0 = arith.constant 0 : index
    %c0_0 = arith.constant 0 : index
    %0 = vector.load %arg1[%c0, %c0_0] : memref<32x128xf32, #tpu.memory_space<vmem>>, vector<32x128xf32>
    %1 = arith.truncf %0 : vector<32x128xf32> to vector<32x128xbf16>
    %c0_1 = arith.constant 0 : index
    %c0_2 = arith.constant 0 : index
    %2 = vector.load %arg2[%c0_1, %c0_2] : memref<128x32xbf16, #tpu.memory_space<vmem>>, vector<128x32xbf16>
    %cst = arith.constant dense<0.000000e+00> : vector<32x32xf32>
    %3 = tpu.matmul %1, %2, %cst {dimension_numbers = #tpu.dot_dimension_numbers<[1], [0], [0], [1], [0, 0, 1, 1], [], []>} : vector<32x128xbf16>, vector<128x32xbf16>, vector<32x32xf32> -> vector<32x32xf32>
    %c0_3 = arith.constant 0 : index
    %c0_4 = arith.constant 0 : index
    %4 = vector.load %arg3[%c0_3, %c0_4] : memref<1x32xf32, #tpu.memory_space<vmem>>, vector<1x32xf32>
    %5 = vector.broadcast %4 : vector<1x32xf32> to vector<32x32xf32>
    %6 = arith.addf %3, %5 : vector<32x32xf32>
    %7 = arith.truncf %6 : vector<32x32xf32> to vector<32x32xbf16>
    %c0_5 = arith.constant 0 : index
    %c0_6 = arith.constant 0 : index
    %8 = vector.load %arg4[%c0_5, %c0_6] : memref<32x32xbf16, #tpu.memory_space<vmem>>, vector<32x32xbf16>
    tpu.vector_store %arg4[%c0_5, %c0_6], %7 {strides = array<i32>} : memref<32x32xbf16, #tpu.memory_space<vmem>>, vector<32x32xbf16>,
    return
  }
  func.func @transform_0(%arg0: i32) -> (i32, i32) {
    %c0_i32 = arith.constant 0 : i32
    %c0_i32_0 = arith.constant 0 : i32
    return %arg0, %c0_i32 : i32, i32
  }
  func.func @transform_1(%arg0: i32) -> (i32, i32) {
    %c0_i32 = arith.constant 0 : i32
    %c0_i32_0 = arith.constant 0 : i32
    %c0_i32_1 = arith.constant 0 : i32
    return %c0_i32, %c0_i32_0 : i32, i32
  }
  func.func @transform_2(%arg0: i32) -> (i32, i32) {
    %c0_i32 = arith.constant 0 : i32
    %c0_i32_0 = arith.constant 0 : i32
    %c0_i32_1 = arith.constant 0 : i32
    return %c0_i32, %c0_i32_0 : i32, i32
  }
  func.func @transform_3(%arg0: i32) -> (i32, i32) {
    %c0_i32 = arith.constant 0 : i32
    %c0_i32_0 = arith.constant 0 : i32
    return %arg0, %c0_i32 : i32, i32
  }
}

module attributes {stable_mosaic.version = 11 : i64} {
  func.func @_transformer_layer_kernel(%arg0: i32, %arg1: memref<32x32xbf16, #tpu.memory_space<vmem>>, %arg2: memref<16x32xf32, #tpu.memory_space<vmem>>, %arg3: memref<1x32xf32, #tpu.memory_space<vmem>>, %arg4: memref<1x32xf32, #tpu.memory_space<vmem>>, %arg5: memref<32x96xbf16, #tpu.memory_space<vmem>>, %arg6: memref<1x96xf32, #tpu.memory_space<vmem>>, %arg7: memref<32x32xbf16, #tpu.memory_space<vmem>>, %arg8: memref<1x32xf32, #tpu.memory_space<vmem>>, %arg9: memref<1x32xf32, #tpu.memory_space<vmem>>, %arg10: memref<1x32xf32, #tpu.memory_space<vmem>>, %arg11: memref<32x128xbf16, #tpu.memory_space<vmem>>, %arg12: memref<1x128xf32, #tpu.memory_space<vmem>>, %arg13: memref<128x32xbf16, #tpu.memory_space<vmem>>, %arg14: memref<1x32xf32, #tpu.memory_space<vmem>>, %arg15: memref<32x32xbf16, #tpu.memory_space<vmem>>) attributes {dimension_semantics = [#tpu.dimension_semantics<parallel>], iteration_bounds = array<i64: 1>, scalar_prefetch = 0 : i64, scratch_operands = 0 : i64, tpu.core_type = #tpu.core_type<tc>, window_params = [{transform_indices = @transform_0, window_bounds = array<i64: 32, 32>}, {pipeline_mode = #tpu.pipeline_mode<synchronous>, transform_indices = @transform_1, window_bounds = array<i64: 16, 32>}, {pipeline_mode = #tpu.pipeline_mode<synchronous>, transform_indices = @transform_2, window_bounds = array<i64: 1, 32>}, {pipeline_mode = #tpu.pipeline_mode<synchronous>, transform_indices = @transform_3, window_bounds = array<i64: 1, 32>}, {pipeline_mode = #tpu.pipeline_mode<synchronous>, transform_indices = @transform_4, window_bounds = array<i64: 32, 96>}, {pipeline_mode = #tpu.pipeline_mode<synchronous>, transform_indices = @transform_5, window_bounds = array<i64: 1, 96>}, {pipeline_mode = #tpu.pipeline_mode<synchronous>, transform_indices = @transform_6, window_bounds = array<i64: 32, 32>}, {pipeline_mode = #tpu.pipeline_mode<synchronous>, transform_indices = @transform_7, window_bounds = array<i64: 1, 32>}, {pipeline_mode = #tpu.pipeline_mode<synchronous>, transform_indices = @transform_8, window_bounds = array<i64: 1, 32>}, {pipeline_mode = #tpu.pipeline_mode<synchronous>, transform_indices = @transform_9, window_bounds = array<i64: 1, 32>}, {pipeline_mode = #tpu.pipeline_mode<synchronous>, transform_indices = @transform_10, window_bounds = array<i64: 32, 128>}, {pipeline_mode = #tpu.pipeline_mode<synchronous>, transform_indices = @transform_11, window_bounds = array<i64: 1, 128>}, {pipeline_mode = #tpu.pipeline_mode<synchronous>, transform_indices = @transform_12, window_bounds = array<i64: 128, 32>}, {pipeline_mode = #tpu.pipeline_mode<synchronous>, transform_indices = @transform_13, window_bounds = array<i64: 1, 32>}, {transform_indices = @transform_14, window_bounds = array<i64: 32, 32>}]} {
    %c0 = arith.constant 0 : index
    %c0_0 = arith.constant 0 : index
    %0 = vector.load %arg1[%c0, %c0_0] : memref<32x32xbf16, #tpu.memory_space<vmem>>, vector<32x32xbf16>
    %1 = arith.extf %0 : vector<32x32xbf16> to vector<32x32xf32>
    %2 = vector.shape_cast %1 : vector<32x32xf32> to vector<2x16x32xf32>
    %c0_1 = arith.constant 0 : index
    %c0_2 = arith.constant 0 : index
    %3 = vector.load %arg2[%c0_1, %c0_2] : memref<16x32xf32, #tpu.memory_space<vmem>>, vector<16x32xf32>
    %4 = vector.shape_cast %3 : vector<16x32xf32> to vector<1x16x32xf32>
    %5 = vector.broadcast %4 : vector<1x16x32xf32> to vector<2x16x32xf32>
    %6 = arith.addf %2, %5 : vector<2x16x32xf32>
    %7 = vector.shape_cast %6 : vector<2x16x32xf32> to vector<32x32xf32>
    %c0_3 = arith.constant 0 : index
    %c0_4 = arith.constant 0 : index
    %8 = vector.load %arg3[%c0_3, %c0_4] : memref<1x32xf32, #tpu.memory_space<vmem>>, vector<1x32xf32>
    %c0_5 = arith.constant 0 : index
    %c0_6 = arith.constant 0 : index
    %9 = vector.load %arg4[%c0_5, %c0_6] : memref<1x32xf32, #tpu.memory_space<vmem>>, vector<1x32xf32>
    %cst = arith.constant dense<0.000000e+00> : vector<32xf32>
    %10 = vector.multi_reduction <add>, %7, %cst [1] : vector<32x32xf32> to vector<32xf32>
    %11 = vector.shape_cast %10 : vector<32xf32> to vector<32x1xf32>
    %cst_7 = arith.constant 3.200000e+01 : f32
    %12 = vector.broadcast %cst_7 : f32 to vector<32x1xf32>
    %13 = arith.divf %11, %12 : vector<32x1xf32>
    %14 = vector.broadcast %13 : vector<32x1xf32> to vector<32x32xf32>
    %15 = arith.subf %7, %14 : vector<32x32xf32>
    %16 = arith.mulf %15, %15 : vector<32x32xf32>
    %cst_8 = arith.constant dense<0.000000e+00> : vector<32xf32>
    %17 = vector.multi_reduction <add>, %16, %cst_8 [1] : vector<32x32xf32> to vector<32xf32>
    %18 = vector.shape_cast %17 : vector<32xf32> to vector<32x1xf32>
    %cst_9 = arith.constant 3.200000e+01 : f32
    %19 = vector.broadcast %cst_9 : f32 to vector<32x1xf32>
    %20 = arith.divf %18, %19 : vector<32x1xf32>
    %21 = vector.broadcast %13 : vector<32x1xf32> to vector<32x32xf32>
    %22 = arith.subf %7, %21 : vector<32x32xf32>
    %cst_10 = arith.constant 9.99999997E-7 : f32
    %23 = vector.broadcast %cst_10 : f32 to vector<32x1xf32>
    %24 = arith.addf %20, %23 : vector<32x1xf32>
    %25 = math.rsqrt %24 : vector<32x1xf32>
    %26 = vector.broadcast %25 : vector<32x1xf32> to vector<32x32xf32>
    %27 = arith.mulf %22, %26 : vector<32x32xf32>
    %28 = vector.broadcast %8 : vector<1x32xf32> to vector<32x32xf32>
    %29 = arith.mulf %27, %28 : vector<32x32xf32>
    %30 = vector.broadcast %9 : vector<1x32xf32> to vector<32x32xf32>
    %31 = arith.addf %29, %30 : vector<32x32xf32>
    %32 = arith.truncf %31 : vector<32x32xf32> to vector<32x32xbf16>
    %c0_11 = arith.constant 0 : index
    %c0_12 = arith.constant 0 : index
    %33 = vector.load %arg5[%c0_11, %c0_12] : memref<32x96xbf16, #tpu.memory_space<vmem>>, vector<32x96xbf16>
    %cst_13 = arith.constant dense<0.000000e+00> : vector<32x96xf32>
    %34 = tpu.matmul %32, %33, %cst_13 {dimension_numbers = #tpu.dot_dimension_numbers<[1], [0], [0], [1], [0, 0, 1, 1], [], []>} : vector<32x32xbf16>, vector<32x96xbf16>, vector<32x96xf32> -> vector<32x96xf32>
    %c0_14 = arith.constant 0 : index
    %c0_15 = arith.constant 0 : index
    %35 = vector.load %arg6[%c0_14, %c0_15] : memref<1x96xf32, #tpu.memory_space<vmem>>, vector<1x96xf32>
    %36 = vector.broadcast %35 : vector<1x96xf32> to vector<32x96xf32>
    %37 = arith.addf %34, %36 : vector<32x96xf32>
    %38 = vector.extract_strided_slice %37 {offsets = [0, 0], sizes = [32, 16], strides = [1, 1]} : vector<32x96xf32> to vector<32x16xf32>
    %39 = vector.shape_cast %38 : vector<32x16xf32> to vector<8x4x16xf32>
    %40 = vector.extract_strided_slice %37 {offsets = [0, 32], sizes = [32, 16], strides = [1, 1]} : vector<32x96xf32> to vector<32x16xf32>
    %41 = vector.shape_cast %40 : vector<32x16xf32> to vector<8x4x16xf32>
    %42 = vector.extract_strided_slice %37 {offsets = [0, 64], sizes = [32, 16], strides = [1, 1]} : vector<32x96xf32> to vector<32x16xf32>
    %43 = vector.shape_cast %42 : vector<32x16xf32> to vector<8x4x16xf32>
    %44 = arith.truncf %39 : vector<8x4x16xf32> to vector<8x4x16xbf16>
    %45 = arith.truncf %41 : vector<8x4x16xf32> to vector<8x4x16xbf16>
    "tpu.trace_start"() <{level = 10 : i32, message = "gnd,gmd->gnm"}> : () -> ()
    %cst_16 = arith.constant dense<0.000000e+00> : vector<8x4x4xf32>
    %46 = tpu.matmul %44, %45, %cst_16 {dimension_numbers = #tpu.dot_dimension_numbers<[2], [2], [1], [1], [0, 0, 0, 1, 1, 1], [0], [0]>} : vector<8x4x16xbf16>, vector<8x4x16xbf16>, vector<8x4x4xf32> -> vector<8x4x4xf32>
    "tpu.trace_stop"() : () -> ()
    %cst_17 = arith.constant dense<0xFF800000> : vector<8x4xf32>
    %47 = vector.multi_reduction <maximumf>, %46, %cst_17 [2] : vector<8x4x4xf32> to vector<8x4xf32>
    %48 = vector.shape_cast %47 : vector<8x4xf32> to vector<8x4x1xf32>
    %49 = vector.broadcast %48 : vector<8x4x1xf32> to vector<8x4x4xf32>
    %50 = arith.subf %46, %49 : vector<8x4x4xf32>
    %51 = math.exp %50 : vector<8x4x4xf32>
    %cst_18 = arith.constant dense<0.000000e+00> : vector<8x4xf32>
    %52 = vector.multi_reduction <add>, %51, %cst_18 [2] : vector<8x4x4xf32> to vector<8x4xf32>
    %53 = vector.shape_cast %52 : vector<8x4xf32> to vector<8x4x1xf32>
    %54 = tpu.reciprocal %53 {approx = true} : vector<8x4x1xf32> -> vector<8x4x1xf32>
    %55 = vector.broadcast %54 : vector<8x4x1xf32> to vector<8x4x4xf32>
    %56 = arith.mulf %51, %55 : vector<8x4x4xf32>
    %57 = arith.truncf %56 : vector<8x4x4xf32> to vector<8x4x4xbf16>
    %58 = arith.truncf %43 : vector<8x4x16xf32> to vector<8x4x16xbf16>
    "tpu.trace_start"() <{level = 10 : i32, message = "gnm,gmd->gnd"}> : () -> ()
    %cst_19 = arith.constant dense<0.000000e+00> : vector<8x4x16xf32>
    %59 = tpu.matmul %57, %58, %cst_19 {dimension_numbers = #tpu.dot_dimension_numbers<[2], [1], [1], [2], [0, 0, 0, 1, 1, 2], [0], [0]>} : vector<8x4x4xbf16>, vector<8x4x16xbf16>, vector<8x4x16xf32> -> vector<8x4x16xf32>
    "tpu.trace_stop"() : () -> ()
    %60 = vector.shape_cast %59 : vector<8x4x16xf32> to vector<32x16xf32>
    %61 = vector.extract_strided_slice %37 {offsets = [0, 16], sizes = [32, 16], strides = [1, 1]} : vector<32x96xf32> to vector<32x16xf32>
    %62 = vector.shape_cast %61 : vector<32x16xf32> to vector<8x4x16xf32>
    %63 = vector.extract_strided_slice %37 {offsets = [0, 48], sizes = [32, 16], strides = [1, 1]} : vector<32x96xf32> to vector<32x16xf32>
    %64 = vector.shape_cast %63 : vector<32x16xf32> to vector<8x4x16xf32>
    %65 = vector.extract_strided_slice %37 {offsets = [0, 80], sizes = [32, 16], strides = [1, 1]} : vector<32x96xf32> to vector<32x16xf32>
    %66 = vector.shape_cast %65 : vector<32x16xf32> to vector<8x4x16xf32>
    %67 = arith.truncf %62 : vector<8x4x16xf32> to vector<8x4x16xbf16>
    %68 = arith.truncf %64 : vector<8x4x16xf32> to vector<8x4x16xbf16>
    "tpu.trace_start"() <{level = 10 : i32, message = "gnd,gmd->gnm"}> : () -> ()
    %cst_20 = arith.constant dense<0.000000e+00> : vector<8x4x4xf32>
    %69 = tpu.matmul %67, %68, %cst_20 {dimension_numbers = #tpu.dot_dimension_numbers<[2], [2], [1], [1], [0, 0, 0, 1, 1, 1], [0], [0]>} : vector<8x4x16xbf16>, vector<8x4x16xbf16>, vector<8x4x4xf32> -> vector<8x4x4xf32>
    "tpu.trace_stop"() : () -> ()
    %cst_21 = arith.constant dense<0xFF800000> : vector<8x4xf32>
    %70 = vector.multi_reduction <maximumf>, %69, %cst_21 [2] : vector<8x4x4xf32> to vector<8x4xf32>
    %71 = vector.shape_cast %70 : vector<8x4xf32> to vector<8x4x1xf32>
    %72 = vector.broadcast %71 : vector<8x4x1xf32> to vector<8x4x4xf32>
    %73 = arith.subf %69, %72 : vector<8x4x4xf32>
    %74 = math.exp %73 : vector<8x4x4xf32>
    %cst_22 = arith.constant dense<0.000000e+00> : vector<8x4xf32>
    %75 = vector.multi_reduction <add>, %74, %cst_22 [2] : vector<8x4x4xf32> to vector<8x4xf32>
    %76 = vector.shape_cast %75 : vector<8x4xf32> to vector<8x4x1xf32>
    %77 = tpu.reciprocal %76 {approx = true} : vector<8x4x1xf32> -> vector<8x4x1xf32>
    %78 = vector.broadcast %77 : vector<8x4x1xf32> to vector<8x4x4xf32>
    %79 = arith.mulf %74, %78 : vector<8x4x4xf32>
    %80 = arith.truncf %79 : vector<8x4x4xf32> to vector<8x4x4xbf16>
    %81 = arith.truncf %66 : vector<8x4x16xf32> to vector<8x4x16xbf16>
    "tpu.trace_start"() <{level = 10 : i32, message = "gnm,gmd->gnd"}> : () -> ()
    %cst_23 = arith.constant dense<0.000000e+00> : vector<8x4x16xf32>
    %82 = tpu.matmul %80, %81, %cst_23 {dimension_numbers = #tpu.dot_dimension_numbers<[2], [1], [1], [2], [0, 0, 0, 1, 1, 2], [0], [0]>} : vector<8x4x4xbf16>, vector<8x4x16xbf16>, vector<8x4x16xf32> -> vector<8x4x16xf32>
    "tpu.trace_stop"() : () -> ()
    %83 = vector.shape_cast %82 : vector<8x4x16xf32> to vector<32x16xf32>
    %84 = tpu.concatenate %60, %83 in 1 : vector<32x16xf32>, vector<32x16xf32> -> vector<32x32xf32>
    %85 = arith.truncf %84 : vector<32x32xf32> to vector<32x32xbf16>
    %c0_24 = arith.constant 0 : index
    %c0_25 = arith.constant 0 : index
    %86 = vector.load %arg7[%c0_24, %c0_25] : memref<32x32xbf16, #tpu.memory_space<vmem>>, vector<32x32xbf16>
    %cst_26 = arith.constant dense<0.000000e+00> : vector<32x32xf32>
    %87 = tpu.matmul %85, %86, %cst_26 {dimension_numbers = #tpu.dot_dimension_numbers<[1], [0], [0], [1], [0, 0, 1, 1], [], []>} : vector<32x32xbf16>, vector<32x32xbf16>, vector<32x32xf32> -> vector<32x32xf32>
    %c0_27 = arith.constant 0 : index
    %c0_28 = arith.constant 0 : index
    %88 = vector.load %arg8[%c0_27, %c0_28] : memref<1x32xf32, #tpu.memory_space<vmem>>, vector<1x32xf32>
    %89 = vector.broadcast %88 : vector<1x32xf32> to vector<32x32xf32>
    %90 = arith.addf %87, %89 : vector<32x32xf32>
    %91 = arith.addf %7, %90 : vector<32x32xf32>
    %c0_29 = arith.constant 0 : index
    %c0_30 = arith.constant 0 : index
    %92 = vector.load %arg9[%c0_29, %c0_30] : memref<1x32xf32, #tpu.memory_space<vmem>>, vector<1x32xf32>
    %c0_31 = arith.constant 0 : index
    %c0_32 = arith.constant 0 : index
    %93 = vector.load %arg10[%c0_31, %c0_32] : memref<1x32xf32, #tpu.memory_space<vmem>>, vector<1x32xf32>
    %cst_33 = arith.constant dense<0.000000e+00> : vector<32xf32>
    %94 = vector.multi_reduction <add>, %91, %cst_33 [1] : vector<32x32xf32> to vector<32xf32>
    %95 = vector.shape_cast %94 : vector<32xf32> to vector<32x1xf32>
    %cst_34 = arith.constant 3.200000e+01 : f32
    %96 = vector.broadcast %cst_34 : f32 to vector<32x1xf32>
    %97 = arith.divf %95, %96 : vector<32x1xf32>
    %98 = vector.broadcast %97 : vector<32x1xf32> to vector<32x32xf32>
    %99 = arith.subf %91, %98 : vector<32x32xf32>
    %100 = arith.mulf %99, %99 : vector<32x32xf32>
    %cst_35 = arith.constant dense<0.000000e+00> : vector<32xf32>
    %101 = vector.multi_reduction <add>, %100, %cst_35 [1] : vector<32x32xf32> to vector<32xf32>
    %102 = vector.shape_cast %101 : vector<32xf32> to vector<32x1xf32>
    %cst_36 = arith.constant 3.200000e+01 : f32
    %103 = vector.broadcast %cst_36 : f32 to vector<32x1xf32>
    %104 = arith.divf %102, %103 : vector<32x1xf32>
    %105 = vector.broadcast %97 : vector<32x1xf32> to vector<32x32xf32>
    %106 = arith.subf %91, %105 : vector<32x32xf32>
    %cst_37 = arith.constant 9.99999997E-7 : f32
    %107 = vector.broadcast %cst_37 : f32 to vector<32x1xf32>
    %108 = arith.addf %104, %107 : vector<32x1xf32>
    %109 = math.rsqrt %108 : vector<32x1xf32>
    %110 = vector.broadcast %109 : vector<32x1xf32> to vector<32x32xf32>
    %111 = arith.mulf %106, %110 : vector<32x32xf32>
    %112 = vector.broadcast %92 : vector<1x32xf32> to vector<32x32xf32>
    %113 = arith.mulf %111, %112 : vector<32x32xf32>
    %114 = vector.broadcast %93 : vector<1x32xf32> to vector<32x32xf32>
    %115 = arith.addf %113, %114 : vector<32x32xf32>
    %116 = arith.truncf %115 : vector<32x32xf32> to vector<32x32xbf16>
    %c0_38 = arith.constant 0 : index
    %c0_39 = arith.constant 0 : index
    %117 = vector.load %arg11[%c0_38, %c0_39] : memref<32x128xbf16, #tpu.memory_space<vmem>>, vector<32x128xbf16>
    %cst_40 = arith.constant dense<0.000000e+00> : vector<32x128xf32>
    %118 = tpu.matmul %116, %117, %cst_40 {dimension_numbers = #tpu.dot_dimension_numbers<[1], [0], [0], [1], [0, 0, 1, 1], [], []>} : vector<32x32xbf16>, vector<32x128xbf16>, vector<32x128xf32> -> vector<32x128xf32>
    %c0_41 = arith.constant 0 : index
    %c0_42 = arith.constant 0 : index
    %119 = vector.load %arg12[%c0_41, %c0_42] : memref<1x128xf32, #tpu.memory_space<vmem>>, vector<1x128xf32>
    %120 = vector.broadcast %119 : vector<1x128xf32> to vector<32x128xf32>
    %121 = arith.addf %118, %120 : vector<32x128xf32>
    %cst_43 = arith.constant 0.707106769 : f32
    %122 = vector.broadcast %cst_43 : f32 to vector<32x128xf32>
    %123 = arith.mulf %121, %122 : vector<32x128xf32>
    %cst_44 = arith.constant 0.000000e+00 : f32
    %124 = vector.broadcast %cst_44 : f32 to vector<32x128xf32>
    %125 = arith.cmpf oge, %123, %124 : vector<32x128xf32>
    %cst_45 = arith.constant 1.000000e+00 : f32
    %cst_46 = arith.constant -1.000000e+00 : f32
    %126 = vector.broadcast %cst_45 : f32 to vector<32x128xf32>
    %127 = vector.broadcast %cst_46 : f32 to vector<32x128xf32>
    %128 = arith.select %125, %126, %127 : vector<32x128xi1>, vector<32x128xf32>
    %129 = math.absf %123 : vector<32x128xf32>
    %cst_47 = arith.constant 0.327591091 : f32
    %130 = vector.broadcast %cst_47 : f32 to vector<32x128xf32>
    %131 = arith.mulf %130, %129 : vector<32x128xf32>
    %cst_48 = arith.constant 1.000000e+00 : f32
    %132 = vector.broadcast %cst_48 : f32 to vector<32x128xf32>
    %133 = arith.addf %132, %131 : vector<32x128xf32>
    %cst_49 = arith.constant 1.000000e+00 : f32
    %134 = vector.broadcast %cst_49 : f32 to vector<32x128xf32>
    %135 = arith.divf %134, %133 : vector<32x128xf32>
    %cst_50 = arith.constant 1.06140542 : f32
    %136 = vector.broadcast %cst_50 : f32 to vector<32x128xf32>
    %137 = arith.mulf %136, %135 : vector<32x128xf32>
    %cst_51 = arith.constant 1.45315206 : f32
    %138 = vector.broadcast %cst_51 : f32 to vector<32x128xf32>
    %139 = arith.subf %137, %138 : vector<32x128xf32>
    %140 = arith.mulf %139, %135 : vector<32x128xf32>
    %cst_52 = arith.constant 1.42141378 : f32
    %141 = vector.broadcast %cst_52 : f32 to vector<32x128xf32>
    %142 = arith.addf %140, %141 : vector<32x128xf32>
    %143 = arith.mulf %142, %135 : vector<32x128xf32>
    %cst_53 = arith.constant 0.284496725 : f32
    %144 = vector.broadcast %cst_53 : f32 to vector<32x128xf32>
    %145 = arith.subf %143, %144 : vector<32x128xf32>
    %146 = arith.mulf %145, %135 : vector<32x128xf32>
    %cst_54 = arith.constant 0.254829586 : f32
    %147 = vector.broadcast %cst_54 : f32 to vector<32x128xf32>
    %148 = arith.addf %146, %147 : vector<32x128xf32>
    %149 = arith.mulf %148, %135 : vector<32x128xf32>
    %cst_55 = arith.constant 0.000000e+00 : f32
    %150 = vector.broadcast %cst_55 : f32 to vector<32x128xf32>
    %151 = arith.subf %150, %129 : vector<32x128xf32>
    %152 = arith.mulf %151, %129 : vector<32x128xf32>
    %153 = math.exp %152 : vector<32x128xf32>
    %154 = arith.mulf %149, %153 : vector<32x128xf32>
    %cst_56 = arith.constant 1.000000e+00 : f32
    %155 = vector.broadcast %cst_56 : f32 to vector<32x128xf32>
    %156 = arith.subf %155, %154 : vector<32x128xf32>
    %157 = arith.mulf %128, %156 : vector<32x128xf32>
    %cst_57 = arith.constant 5.000000e-01 : f32
    %158 = vector.broadcast %cst_57 : f32 to vector<32x128xf32>
    %159 = arith.mulf %158, %121 : vector<32x128xf32>
    %cst_58 = arith.constant 1.000000e+00 : f32
    %160 = vector.broadcast %cst_58 : f32 to vector<32x128xf32>
    %161 = arith.addf %160, %157 : vector<32x128xf32>
    %162 = arith.mulf %159, %161 : vector<32x128xf32>
    %163 = arith.truncf %162 : vector<32x128xf32> to vector<32x128xbf16>
    %c0_59 = arith.constant 0 : index
    %c0_60 = arith.constant 0 : index
    %164 = vector.load %arg13[%c0_59, %c0_60] : memref<128x32xbf16, #tpu.memory_space<vmem>>, vector<128x32xbf16>
    %cst_61 = arith.constant dense<0.000000e+00> : vector<32x32xf32>
    %165 = tpu.matmul %163, %164, %cst_61 {dimension_numbers = #tpu.dot_dimension_numbers<[1], [0], [0], [1], [0, 0, 1, 1], [], []>} : vector<32x128xbf16>, vector<128x32xbf16>, vector<32x32xf32> -> vector<32x32xf32>
    %c0_62 = arith.constant 0 : index
    %c0_63 = arith.constant 0 : index
    %166 = vector.load %arg14[%c0_62, %c0_63] : memref<1x32xf32, #tpu.memory_space<vmem>>, vector<1x32xf32>
    %167 = vector.broadcast %166 : vector<1x32xf32> to vector<32x32xf32>
    %168 = arith.addf %165, %167 : vector<32x32xf32>
    %169 = arith.addf %91, %168 : vector<32x32xf32>
    %170 = arith.truncf %169 : vector<32x32xf32> to vector<32x32xbf16>
    %c0_64 = arith.constant 0 : index
    %c0_65 = arith.constant 0 : index
    %171 = vector.load %arg15[%c0_64, %c0_65] : memref<32x32xbf16, #tpu.memory_space<vmem>>, vector<32x32xbf16>
    tpu.vector_store %arg15[%c0_64, %c0_65], %170 {strides = array<i32>} : memref<32x32xbf16, #tpu.memory_space<vmem>>, vector<32x32xbf16>,
    return
  }
  func.func @transform_0(%arg0: i32) -> (i32, i32) {
    %c0_i32 = arith.constant 0 : i32
    %c0_i32_0 = arith.constant 0 : i32
    return %arg0, %c0_i32 : i32, i32
  }
  func.func @transform_1(%arg0: i32) -> (i32, i32) {
    %c0_i32 = arith.constant 0 : i32
    %c0_i32_0 = arith.constant 0 : i32
    %c0_i32_1 = arith.constant 0 : i32
    return %c0_i32, %c0_i32_0 : i32, i32
  }
  func.func @transform_2(%arg0: i32) -> (i32, i32) {
    %c0_i32 = arith.constant 0 : i32
    %c0_i32_0 = arith.constant 0 : i32
    %c0_i32_1 = arith.constant 0 : i32
    return %c0_i32, %c0_i32_0 : i32, i32
  }
  func.func @transform_3(%arg0: i32) -> (i32, i32) {
    %c0_i32 = arith.constant 0 : i32
    %c0_i32_0 = arith.constant 0 : i32
    %c0_i32_1 = arith.constant 0 : i32
    return %c0_i32, %c0_i32_0 : i32, i32
  }
  func.func @transform_4(%arg0: i32) -> (i32, i32) {
    %c0_i32 = arith.constant 0 : i32
    %c0_i32_0 = arith.constant 0 : i32
    %c0_i32_1 = arith.constant 0 : i32
    return %c0_i32, %c0_i32_0 : i32, i32
  }
  func.func @transform_5(%arg0: i32) -> (i32, i32) {
    %c0_i32 = arith.constant 0 : i32
    %c0_i32_0 = arith.constant 0 : i32
    %c0_i32_1 = arith.constant 0 : i32
    return %c0_i32, %c0_i32_0 : i32, i32
  }
  func.func @transform_6(%arg0: i32) -> (i32, i32) {
    %c0_i32 = arith.constant 0 : i32
    %c0_i32_0 = arith.constant 0 : i32
    %c0_i32_1 = arith.constant 0 : i32
    return %c0_i32, %c0_i32_0 : i32, i32
  }
  func.func @transform_7(%arg0: i32) -> (i32, i32) {
    %c0_i32 = arith.constant 0 : i32
    %c0_i32_0 = arith.constant 0 : i32
    %c0_i32_1 = arith.constant 0 : i32
    return %c0_i32, %c0_i32_0 : i32, i32
  }
  func.func @transform_8(%arg0: i32) -> (i32, i32) {
    %c0_i32 = arith.constant 0 : i32
    %c0_i32_0 = arith.constant 0 : i32
    %c0_i32_1 = arith.constant 0 : i32
    return %c0_i32, %c0_i32_0 : i32, i32
  }
  func.func @transform_9(%arg0: i32) -> (i32, i32) {
    %c0_i32 = arith.constant 0 : i32
    %c0_i32_0 = arith.constant 0 : i32
    %c0_i32_1 = arith.constant 0 : i32
    return %c0_i32, %c0_i32_0 : i32, i32
  }
  func.func @transform_10(%arg0: i32) -> (i32, i32) {
    %c0_i32 = arith.constant 0 : i32
    %c0_i32_0 = arith.constant 0 : i32
    %c0_i32_1 = arith.constant 0 : i32
    return %c0_i32, %c0_i32_0 : i32, i32
  }
  func.func @transform_11(%arg0: i32) -> (i32, i32) {
    %c0_i32 = arith.constant 0 : i32
    %c0_i32_0 = arith.constant 0 : i32
    %c0_i32_1 = arith.constant 0 : i32
    return %c0_i32, %c0_i32_0 : i32, i32
  }
  func.func @transform_12(%arg0: i32) -> (i32, i32) {
    %c0_i32 = arith.constant 0 : i32
    %c0_i32_0 = arith.constant 0 : i32
    %c0_i32_1 = arith.constant 0 : i32
    return %c0_i32, %c0_i32_0 : i32, i32
  }
  func.func @transform_13(%arg0: i32) -> (i32, i32) {
    %c0_i32 = arith.constant 0 : i32
    %c0_i32_0 = arith.constant 0 : i32
    %c0_i32_1 = arith.constant 0 : i32
    return %c0_i32, %c0_i32_0 : i32, i32
  }
  func.func @transform_14(%arg0: i32) -> (i32, i32) {
    %c0_i32 = arith.constant 0 : i32
    %c0_i32_0 = arith.constant 0 : i32
    return %arg0, %c0_i32 : i32, i32
  }
}

module attributes {stable_mosaic.version = 11 : i64} {
  func.func @_convpool_kernel(%arg0: i32, %arg1: memref<1x24x96xbf16, #tpu.memory_space<vmem>>, %arg2: memref<3x96x64xbf16, #tpu.memory_space<vmem>>, %arg3: memref<1x64xf32, #tpu.memory_space<vmem>>, %arg4: memref<1x64xf32, #tpu.memory_space<vmem>>, %arg5: memref<1x64xf32, #tpu.memory_space<vmem>>, %arg6: memref<1x2x2x64xbf16, #tpu.memory_space<vmem>>) attributes {dimension_semantics = [#tpu.dimension_semantics<parallel>], iteration_bounds = array<i64: 2>, scalar_prefetch = 0 : i64, scratch_operands = 0 : i64, tpu.core_type = #tpu.core_type<tc>, window_params = [{transform_indices = @transform_0, window_bounds = array<i64: 1, 24, 96>}, {pipeline_mode = #tpu.pipeline_mode<synchronous>, transform_indices = @transform_1, window_bounds = array<i64: 3, 96, 64>}, {pipeline_mode = #tpu.pipeline_mode<synchronous>, transform_indices = @transform_2, window_bounds = array<i64: 1, 64>}, {pipeline_mode = #tpu.pipeline_mode<synchronous>, transform_indices = @transform_3, window_bounds = array<i64: 1, 64>}, {pipeline_mode = #tpu.pipeline_mode<synchronous>, transform_indices = @transform_4, window_bounds = array<i64: 1, 64>}, {transform_indices = @transform_5, window_bounds = array<i64: 1, 2, 2, 64>}]} {
    %cst = arith.constant 0.000000e+00 : f32
    %0 = vector.broadcast %cst : f32 to vector<16x64xf32>
    %c0 = arith.constant 0 : index
    %c0_0 = arith.constant 0 : index
    %c0_1 = arith.constant 0 : index
    %1 = vector.load %arg1[%c0, %c0_0, %c0_1] : memref<1x24x96xbf16, #tpu.memory_space<vmem>>, vector<1x16x96xbf16>
    %2 = vector.shape_cast %1 : vector<1x16x96xbf16> to vector<16x96xbf16>
    %c0_2 = arith.constant 0 : index
    %c0_3 = arith.constant 0 : index
    %c0_4 = arith.constant 0 : index
    %3 = vector.load %arg2[%c0_2, %c0_3, %c0_4] : memref<3x96x64xbf16, #tpu.memory_space<vmem>>, vector<1x96x64xbf16>
    %4 = vector.shape_cast %3 : vector<1x96x64xbf16> to vector<96x64xbf16>
    %cst_5 = arith.constant dense<0.000000e+00> : vector<16x64xf32>
    %5 = tpu.matmul %2, %4, %cst_5 {dimension_numbers = #tpu.dot_dimension_numbers<[1], [0], [0], [1], [0, 0, 1, 1], [], []>} : vector<16x96xbf16>, vector<96x64xbf16>, vector<16x64xf32> -> vector<16x64xf32>
    %6 = arith.addf %0, %5 : vector<16x64xf32>
    %c0_6 = arith.constant 0 : index
    %c4 = arith.constant 4 : index
    %c0_7 = arith.constant 0 : index
    %7 = vector.load %arg1[%c0_6, %c4, %c0_7] : memref<1x24x96xbf16, #tpu.memory_space<vmem>>, vector<1x16x96xbf16>
    %8 = vector.shape_cast %7 : vector<1x16x96xbf16> to vector<16x96xbf16>
    %c1 = arith.constant 1 : index
    %c0_8 = arith.constant 0 : index
    %c0_9 = arith.constant 0 : index
    %9 = vector.load %arg2[%c1, %c0_8, %c0_9] : memref<3x96x64xbf16, #tpu.memory_space<vmem>>, vector<1x96x64xbf16>
    %10 = vector.shape_cast %9 : vector<1x96x64xbf16> to vector<96x64xbf16>
    %cst_10 = arith.constant dense<0.000000e+00> : vector<16x64xf32>
    %11 = tpu.matmul %8, %10, %cst_10 {dimension_numbers = #tpu.dot_dimension_numbers<[1], [0], [0], [1], [0, 0, 1, 1], [], []>} : vector<16x96xbf16>, vector<96x64xbf16>, vector<16x64xf32> -> vector<16x64xf32>
    %12 = arith.addf %6, %11 : vector<16x64xf32>
    %c0_11 = arith.constant 0 : index
    %c8 = arith.constant 8 : index
    %c0_12 = arith.constant 0 : index
    %13 = vector.load %arg1[%c0_11, %c8, %c0_12] : memref<1x24x96xbf16, #tpu.memory_space<vmem>>, vector<1x16x96xbf16>
    %14 = vector.shape_cast %13 : vector<1x16x96xbf16> to vector<16x96xbf16>
    %c2 = arith.constant 2 : index
    %c0_13 = arith.constant 0 : index
    %c0_14 = arith.constant 0 : index
    %15 = vector.load %arg2[%c2, %c0_13, %c0_14] : memref<3x96x64xbf16, #tpu.memory_space<vmem>>, vector<1x96x64xbf16>
    %16 = vector.shape_cast %15 : vector<1x96x64xbf16> to vector<96x64xbf16>
    %cst_15 = arith.constant dense<0.000000e+00> : vector<16x64xf32>
    %17 = tpu.matmul %14, %16, %cst_15 {dimension_numbers = #tpu.dot_dimension_numbers<[1], [0], [0], [1], [0, 0, 1, 1], [], []>} : vector<16x96xbf16>, vector<96x64xbf16>, vector<16x64xf32> -> vector<16x64xf32>
    %18 = arith.addf %12, %17 : vector<16x64xf32>
    %c0_16 = arith.constant 0 : index
    %c0_17 = arith.constant 0 : index
    %19 = vector.load %arg3[%c0_16, %c0_17] : memref<1x64xf32, #tpu.memory_space<vmem>>, vector<1x64xf32>
    %20 = vector.broadcast %19 : vector<1x64xf32> to vector<16x64xf32>
    %21 = arith.addf %18, %20 : vector<16x64xf32>
    %c0_18 = arith.constant 0 : index
    %c0_19 = arith.constant 0 : index
    %22 = vector.load %arg4[%c0_18, %c0_19] : memref<1x64xf32, #tpu.memory_space<vmem>>, vector<1x64xf32>
    %c0_20 = arith.constant 0 : index
    %c0_21 = arith.constant 0 : index
    %23 = vector.load %arg5[%c0_20, %c0_21] : memref<1x64xf32, #tpu.memory_space<vmem>>, vector<1x64xf32>
    %cst_22 = arith.constant dense<0.000000e+00> : vector<16xf32>
    %24 = vector.multi_reduction <add>, %21, %cst_22 [1] : vector<16x64xf32> to vector<16xf32>
    %25 = vector.shape_cast %24 : vector<16xf32> to vector<16x1xf32>
    %cst_23 = arith.constant 6.400000e+01 : f32
    %26 = vector.broadcast %cst_23 : f32 to vector<16x1xf32>
    %27 = arith.divf %25, %26 : vector<16x1xf32>
    %28 = vector.broadcast %27 : vector<16x1xf32> to vector<16x64xf32>
    %29 = arith.subf %21, %28 : vector<16x64xf32>
    %30 = arith.mulf %29, %29 : vector<16x64xf32>
    %cst_24 = arith.constant dense<0.000000e+00> : vector<16xf32>
    %31 = vector.multi_reduction <add>, %30, %cst_24 [1] : vector<16x64xf32> to vector<16xf32>
    %32 = vector.shape_cast %31 : vector<16xf32> to vector<16x1xf32>
    %cst_25 = arith.constant 6.400000e+01 : f32
    %33 = vector.broadcast %cst_25 : f32 to vector<16x1xf32>
    %34 = arith.divf %32, %33 : vector<16x1xf32>
    %35 = vector.broadcast %27 : vector<16x1xf32> to vector<16x64xf32>
    %36 = arith.subf %21, %35 : vector<16x64xf32>
    %cst_26 = arith.constant 9.99999997E-7 : f32
    %37 = vector.broadcast %cst_26 : f32 to vector<16x1xf32>
    %38 = arith.addf %34, %37 : vector<16x1xf32>
    %39 = math.rsqrt %38 : vector<16x1xf32>
    %40 = vector.broadcast %39 : vector<16x1xf32> to vector<16x64xf32>
    %41 = arith.mulf %36, %40 : vector<16x64xf32>
    %42 = vector.broadcast %22 : vector<1x64xf32> to vector<16x64xf32>
    %43 = arith.mulf %41, %42 : vector<16x64xf32>
    %44 = vector.broadcast %23 : vector<1x64xf32> to vector<16x64xf32>
    %45 = arith.addf %43, %44 : vector<16x64xf32>
    %46 = vector.shape_cast %45 : vector<16x64xf32> to vector<2x8x64xf32>
    %47 = vector.extract_strided_slice %46 {offsets = [0, 0, 0], sizes = [2, 4, 64], strides = [1, 1, 1]} : vector<2x8x64xf32> to vector<2x4x64xf32>
    %48 = vector.extract_strided_slice %46 {offsets = [0, 4, 0], sizes = [2, 4, 64], strides = [1, 1, 1]} : vector<2x8x64xf32> to vector<2x4x64xf32>
    %cst_27 = arith.constant 0xFF800000 : f32
    %49 = vector.broadcast %cst_27 : f32 to vector<1x4x64xf32>
    %50 = vector.extract_strided_slice %48 {offsets = [0, 0, 0], sizes = [1, 4, 64], strides = [1, 1, 1]} : vector<2x4x64xf32> to vector<1x4x64xf32>
    %51 = tpu.concatenate %49, %50 in 0 : vector<1x4x64xf32>, vector<1x4x64xf32> -> vector<2x4x64xf32>
    %52 = arith.maximumf %47, %48 : vector<2x4x64xf32>
    %53 = arith.maximumf %52, %51 : vector<2x4x64xf32>
    %54 = vector.shape_cast %53 : vector<2x4x64xf32> to vector<2x2x2x64xf32>
    %55 = vector.extract_strided_slice %54 {offsets = [0, 0, 0, 0], sizes = [2, 2, 1, 64], strides = [1, 1, 1, 1]} : vector<2x2x2x64xf32> to vector<2x2x1x64xf32>
    %56 = vector.shape_cast %55 : vector<2x2x1x64xf32> to vector<2x2x64xf32>
    %57 = vector.extract_strided_slice %54 {offsets = [0, 0, 1, 0], sizes = [2, 2, 1, 64], strides = [1, 1, 1, 1]} : vector<2x2x2x64xf32> to vector<2x2x1x64xf32>
    %58 = vector.shape_cast %57 : vector<2x2x1x64xf32> to vector<2x2x64xf32>
    %cst_28 = arith.constant 0xFF800000 : f32
    %59 = vector.broadcast %cst_28 : f32 to vector<2x1x64xf32>
    %60 = vector.extract_strided_slice %58 {offsets = [0, 0, 0], sizes = [2, 1, 64], strides = [1, 1, 1]} : vector<2x2x64xf32> to vector<2x1x64xf32>
    %61 = tpu.concatenate %59, %60 in 1 : vector<2x1x64xf32>, vector<2x1x64xf32> -> vector<2x2x64xf32>
    %62 = arith.maximumf %56, %58 : vector<2x2x64xf32>
    %63 = arith.maximumf %62, %61 : vector<2x2x64xf32>
    %64 = arith.truncf %63 : vector<2x2x64xf32> to vector<2x2x64xbf16>
    %c0_29 = arith.constant 0 : index
    %c0_30 = arith.constant 0 : index
    %c0_31 = arith.constant 0 : index
    %c0_32 = arith.constant 0 : index
    %65 = vector.load %arg6[%c0_29, %c0_30, %c0_31, %c0_32] : memref<1x2x2x64xbf16, #tpu.memory_space<vmem>>, vector<1x2x2x64xbf16>
    %66 = vector.shape_cast %65 : vector<1x2x2x64xbf16> to vector<2x2x64xbf16>
    %67 = vector.shape_cast %64 : vector<2x2x64xbf16> to vector<1x2x2x64xbf16>
    tpu.vector_store %arg6[%c0_29, %c0_30, %c0_31, %c0_32], %67 {strides = array<i32>} : memref<1x2x2x64xbf16, #tpu.memory_space<vmem>>, vector<1x2x2x64xbf16>,
    return
  }
  func.func @transform_0(%arg0: i32) -> (i32, i32, i32) {
    %c0_i32 = arith.constant 0 : i32
    %c0_i32_0 = arith.constant 0 : i32
    %c0_i32_1 = arith.constant 0 : i32
    return %arg0, %c0_i32, %c0_i32_0 : i32, i32, i32
  }
  func.func @transform_1(%arg0: i32) -> (i32, i32, i32) {
    %c0_i32 = arith.constant 0 : i32
    %c0_i32_0 = arith.constant 0 : i32
    %c0_i32_1 = arith.constant 0 : i32
    %c0_i32_2 = arith.constant 0 : i32
    return %c0_i32, %c0_i32_0, %c0_i32_1 : i32, i32, i32
  }
  func.func @transform_2(%arg0: i32) -> (i32, i32) {
    %c0_i32 = arith.constant 0 : i32
    %c0_i32_0 = arith.constant 0 : i32
    %c0_i32_1 = arith.constant 0 : i32
    return %c0_i32, %c0_i32_0 : i32, i32
  }
  func.func @transform_3(%arg0: i32) -> (i32, i32) {
    %c0_i32 = arith.constant 0 : i32
    %c0_i32_0 = arith.constant 0 : i32
    %c0_i32_1 = arith.constant 0 : i32
    return %c0_i32, %c0_i32_0 : i32, i32
  }
  func.func @transform_4(%arg0: i32) -> (i32, i32) {
    %c0_i32 = arith.constant 0 : i32
    %c0_i32_0 = arith.constant 0 : i32
    %c0_i32_1 = arith.constant 0 : i32
    return %c0_i32, %c0_i32_0 : i32, i32
  }
  func.func @transform_5(%arg0: i32) -> (i32, i32, i32, i32) {
    %c0_i32 = arith.constant 0 : i32
    %c0_i32_0 = arith.constant 0 : i32
    %c0_i32_1 = arith.constant 0 : i32
    %c0_i32_2 = arith.constant 0 : i32
    return %arg0, %c0_i32, %c0_i32_0, %c0_i32_1 : i32, i32, i32, i32
  }
}

module attributes {stable_mosaic.version = 11 : i64} {
  func.func @_transformer_layer_kernel(%arg0: i32, %arg1: memref<8x64xbf16, #tpu.memory_space<vmem>>, %arg2: memref<4x64xf32, #tpu.memory_space<vmem>>, %arg3: memref<1x64xf32, #tpu.memory_space<vmem>>, %arg4: memref<1x64xf32, #tpu.memory_space<vmem>>, %arg5: memref<64x192xbf16, #tpu.memory_space<vmem>>, %arg6: memref<1x192xf32, #tpu.memory_space<vmem>>, %arg7: memref<64x64xbf16, #tpu.memory_space<vmem>>, %arg8: memref<1x64xf32, #tpu.memory_space<vmem>>, %arg9: memref<1x64xf32, #tpu.memory_space<vmem>>, %arg10: memref<1x64xf32, #tpu.memory_space<vmem>>, %arg11: memref<64x256xbf16, #tpu.memory_space<vmem>>, %arg12: memref<1x256xf32, #tpu.memory_space<vmem>>, %arg13: memref<256x64xbf16, #tpu.memory_space<vmem>>, %arg14: memref<1x64xf32, #tpu.memory_space<vmem>>, %arg15: memref<8x64xbf16, #tpu.memory_space<vmem>>) attributes {dimension_semantics = [#tpu.dimension_semantics<parallel>], iteration_bounds = array<i64: 1>, scalar_prefetch = 0 : i64, scratch_operands = 0 : i64, tpu.core_type = #tpu.core_type<tc>, window_params = [{transform_indices = @transform_0, window_bounds = array<i64: 8, 64>}, {pipeline_mode = #tpu.pipeline_mode<synchronous>, transform_indices = @transform_1, window_bounds = array<i64: 4, 64>}, {pipeline_mode = #tpu.pipeline_mode<synchronous>, transform_indices = @transform_2, window_bounds = array<i64: 1, 64>}, {pipeline_mode = #tpu.pipeline_mode<synchronous>, transform_indices = @transform_3, window_bounds = array<i64: 1, 64>}, {pipeline_mode = #tpu.pipeline_mode<synchronous>, transform_indices = @transform_4, window_bounds = array<i64: 64, 192>}, {pipeline_mode = #tpu.pipeline_mode<synchronous>, transform_indices = @transform_5, window_bounds = array<i64: 1, 192>}, {pipeline_mode = #tpu.pipeline_mode<synchronous>, transform_indices = @transform_6, window_bounds = array<i64: 64, 64>}, {pipeline_mode = #tpu.pipeline_mode<synchronous>, transform_indices = @transform_7, window_bounds = array<i64: 1, 64>}, {pipeline_mode = #tpu.pipeline_mode<synchronous>, transform_indices = @transform_8, window_bounds = array<i64: 1, 64>}, {pipeline_mode = #tpu.pipeline_mode<synchronous>, transform_indices = @transform_9, window_bounds = array<i64: 1, 64>}, {pipeline_mode = #tpu.pipeline_mode<synchronous>, transform_indices = @transform_10, window_bounds = array<i64: 64, 256>}, {pipeline_mode = #tpu.pipeline_mode<synchronous>, transform_indices = @transform_11, window_bounds = array<i64: 1, 256>}, {pipeline_mode = #tpu.pipeline_mode<synchronous>, transform_indices = @transform_12, window_bounds = array<i64: 256, 64>}, {pipeline_mode = #tpu.pipeline_mode<synchronous>, transform_indices = @transform_13, window_bounds = array<i64: 1, 64>}, {transform_indices = @transform_14, window_bounds = array<i64: 8, 64>}]} {
    %c0 = arith.constant 0 : index
    %c0_0 = arith.constant 0 : index
    %0 = vector.load %arg1[%c0, %c0_0] : memref<8x64xbf16, #tpu.memory_space<vmem>>, vector<8x64xbf16>
    %1 = arith.extf %0 : vector<8x64xbf16> to vector<8x64xf32>
    %2 = vector.shape_cast %1 : vector<8x64xf32> to vector<2x4x64xf32>
    %c0_1 = arith.constant 0 : index
    %c0_2 = arith.constant 0 : index
    %3 = vector.load %arg2[%c0_1, %c0_2] : memref<4x64xf32, #tpu.memory_space<vmem>>, vector<4x64xf32>
    %4 = vector.shape_cast %3 : vector<4x64xf32> to vector<1x4x64xf32>
    %5 = vector.broadcast %4 : vector<1x4x64xf32> to vector<2x4x64xf32>
    %6 = arith.addf %2, %5 : vector<2x4x64xf32>
    %7 = vector.shape_cast %6 : vector<2x4x64xf32> to vector<8x64xf32>
    %c0_3 = arith.constant 0 : index
    %c0_4 = arith.constant 0 : index
    %8 = vector.load %arg3[%c0_3, %c0_4] : memref<1x64xf32, #tpu.memory_space<vmem>>, vector<1x64xf32>
    %c0_5 = arith.constant 0 : index
    %c0_6 = arith.constant 0 : index
    %9 = vector.load %arg4[%c0_5, %c0_6] : memref<1x64xf32, #tpu.memory_space<vmem>>, vector<1x64xf32>
    %cst = arith.constant dense<0.000000e+00> : vector<8xf32>
    %10 = vector.multi_reduction <add>, %7, %cst [1] : vector<8x64xf32> to vector<8xf32>
    %11 = vector.shape_cast %10 : vector<8xf32> to vector<8x1xf32>
    %cst_7 = arith.constant 6.400000e+01 : f32
    %12 = vector.broadcast %cst_7 : f32 to vector<8x1xf32>
    %13 = arith.divf %11, %12 : vector<8x1xf32>
    %14 = vector.broadcast %13 : vector<8x1xf32> to vector<8x64xf32>
    %15 = arith.subf %7, %14 : vector<8x64xf32>
    %16 = arith.mulf %15, %15 : vector<8x64xf32>
    %cst_8 = arith.constant dense<0.000000e+00> : vector<8xf32>
    %17 = vector.multi_reduction <add>, %16, %cst_8 [1] : vector<8x64xf32> to vector<8xf32>
    %18 = vector.shape_cast %17 : vector<8xf32> to vector<8x1xf32>
    %cst_9 = arith.constant 6.400000e+01 : f32
    %19 = vector.broadcast %cst_9 : f32 to vector<8x1xf32>
    %20 = arith.divf %18, %19 : vector<8x1xf32>
    %21 = vector.broadcast %13 : vector<8x1xf32> to vector<8x64xf32>
    %22 = arith.subf %7, %21 : vector<8x64xf32>
    %cst_10 = arith.constant 9.99999997E-7 : f32
    %23 = vector.broadcast %cst_10 : f32 to vector<8x1xf32>
    %24 = arith.addf %20, %23 : vector<8x1xf32>
    %25 = math.rsqrt %24 : vector<8x1xf32>
    %26 = vector.broadcast %25 : vector<8x1xf32> to vector<8x64xf32>
    %27 = arith.mulf %22, %26 : vector<8x64xf32>
    %28 = vector.broadcast %8 : vector<1x64xf32> to vector<8x64xf32>
    %29 = arith.mulf %27, %28 : vector<8x64xf32>
    %30 = vector.broadcast %9 : vector<1x64xf32> to vector<8x64xf32>
    %31 = arith.addf %29, %30 : vector<8x64xf32>
    %32 = arith.truncf %31 : vector<8x64xf32> to vector<8x64xbf16>
    %c0_11 = arith.constant 0 : index
    %c0_12 = arith.constant 0 : index
    %33 = vector.load %arg5[%c0_11, %c0_12] : memref<64x192xbf16, #tpu.memory_space<vmem>>, vector<64x192xbf16>
    %cst_13 = arith.constant dense<0.000000e+00> : vector<8x192xf32>
    %34 = tpu.matmul %32, %33, %cst_13 {dimension_numbers = #tpu.dot_dimension_numbers<[1], [0], [0], [1], [0, 0, 1, 1], [], []>} : vector<8x64xbf16>, vector<64x192xbf16>, vector<8x192xf32> -> vector<8x192xf32>
    %c0_14 = arith.constant 0 : index
    %c0_15 = arith.constant 0 : index
    %35 = vector.load %arg6[%c0_14, %c0_15] : memref<1x192xf32, #tpu.memory_space<vmem>>, vector<1x192xf32>
    %36 = vector.broadcast %35 : vector<1x192xf32> to vector<8x192xf32>
    %37 = arith.addf %34, %36 : vector<8x192xf32>
    %38 = vector.extract_strided_slice %37 {offsets = [0, 0], sizes = [8, 16], strides = [1, 1]} : vector<8x192xf32> to vector<8x16xf32>
    %39 = vector.shape_cast %38 : vector<8x16xf32> to vector<2x4x16xf32>
    %40 = vector.extract_strided_slice %37 {offsets = [0, 64], sizes = [8, 16], strides = [1, 1]} : vector<8x192xf32> to vector<8x16xf32>
    %41 = vector.shape_cast %40 : vector<8x16xf32> to vector<2x4x16xf32>
    %42 = vector.extract_strided_slice %37 {offsets = [0, 128], sizes = [8, 16], strides = [1, 1]} : vector<8x192xf32> to vector<8x16xf32>
    %43 = vector.shape_cast %42 : vector<8x16xf32> to vector<2x4x16xf32>
    %44 = arith.truncf %39 : vector<2x4x16xf32> to vector<2x4x16xbf16>
    %45 = arith.truncf %41 : vector<2x4x16xf32> to vector<2x4x16xbf16>
    "tpu.trace_start"() <{level = 10 : i32, message = "gnd,gmd->gnm"}> : () -> ()
    %cst_16 = arith.constant dense<0.000000e+00> : vector<2x4x4xf32>
    %46 = tpu.matmul %44, %45, %cst_16 {dimension_numbers = #tpu.dot_dimension_numbers<[2], [2], [1], [1], [0, 0, 0, 1, 1, 1], [0], [0]>} : vector<2x4x16xbf16>, vector<2x4x16xbf16>, vector<2x4x4xf32> -> vector<2x4x4xf32>
    "tpu.trace_stop"() : () -> ()
    %cst_17 = arith.constant dense<0xFF800000> : vector<2x4xf32>
    %47 = vector.multi_reduction <maximumf>, %46, %cst_17 [2] : vector<2x4x4xf32> to vector<2x4xf32>
    %48 = vector.shape_cast %47 : vector<2x4xf32> to vector<2x4x1xf32>
    %49 = vector.broadcast %48 : vector<2x4x1xf32> to vector<2x4x4xf32>
    %50 = arith.subf %46, %49 : vector<2x4x4xf32>
    %51 = math.exp %50 : vector<2x4x4xf32>
    %cst_18 = arith.constant dense<0.000000e+00> : vector<2x4xf32>
    %52 = vector.multi_reduction <add>, %51, %cst_18 [2] : vector<2x4x4xf32> to vector<2x4xf32>
    %53 = vector.shape_cast %52 : vector<2x4xf32> to vector<2x4x1xf32>
    %54 = tpu.reciprocal %53 {approx = true} : vector<2x4x1xf32> -> vector<2x4x1xf32>
    %55 = vector.broadcast %54 : vector<2x4x1xf32> to vector<2x4x4xf32>
    %56 = arith.mulf %51, %55 : vector<2x4x4xf32>
    %57 = arith.truncf %56 : vector<2x4x4xf32> to vector<2x4x4xbf16>
    %58 = arith.truncf %43 : vector<2x4x16xf32> to vector<2x4x16xbf16>
    "tpu.trace_start"() <{level = 10 : i32, message = "gnm,gmd->gnd"}> : () -> ()
    %cst_19 = arith.constant dense<0.000000e+00> : vector<2x4x16xf32>
    %59 = tpu.matmul %57, %58, %cst_19 {dimension_numbers = #tpu.dot_dimension_numbers<[2], [1], [1], [2], [0, 0, 0, 1, 1, 2], [0], [0]>} : vector<2x4x4xbf16>, vector<2x4x16xbf16>, vector<2x4x16xf32> -> vector<2x4x16xf32>
    "tpu.trace_stop"() : () -> ()
    %60 = vector.shape_cast %59 : vector<2x4x16xf32> to vector<8x16xf32>
    %61 = vector.extract_strided_slice %37 {offsets = [0, 16], sizes = [8, 16], strides = [1, 1]} : vector<8x192xf32> to vector<8x16xf32>
    %62 = vector.shape_cast %61 : vector<8x16xf32> to vector<2x4x16xf32>
    %63 = vector.extract_strided_slice %37 {offsets = [0, 80], sizes = [8, 16], strides = [1, 1]} : vector<8x192xf32> to vector<8x16xf32>
    %64 = vector.shape_cast %63 : vector<8x16xf32> to vector<2x4x16xf32>
    %65 = vector.extract_strided_slice %37 {offsets = [0, 144], sizes = [8, 16], strides = [1, 1]} : vector<8x192xf32> to vector<8x16xf32>
    %66 = vector.shape_cast %65 : vector<8x16xf32> to vector<2x4x16xf32>
    %67 = arith.truncf %62 : vector<2x4x16xf32> to vector<2x4x16xbf16>
    %68 = arith.truncf %64 : vector<2x4x16xf32> to vector<2x4x16xbf16>
    "tpu.trace_start"() <{level = 10 : i32, message = "gnd,gmd->gnm"}> : () -> ()
    %cst_20 = arith.constant dense<0.000000e+00> : vector<2x4x4xf32>
    %69 = tpu.matmul %67, %68, %cst_20 {dimension_numbers = #tpu.dot_dimension_numbers<[2], [2], [1], [1], [0, 0, 0, 1, 1, 1], [0], [0]>} : vector<2x4x16xbf16>, vector<2x4x16xbf16>, vector<2x4x4xf32> -> vector<2x4x4xf32>
    "tpu.trace_stop"() : () -> ()
    %cst_21 = arith.constant dense<0xFF800000> : vector<2x4xf32>
    %70 = vector.multi_reduction <maximumf>, %69, %cst_21 [2] : vector<2x4x4xf32> to vector<2x4xf32>
    %71 = vector.shape_cast %70 : vector<2x4xf32> to vector<2x4x1xf32>
    %72 = vector.broadcast %71 : vector<2x4x1xf32> to vector<2x4x4xf32>
    %73 = arith.subf %69, %72 : vector<2x4x4xf32>
    %74 = math.exp %73 : vector<2x4x4xf32>
    %cst_22 = arith.constant dense<0.000000e+00> : vector<2x4xf32>
    %75 = vector.multi_reduction <add>, %74, %cst_22 [2] : vector<2x4x4xf32> to vector<2x4xf32>
    %76 = vector.shape_cast %75 : vector<2x4xf32> to vector<2x4x1xf32>
    %77 = tpu.reciprocal %76 {approx = true} : vector<2x4x1xf32> -> vector<2x4x1xf32>
    %78 = vector.broadcast %77 : vector<2x4x1xf32> to vector<2x4x4xf32>
    %79 = arith.mulf %74, %78 : vector<2x4x4xf32>
    %80 = arith.truncf %79 : vector<2x4x4xf32> to vector<2x4x4xbf16>
    %81 = arith.truncf %66 : vector<2x4x16xf32> to vector<2x4x16xbf16>
    "tpu.trace_start"() <{level = 10 : i32, message = "gnm,gmd->gnd"}> : () -> ()
    %cst_23 = arith.constant dense<0.000000e+00> : vector<2x4x16xf32>
    %82 = tpu.matmul %80, %81, %cst_23 {dimension_numbers = #tpu.dot_dimension_numbers<[2], [1], [1], [2], [0, 0, 0, 1, 1, 2], [0], [0]>} : vector<2x4x4xbf16>, vector<2x4x16xbf16>, vector<2x4x16xf32> -> vector<2x4x16xf32>
    "tpu.trace_stop"() : () -> ()
    %83 = vector.shape_cast %82 : vector<2x4x16xf32> to vector<8x16xf32>
    %84 = vector.extract_strided_slice %37 {offsets = [0, 32], sizes = [8, 16], strides = [1, 1]} : vector<8x192xf32> to vector<8x16xf32>
    %85 = vector.shape_cast %84 : vector<8x16xf32> to vector<2x4x16xf32>
    %86 = vector.extract_strided_slice %37 {offsets = [0, 96], sizes = [8, 16], strides = [1, 1]} : vector<8x192xf32> to vector<8x16xf32>
    %87 = vector.shape_cast %86 : vector<8x16xf32> to vector<2x4x16xf32>
    %88 = vector.extract_strided_slice %37 {offsets = [0, 160], sizes = [8, 16], strides = [1, 1]} : vector<8x192xf32> to vector<8x16xf32>
    %89 = vector.shape_cast %88 : vector<8x16xf32> to vector<2x4x16xf32>
    %90 = arith.truncf %85 : vector<2x4x16xf32> to vector<2x4x16xbf16>
    %91 = arith.truncf %87 : vector<2x4x16xf32> to vector<2x4x16xbf16>
    "tpu.trace_start"() <{level = 10 : i32, message = "gnd,gmd->gnm"}> : () -> ()
    %cst_24 = arith.constant dense<0.000000e+00> : vector<2x4x4xf32>
    %92 = tpu.matmul %90, %91, %cst_24 {dimension_numbers = #tpu.dot_dimension_numbers<[2], [2], [1], [1], [0, 0, 0, 1, 1, 1], [0], [0]>} : vector<2x4x16xbf16>, vector<2x4x16xbf16>, vector<2x4x4xf32> -> vector<2x4x4xf32>
    "tpu.trace_stop"() : () -> ()
    %cst_25 = arith.constant dense<0xFF800000> : vector<2x4xf32>
    %93 = vector.multi_reduction <maximumf>, %92, %cst_25 [2] : vector<2x4x4xf32> to vector<2x4xf32>
    %94 = vector.shape_cast %93 : vector<2x4xf32> to vector<2x4x1xf32>
    %95 = vector.broadcast %94 : vector<2x4x1xf32> to vector<2x4x4xf32>
    %96 = arith.subf %92, %95 : vector<2x4x4xf32>
    %97 = math.exp %96 : vector<2x4x4xf32>
    %cst_26 = arith.constant dense<0.000000e+00> : vector<2x4xf32>
    %98 = vector.multi_reduction <add>, %97, %cst_26 [2] : vector<2x4x4xf32> to vector<2x4xf32>
    %99 = vector.shape_cast %98 : vector<2x4xf32> to vector<2x4x1xf32>
    %100 = tpu.reciprocal %99 {approx = true} : vector<2x4x1xf32> -> vector<2x4x1xf32>
    %101 = vector.broadcast %100 : vector<2x4x1xf32> to vector<2x4x4xf32>
    %102 = arith.mulf %97, %101 : vector<2x4x4xf32>
    %103 = arith.truncf %102 : vector<2x4x4xf32> to vector<2x4x4xbf16>
    %104 = arith.truncf %89 : vector<2x4x16xf32> to vector<2x4x16xbf16>
    "tpu.trace_start"() <{level = 10 : i32, message = "gnm,gmd->gnd"}> : () -> ()
    %cst_27 = arith.constant dense<0.000000e+00> : vector<2x4x16xf32>
    %105 = tpu.matmul %103, %104, %cst_27 {dimension_numbers = #tpu.dot_dimension_numbers<[2], [1], [1], [2], [0, 0, 0, 1, 1, 2], [0], [0]>} : vector<2x4x4xbf16>, vector<2x4x16xbf16>, vector<2x4x16xf32> -> vector<2x4x16xf32>
    "tpu.trace_stop"() : () -> ()
    %106 = vector.shape_cast %105 : vector<2x4x16xf32> to vector<8x16xf32>
    %107 = vector.extract_strided_slice %37 {offsets = [0, 48], sizes = [8, 16], strides = [1, 1]} : vector<8x192xf32> to vector<8x16xf32>
    %108 = vector.shape_cast %107 : vector<8x16xf32> to vector<2x4x16xf32>
    %109 = vector.extract_strided_slice %37 {offsets = [0, 112], sizes = [8, 16], strides = [1, 1]} : vector<8x192xf32> to vector<8x16xf32>
    %110 = vector.shape_cast %109 : vector<8x16xf32> to vector<2x4x16xf32>
    %111 = vector.extract_strided_slice %37 {offsets = [0, 176], sizes = [8, 16], strides = [1, 1]} : vector<8x192xf32> to vector<8x16xf32>
    %112 = vector.shape_cast %111 : vector<8x16xf32> to vector<2x4x16xf32>
    %113 = arith.truncf %108 : vector<2x4x16xf32> to vector<2x4x16xbf16>
    %114 = arith.truncf %110 : vector<2x4x16xf32> to vector<2x4x16xbf16>
    "tpu.trace_start"() <{level = 10 : i32, message = "gnd,gmd->gnm"}> : () -> ()
    %cst_28 = arith.constant dense<0.000000e+00> : vector<2x4x4xf32>
    %115 = tpu.matmul %113, %114, %cst_28 {dimension_numbers = #tpu.dot_dimension_numbers<[2], [2], [1], [1], [0, 0, 0, 1, 1, 1], [0], [0]>} : vector<2x4x16xbf16>, vector<2x4x16xbf16>, vector<2x4x4xf32> -> vector<2x4x4xf32>
    "tpu.trace_stop"() : () -> ()
    %cst_29 = arith.constant dense<0xFF800000> : vector<2x4xf32>
    %116 = vector.multi_reduction <maximumf>, %115, %cst_29 [2] : vector<2x4x4xf32> to vector<2x4xf32>
    %117 = vector.shape_cast %116 : vector<2x4xf32> to vector<2x4x1xf32>
    %118 = vector.broadcast %117 : vector<2x4x1xf32> to vector<2x4x4xf32>
    %119 = arith.subf %115, %118 : vector<2x4x4xf32>
    %120 = math.exp %119 : vector<2x4x4xf32>
    %cst_30 = arith.constant dense<0.000000e+00> : vector<2x4xf32>
    %121 = vector.multi_reduction <add>, %120, %cst_30 [2] : vector<2x4x4xf32> to vector<2x4xf32>
    %122 = vector.shape_cast %121 : vector<2x4xf32> to vector<2x4x1xf32>
    %123 = tpu.reciprocal %122 {approx = true} : vector<2x4x1xf32> -> vector<2x4x1xf32>
    %124 = vector.broadcast %123 : vector<2x4x1xf32> to vector<2x4x4xf32>
    %125 = arith.mulf %120, %124 : vector<2x4x4xf32>
    %126 = arith.truncf %125 : vector<2x4x4xf32> to vector<2x4x4xbf16>
    %127 = arith.truncf %112 : vector<2x4x16xf32> to vector<2x4x16xbf16>
    "tpu.trace_start"() <{level = 10 : i32, message = "gnm,gmd->gnd"}> : () -> ()
    %cst_31 = arith.constant dense<0.000000e+00> : vector<2x4x16xf32>
    %128 = tpu.matmul %126, %127, %cst_31 {dimension_numbers = #tpu.dot_dimension_numbers<[2], [1], [1], [2], [0, 0, 0, 1, 1, 2], [0], [0]>} : vector<2x4x4xbf16>, vector<2x4x16xbf16>, vector<2x4x16xf32> -> vector<2x4x16xf32>
    "tpu.trace_stop"() : () -> ()
    %129 = vector.shape_cast %128 : vector<2x4x16xf32> to vector<8x16xf32>
    %130 = tpu.concatenate %60, %83, %106, %129 in 1 : vector<8x16xf32>, vector<8x16xf32>, vector<8x16xf32>, vector<8x16xf32> -> vector<8x64xf32>
    %131 = arith.truncf %130 : vector<8x64xf32> to vector<8x64xbf16>
    %c0_32 = arith.constant 0 : index
    %c0_33 = arith.constant 0 : index
    %132 = vector.load %arg7[%c0_32, %c0_33] : memref<64x64xbf16, #tpu.memory_space<vmem>>, vector<64x64xbf16>
    %cst_34 = arith.constant dense<0.000000e+00> : vector<8x64xf32>
    %133 = tpu.matmul %131, %132, %cst_34 {dimension_numbers = #tpu.dot_dimension_numbers<[1], [0], [0], [1], [0, 0, 1, 1], [], []>} : vector<8x64xbf16>, vector<64x64xbf16>, vector<8x64xf32> -> vector<8x64xf32>
    %c0_35 = arith.constant 0 : index
    %c0_36 = arith.constant 0 : index
    %134 = vector.load %arg8[%c0_35, %c0_36] : memref<1x64xf32, #tpu.memory_space<vmem>>, vector<1x64xf32>
    %135 = vector.broadcast %134 : vector<1x64xf32> to vector<8x64xf32>
    %136 = arith.addf %133, %135 : vector<8x64xf32>
    %137 = arith.addf %7, %136 : vector<8x64xf32>
    %c0_37 = arith.constant 0 : index
    %c0_38 = arith.constant 0 : index
    %138 = vector.load %arg9[%c0_37, %c0_38] : memref<1x64xf32, #tpu.memory_space<vmem>>, vector<1x64xf32>
    %c0_39 = arith.constant 0 : index
    %c0_40 = arith.constant 0 : index
    %139 = vector.load %arg10[%c0_39, %c0_40] : memref<1x64xf32, #tpu.memory_space<vmem>>, vector<1x64xf32>
    %cst_41 = arith.constant dense<0.000000e+00> : vector<8xf32>
    %140 = vector.multi_reduction <add>, %137, %cst_41 [1] : vector<8x64xf32> to vector<8xf32>
    %141 = vector.shape_cast %140 : vector<8xf32> to vector<8x1xf32>
    %cst_42 = arith.constant 6.400000e+01 : f32
    %142 = vector.broadcast %cst_42 : f32 to vector<8x1xf32>
    %143 = arith.divf %141, %142 : vector<8x1xf32>
    %144 = vector.broadcast %143 : vector<8x1xf32> to vector<8x64xf32>
    %145 = arith.subf %137, %144 : vector<8x64xf32>
    %146 = arith.mulf %145, %145 : vector<8x64xf32>
    %cst_43 = arith.constant dense<0.000000e+00> : vector<8xf32>
    %147 = vector.multi_reduction <add>, %146, %cst_43 [1] : vector<8x64xf32> to vector<8xf32>
    %148 = vector.shape_cast %147 : vector<8xf32> to vector<8x1xf32>
    %cst_44 = arith.constant 6.400000e+01 : f32
    %149 = vector.broadcast %cst_44 : f32 to vector<8x1xf32>
    %150 = arith.divf %148, %149 : vector<8x1xf32>
    %151 = vector.broadcast %143 : vector<8x1xf32> to vector<8x64xf32>
    %152 = arith.subf %137, %151 : vector<8x64xf32>
    %cst_45 = arith.constant 9.99999997E-7 : f32
    %153 = vector.broadcast %cst_45 : f32 to vector<8x1xf32>
    %154 = arith.addf %150, %153 : vector<8x1xf32>
    %155 = math.rsqrt %154 : vector<8x1xf32>
    %156 = vector.broadcast %155 : vector<8x1xf32> to vector<8x64xf32>
    %157 = arith.mulf %152, %156 : vector<8x64xf32>
    %158 = vector.broadcast %138 : vector<1x64xf32> to vector<8x64xf32>
    %159 = arith.mulf %157, %158 : vector<8x64xf32>
    %160 = vector.broadcast %139 : vector<1x64xf32> to vector<8x64xf32>
    %161 = arith.addf %159, %160 : vector<8x64xf32>
    %162 = arith.truncf %161 : vector<8x64xf32> to vector<8x64xbf16>
    %c0_46 = arith.constant 0 : index
    %c0_47 = arith.constant 0 : index
    %163 = vector.load %arg11[%c0_46, %c0_47] : memref<64x256xbf16, #tpu.memory_space<vmem>>, vector<64x256xbf16>
    %cst_48 = arith.constant dense<0.000000e+00> : vector<8x256xf32>
    %164 = tpu.matmul %162, %163, %cst_48 {dimension_numbers = #tpu.dot_dimension_numbers<[1], [0], [0], [1], [0, 0, 1, 1], [], []>} : vector<8x64xbf16>, vector<64x256xbf16>, vector<8x256xf32> -> vector<8x256xf32>
    %c0_49 = arith.constant 0 : index
    %c0_50 = arith.constant 0 : index
    %165 = vector.load %arg12[%c0_49, %c0_50] : memref<1x256xf32, #tpu.memory_space<vmem>>, vector<1x256xf32>
    %166 = vector.broadcast %165 : vector<1x256xf32> to vector<8x256xf32>
    %167 = arith.addf %164, %166 : vector<8x256xf32>
    %cst_51 = arith.constant 0.707106769 : f32
    %168 = vector.broadcast %cst_51 : f32 to vector<8x256xf32>
    %169 = arith.mulf %167, %168 : vector<8x256xf32>
    %cst_52 = arith.constant 0.000000e+00 : f32
    %170 = vector.broadcast %cst_52 : f32 to vector<8x256xf32>
    %171 = arith.cmpf oge, %169, %170 : vector<8x256xf32>
    %cst_53 = arith.constant 1.000000e+00 : f32
    %cst_54 = arith.constant -1.000000e+00 : f32
    %172 = vector.broadcast %cst_53 : f32 to vector<8x256xf32>
    %173 = vector.broadcast %cst_54 : f32 to vector<8x256xf32>
    %174 = arith.select %171, %172, %173 : vector<8x256xi1>, vector<8x256xf32>
    %175 = math.absf %169 : vector<8x256xf32>
    %cst_55 = arith.constant 0.327591091 : f32
    %176 = vector.broadcast %cst_55 : f32 to vector<8x256xf32>
    %177 = arith.mulf %176, %175 : vector<8x256xf32>
    %cst_56 = arith.constant 1.000000e+00 : f32
    %178 = vector.broadcast %cst_56 : f32 to vector<8x256xf32>
    %179 = arith.addf %178, %177 : vector<8x256xf32>
    %cst_57 = arith.constant 1.000000e+00 : f32
    %180 = vector.broadcast %cst_57 : f32 to vector<8x256xf32>
    %181 = arith.divf %180, %179 : vector<8x256xf32>
    %cst_58 = arith.constant 1.06140542 : f32
    %182 = vector.broadcast %cst_58 : f32 to vector<8x256xf32>
    %183 = arith.mulf %182, %181 : vector<8x256xf32>
    %cst_59 = arith.constant 1.45315206 : f32
    %184 = vector.broadcast %cst_59 : f32 to vector<8x256xf32>
    %185 = arith.subf %183, %184 : vector<8x256xf32>
    %186 = arith.mulf %185, %181 : vector<8x256xf32>
    %cst_60 = arith.constant 1.42141378 : f32
    %187 = vector.broadcast %cst_60 : f32 to vector<8x256xf32>
    %188 = arith.addf %186, %187 : vector<8x256xf32>
    %189 = arith.mulf %188, %181 : vector<8x256xf32>
    %cst_61 = arith.constant 0.284496725 : f32
    %190 = vector.broadcast %cst_61 : f32 to vector<8x256xf32>
    %191 = arith.subf %189, %190 : vector<8x256xf32>
    %192 = arith.mulf %191, %181 : vector<8x256xf32>
    %cst_62 = arith.constant 0.254829586 : f32
    %193 = vector.broadcast %cst_62 : f32 to vector<8x256xf32>
    %194 = arith.addf %192, %193 : vector<8x256xf32>
    %195 = arith.mulf %194, %181 : vector<8x256xf32>
    %cst_63 = arith.constant 0.000000e+00 : f32
    %196 = vector.broadcast %cst_63 : f32 to vector<8x256xf32>
    %197 = arith.subf %196, %175 : vector<8x256xf32>
    %198 = arith.mulf %197, %175 : vector<8x256xf32>
    %199 = math.exp %198 : vector<8x256xf32>
    %200 = arith.mulf %195, %199 : vector<8x256xf32>
    %cst_64 = arith.constant 1.000000e+00 : f32
    %201 = vector.broadcast %cst_64 : f32 to vector<8x256xf32>
    %202 = arith.subf %201, %200 : vector<8x256xf32>
    %203 = arith.mulf %174, %202 : vector<8x256xf32>
    %cst_65 = arith.constant 5.000000e-01 : f32
    %204 = vector.broadcast %cst_65 : f32 to vector<8x256xf32>
    %205 = arith.mulf %204, %167 : vector<8x256xf32>
    %cst_66 = arith.constant 1.000000e+00 : f32
    %206 = vector.broadcast %cst_66 : f32 to vector<8x256xf32>
    %207 = arith.addf %206, %203 : vector<8x256xf32>
    %208 = arith.mulf %205, %207 : vector<8x256xf32>
    %209 = arith.truncf %208 : vector<8x256xf32> to vector<8x256xbf16>
    %c0_67 = arith.constant 0 : index
    %c0_68 = arith.constant 0 : index
    %210 = vector.load %arg13[%c0_67, %c0_68] : memref<256x64xbf16, #tpu.memory_space<vmem>>, vector<256x64xbf16>
    %cst_69 = arith.constant dense<0.000000e+00> : vector<8x64xf32>
    %211 = tpu.matmul %209, %210, %cst_69 {dimension_numbers = #tpu.dot_dimension_numbers<[1], [0], [0], [1], [0, 0, 1, 1], [], []>} : vector<8x256xbf16>, vector<256x64xbf16>, vector<8x64xf32> -> vector<8x64xf32>
    %c0_70 = arith.constant 0 : index
    %c0_71 = arith.constant 0 : index
    %212 = vector.load %arg14[%c0_70, %c0_71] : memref<1x64xf32, #tpu.memory_space<vmem>>, vector<1x64xf32>
    %213 = vector.broadcast %212 : vector<1x64xf32> to vector<8x64xf32>
    %214 = arith.addf %211, %213 : vector<8x64xf32>
    %215 = arith.addf %137, %214 : vector<8x64xf32>
    %216 = arith.truncf %215 : vector<8x64xf32> to vector<8x64xbf16>
    %c0_72 = arith.constant 0 : index
    %c0_73 = arith.constant 0 : index
    %217 = vector.load %arg15[%c0_72, %c0_73] : memref<8x64xbf16, #tpu.memory_space<vmem>>, vector<8x64xbf16>
    tpu.vector_store %arg15[%c0_72, %c0_73], %216 {strides = array<i32>} : memref<8x64xbf16, #tpu.memory_space<vmem>>, vector<8x64xbf16>,
    return
  }
  func.func @transform_0(%arg0: i32) -> (i32, i32) {
    %c0_i32 = arith.constant 0 : i32
    %c0_i32_0 = arith.constant 0 : i32
    return %arg0, %c0_i32 : i32, i32
  }
  func.func @transform_1(%arg0: i32) -> (i32, i32) {
    %c0_i32 = arith.constant 0 : i32
    %c0_i32_0 = arith.constant 0 : i32
    %c0_i32_1 = arith.constant 0 : i32
    return %c0_i32, %c0_i32_0 : i32, i32
  }
  func.func @transform_2(%arg0: i32) -> (i32, i32) {
    %c0_i32 = arith.constant 0 : i32
    %c0_i32_0 = arith.constant 0 : i32
    %c0_i32_1 = arith.constant 0 : i32
    return %c0_i32, %c0_i32_0 : i32, i32
  }
  func.func @transform_3(%arg0: i32) -> (i32, i32) {
    %c0_i32 = arith.constant 0 : i32
    %c0_i32_0 = arith.constant 0 : i32
    %c0_i32_1 = arith.constant 0 : i32
    return %c0_i32, %c0_i32_0 : i32, i32
  }
  func.func @transform_4(%arg0: i32) -> (i32, i32) {
    %c0_i32 = arith.constant 0 : i32
    %c0_i32_0 = arith.constant 0 : i32
    %c0_i32_1 = arith.constant 0 : i32
    return %c0_i32, %c0_i32_0 : i32, i32
  }
  func.func @transform_5(%arg0: i32) -> (i32, i32) {
    %c0_i32 = arith.constant 0 : i32
    %c0_i32_0 = arith.constant 0 : i32
    %c0_i32_1 = arith.constant 0 : i32
    return %c0_i32, %c0_i32_0 : i32, i32
  }
  func.func @transform_6(%arg0: i32) -> (i32, i32) {
    %c0_i32 = arith.constant 0 : i32
    %c0_i32_0 = arith.constant 0 : i32
    %c0_i32_1 = arith.constant 0 : i32
    return %c0_i32, %c0_i32_0 : i32, i32
  }
  func.func @transform_7(%arg0: i32) -> (i32, i32) {
    %c0_i32 = arith.constant 0 : i32
    %c0_i32_0 = arith.constant 0 : i32
    %c0_i32_1 = arith.constant 0 : i32
    return %c0_i32, %c0_i32_0 : i32, i32
  }
  func.func @transform_8(%arg0: i32) -> (i32, i32) {
    %c0_i32 = arith.constant 0 : i32
    %c0_i32_0 = arith.constant 0 : i32
    %c0_i32_1 = arith.constant 0 : i32
    return %c0_i32, %c0_i32_0 : i32, i32
  }
  func.func @transform_9(%arg0: i32) -> (i32, i32) {
    %c0_i32 = arith.constant 0 : i32
    %c0_i32_0 = arith.constant 0 : i32
    %c0_i32_1 = arith.constant 0 : i32
    return %c0_i32, %c0_i32_0 : i32, i32
  }
  func.func @transform_10(%arg0: i32) -> (i32, i32) {
    %c0_i32 = arith.constant 0 : i32
    %c0_i32_0 = arith.constant 0 : i32
    %c0_i32_1 = arith.constant 0 : i32
    return %c0_i32, %c0_i32_0 : i32, i32
  }
  func.func @transform_11(%arg0: i32) -> (i32, i32) {
    %c0_i32 = arith.constant 0 : i32
    %c0_i32_0 = arith.constant 0 : i32
    %c0_i32_1 = arith.constant 0 : i32
    return %c0_i32, %c0_i32_0 : i32, i32
  }
  func.func @transform_12(%arg0: i32) -> (i32, i32) {
    %c0_i32 = arith.constant 0 : i32
    %c0_i32_0 = arith.constant 0 : i32
    %c0_i32_1 = arith.constant 0 : i32
    return %c0_i32, %c0_i32_0 : i32, i32
  }
  func.func @transform_13(%arg0: i32) -> (i32, i32) {
    %c0_i32 = arith.constant 0 : i32
    %c0_i32_0 = arith.constant 0 : i32
    %c0_i32_1 = arith.constant 0 : i32
    return %c0_i32, %c0_i32_0 : i32, i32
  }
  func.func @transform_14(%arg0: i32) -> (i32, i32) {
    %c0_i32 = arith.constant 0 : i32
    %c0_i32_0 = arith.constant 0 : i32
    return %arg0, %c0_i32 : i32, i32
  }
}

module attributes {stable_mosaic.version = 11 : i64} {
  func.func @_norm_pool_head_kernel(%arg0: i32, %arg1: memref<2x4x64xbf16, #tpu.memory_space<vmem>>, %arg2: memref<1x64xf32, #tpu.memory_space<vmem>>, %arg3: memref<1x64xf32, #tpu.memory_space<vmem>>, %arg4: memref<64x128xf32, #tpu.memory_space<vmem>>, %arg5: memref<1x128xf32, #tpu.memory_space<vmem>>, %arg6: memref<2x128xf32, #tpu.memory_space<vmem>>) attributes {dimension_semantics = [#tpu.dimension_semantics<parallel>], iteration_bounds = array<i64: 1>, scalar_prefetch = 0 : i64, scratch_operands = 0 : i64, tpu.core_type = #tpu.core_type<tc>, window_params = [{transform_indices = @transform_0, window_bounds = array<i64: 2, 4, 64>}, {pipeline_mode = #tpu.pipeline_mode<synchronous>, transform_indices = @transform_1, window_bounds = array<i64: 1, 64>}, {pipeline_mode = #tpu.pipeline_mode<synchronous>, transform_indices = @transform_2, window_bounds = array<i64: 1, 64>}, {pipeline_mode = #tpu.pipeline_mode<synchronous>, transform_indices = @transform_3, window_bounds = array<i64: 64, 128>}, {pipeline_mode = #tpu.pipeline_mode<synchronous>, transform_indices = @transform_4, window_bounds = array<i64: 1, 128>}, {transform_indices = @transform_5, window_bounds = array<i64: 2, 128>}]} {
    %c0 = arith.constant 0 : index
    %c0_0 = arith.constant 0 : index
    %c0_1 = arith.constant 0 : index
    %0 = vector.load %arg1[%c0, %c0_0, %c0_1] : memref<2x4x64xbf16, #tpu.memory_space<vmem>>, vector<2x4x64xbf16>
    %1 = arith.extf %0 : vector<2x4x64xbf16> to vector<2x4x64xf32>
    %c0_2 = arith.constant 0 : index
    %c0_3 = arith.constant 0 : index
    %2 = vector.load %arg2[%c0_2, %c0_3] : memref<1x64xf32, #tpu.memory_space<vmem>>, vector<1x64xf32>
    %c0_4 = arith.constant 0 : index
    %c0_5 = arith.constant 0 : index
    %3 = vector.load %arg3[%c0_4, %c0_5] : memref<1x64xf32, #tpu.memory_space<vmem>>, vector<1x64xf32>
    %cst = arith.constant dense<0.000000e+00> : vector<2x4xf32>
    %4 = vector.multi_reduction <add>, %1, %cst [2] : vector<2x4x64xf32> to vector<2x4xf32>
    %5 = vector.shape_cast %4 : vector<2x4xf32> to vector<2x4x1xf32>
    %cst_6 = arith.constant 6.400000e+01 : f32
    %6 = vector.broadcast %cst_6 : f32 to vector<2x4x1xf32>
    %7 = arith.divf %5, %6 : vector<2x4x1xf32>
    %8 = vector.broadcast %7 : vector<2x4x1xf32> to vector<2x4x64xf32>
    %9 = arith.subf %1, %8 : vector<2x4x64xf32>
    %10 = arith.mulf %9, %9 : vector<2x4x64xf32>
    %cst_7 = arith.constant dense<0.000000e+00> : vector<2x4xf32>
    %11 = vector.multi_reduction <add>, %10, %cst_7 [2] : vector<2x4x64xf32> to vector<2x4xf32>
    %12 = vector.shape_cast %11 : vector<2x4xf32> to vector<2x4x1xf32>
    %cst_8 = arith.constant 6.400000e+01 : f32
    %13 = vector.broadcast %cst_8 : f32 to vector<2x4x1xf32>
    %14 = arith.divf %12, %13 : vector<2x4x1xf32>
    %15 = vector.broadcast %7 : vector<2x4x1xf32> to vector<2x4x64xf32>
    %16 = arith.subf %1, %15 : vector<2x4x64xf32>
    %cst_9 = arith.constant 9.99999974E-6 : f32
    %17 = vector.broadcast %cst_9 : f32 to vector<2x4x1xf32>
    %18 = arith.addf %14, %17 : vector<2x4x1xf32>
    %19 = math.rsqrt %18 : vector<2x4x1xf32>
    %20 = vector.broadcast %19 : vector<2x4x1xf32> to vector<2x4x64xf32>
    %21 = arith.mulf %16, %20 : vector<2x4x64xf32>
    %22 = vector.shape_cast %2 : vector<1x64xf32> to vector<1x1x64xf32>
    %23 = vector.broadcast %22 : vector<1x1x64xf32> to vector<2x4x64xf32>
    %24 = arith.mulf %21, %23 : vector<2x4x64xf32>
    %25 = vector.shape_cast %3 : vector<1x64xf32> to vector<1x1x64xf32>
    %26 = vector.broadcast %25 : vector<1x1x64xf32> to vector<2x4x64xf32>
    %27 = arith.addf %24, %26 : vector<2x4x64xf32>
    %cst_10 = arith.constant dense<0.000000e+00> : vector<2x64xf32>
    %28 = vector.multi_reduction <add>, %27, %cst_10 [1] : vector<2x4x64xf32> to vector<2x64xf32>
    %cst_11 = arith.constant 4.000000e+00 : f32
    %29 = vector.broadcast %cst_11 : f32 to vector<2x64xf32>
    %30 = arith.divf %28, %29 : vector<2x64xf32>
    %c0_12 = arith.constant 0 : index
    %c0_13 = arith.constant 0 : index
    %31 = vector.load %arg4[%c0_12, %c0_13] : memref<64x128xf32, #tpu.memory_space<vmem>>, vector<64x128xf32>
    %cst_14 = arith.constant dense<0.000000e+00> : vector<2x128xf32>
    %32 = tpu.matmul %30, %31, %cst_14 {dimension_numbers = #tpu.dot_dimension_numbers<[1], [0], [0], [1], [0, 0, 1, 1], [], []>} : vector<2x64xf32>, vector<64x128xf32>, vector<2x128xf32> -> vector<2x128xf32>
    %c0_15 = arith.constant 0 : index
    %c0_16 = arith.constant 0 : index
    %33 = vector.load %arg5[%c0_15, %c0_16] : memref<1x128xf32, #tpu.memory_space<vmem>>, vector<1x128xf32>
    %34 = vector.broadcast %33 : vector<1x128xf32> to vector<2x128xf32>
    %35 = arith.addf %32, %34 : vector<2x128xf32>
    %c0_17 = arith.constant 0 : index
    %c0_18 = arith.constant 0 : index
    %36 = vector.load %arg6[%c0_17, %c0_18] : memref<2x128xf32, #tpu.memory_space<vmem>>, vector<2x128xf32>
    tpu.vector_store %arg6[%c0_17, %c0_18], %35 {strides = array<i32>} : memref<2x128xf32, #tpu.memory_space<vmem>>, vector<2x128xf32>,
    return
  }
  func.func @transform_0(%arg0: i32) -> (i32, i32, i32) {
    %c0_i32 = arith.constant 0 : i32
    %c0_i32_0 = arith.constant 0 : i32
    %c0_i32_1 = arith.constant 0 : i32
    return %arg0, %c0_i32, %c0_i32_0 : i32, i32, i32
  }
  func.func @transform_1(%arg0: i32) -> (i32, i32) {
    %c0_i32 = arith.constant 0 : i32
    %c0_i32_0 = arith.constant 0 : i32
    %c0_i32_1 = arith.constant 0 : i32
    return %c0_i32, %c0_i32_0 : i32, i32
  }
  func.func @transform_2(%arg0: i32) -> (i32, i32) {
    %c0_i32 = arith.constant 0 : i32
    %c0_i32_0 = arith.constant 0 : i32
    %c0_i32_1 = arith.constant 0 : i32
    return %c0_i32, %c0_i32_0 : i32, i32
  }
  func.func @transform_3(%arg0: i32) -> (i32, i32) {
    %c0_i32 = arith.constant 0 : i32
    %c0_i32_0 = arith.constant 0 : i32
    %c0_i32_1 = arith.constant 0 : i32
    return %c0_i32, %c0_i32_0 : i32, i32
  }
  func.func @transform_4(%arg0: i32) -> (i32, i32) {
    %c0_i32 = arith.constant 0 : i32
    %c0_i32_0 = arith.constant 0 : i32
    %c0_i32_1 = arith.constant 0 : i32
    return %c0_i32, %c0_i32_0 : i32, i32
  }
  func.func @transform_5(%arg0: i32) -> (i32, i32) {
    %c0_i32 = arith.constant 0 : i32
    %c0_i32_0 = arith.constant 0 : i32
    return %arg0, %c0_i32 : i32, i32
  }
}

</mosaic_0001>

<bundles_post_ra>
// kernel: nest_forward.5
= control target key start
LH: loop header
LB: loop body
LE: loop exit
PB: predicated region body
PF: predicated region fallthrough
CT: control target
= control target key end

     0   :  { %vm157_vm0 = vcmask 257024   ;;  %s292_s1 = inlined_call_operand.vmem [shape: bf16[128,32], index: 1, kind: input, shape index: {}]   ;;  %s293_s0 = inlined_call_operand.vmem [shape: f32[32,128], index: 0, kind: input, shape index: {}]   ;;  %s294_s2 = inlined_call_operand.vmem [shape: f32[1,32], index: 2, kind: input, shape index: {}]   ;;  %s295_s3 = inlined_call_operand.vmem [shape: bf16[32,32], index: 3, kind: output, shape index: {}]  }
   0x1   :  { %v213_v0 = vld [vmem:[%s292_s1 + $0x38] sm:$0xff]   ;;  %v214_v1 = vld [vmem:[%s292_s1 + $0x30] sm:$0xff]   ;;  %v215_v2 = vld [vmem:[%s292_s1 + $0x28] sm:$0xff]  }
   0x2   :  { %193 = vmatprep.subr.bf16.mxu0 %v213_v0  ;;  %v216_v3 = vld [vmem:[%s292_s1 + $0x20] sm:$0xff]   ;;  %v16_v5 = vld [vmem:[%s293_s0 + $0x8] sm:$0xff]  ;;  %v217_v7 = vld [vmem:[%s292_s1 + $0x18] sm:$0xff]  }
   0x3   :  { %194 = vmatpush3.bf16.msra.mxu0 %v213_v0  ;;  %v15_v4 = vld [vmem:[%s293_s0] sm:$0xff]  ;;  %v218_v8 = vld [vmem:[%s292_s1 + $0x10] sm:$0xff]   ;;  %v219_v9 = vld [vmem:[%s292_s1 + $0x8] sm:$0xff]  }
   0x4   :  { %195 = vmatprep.subr.bf16.mxu0 %v214_v1  ;;  %v19_v6 = vpack.c.bf16 %v16_v5, %v15_v4  ;;  %v220_v10 = vld [vmem:[%s292_s1] sm:$0xff]   ;;  %v17_v11 = vld [vmem:[%s293_s0 + $0x10] sm:$0xff]  ;;  %v18_v12 = vld [vmem:[%s293_s0 + $0x18] sm:$0xff] }
   0x5   :  { %v20_v13 = vpack.c.bf16 %v18_v12, %v17_v11  ;;  %v166_v14 = vld [vmem:[%s294_s2] ss:$0 sm:$0xff] }
   0x6   :  { %209 = vmatprep.mubr.bf16.mxu0 %v19_v6 }
   0x7   :  { %196 = vmatpush3.bf16.msra.mxu0 %v214_v1 }
   0x8   :  { %197 = vmatprep.subr.bf16.mxu0 %v215_v2 }
   0xb   :  { %198 = vmatpush3.bf16.msra.mxu0 %v215_v2 }
   0xc   :  { %199 = vmatprep.subr.bf16.mxu0 %v216_v3 }
   0xf   :  { %200 = vmatpush3.bf16.msra.mxu0 %v216_v3 }
  0x10   :  { %201 = vmatprep.subr.bf16.mxu0 %v217_v7 }
  0x13   :  { %202 = vmatpush3.bf16.msra.mxu0 %v217_v7 }
  0x14   :  { %203 = vmatprep.subr.bf16.mxu0 %v218_v8 }
  0x17   :  { %204 = vmatpush3.bf16.msra.mxu0 %v218_v8 }
  0x18   :  { %205 = vmatprep.subr.bf16.mxu0 %v219_v9 }
  0x1b   :  { %206 = vmatpush3.bf16.msra.mxu0 %v219_v9 }
  0x1c   :  { %207 = vmatprep.subr.bf16.mxu0 %v220_v10 }
  0x1f   :  { %208 = vmatpush3.bf16.msra.mxu0 %v220_v10 }
  0x22   :  { %210 = vmatmul.mubr.bf16.vlgmr.msra.gmra.mxu0 %v20_v13 }
  0xe2   :  { %v211_v15 = vpop.f32.mrf.mxu0 }
  0xe3   :  { %v135_v16 = vadd.f32 %v211_v15, %v166_v14 }
  0xe4   :  { %v126_v17 = vpop.f32.mrf.mxu0 }
  0xe5   :  { %v181_v18 = vpack.c.bf16 %v135_v16, %v135_v16  ;;  %v127_v19 = vadd.f32 %v166_v14, %v126_v17 }
  0xe6   :  { %v212_v20 = vpop.f32.mrf.mxu0 }
  0xe7   :  { %160 = vst.msk [vmem:[%s295_s3 + $0x8] sm:$0xf] %vm157_vm0, %v181_v18  ;;  %v179_v21 = vpack.c.bf16 %v127_v19, %v127_v19  ;;  %v138_v22 = vadd.f32 %v212_v20, %v166_v14 }
  0xe8   :  { %v129_v23 = vpop.f32.mrf.mxu0 }
  0xe9   :  { %158 = vst.msk [vmem:[%s295_s3] sm:$0xf] %vm157_vm0, %v179_v21  ;;  %v182_v24 = vpack.c.bf16 %v138_v22, %v138_v22  ;;  %v130_v25 = vadd.f32 %v166_v14, %v129_v23 }
  0xeb   :  { %161 = vst.msk [vmem:[%s295_s3 + $0xc] sm:$0xf] %vm157_vm0, %v182_v24  ;;  %v180_v26 = vpack.c.bf16 %v130_v25, %v130_v25 }
  0xed   :  { %159 = vst.msk [vmem:[%s295_s3 + $0x4] sm:$0xf] %vm157_vm0, %v180_v26 }

// kernel: nest_forward.9
= control target key start
LH: loop header
LB: loop body
LE: loop exit
PB: predicated region body
PF: predicated region fallthrough
CT: control target
= control target key end

     0   :  { %vm27_vm0 = vcmask 519168   ;;  %s337_s0 = inlined_call_operand.vmem [shape: bf16[2,4,64], index: 0, kind: input, shape index: {}]   ;;  %s338_s1 = inlined_call_operand.vmem [shape: f32[1,64], index: 1, kind: input, shape index: {}]   ;;  %s339_s2 = inlined_call_operand.vmem [shape: f32[1,64], index: 2, kind: input, shape index: {}]   ;;  %s340_s3 = inlined_call_operand.vmem [shape: f32[64,128], index: 3, kind: input, shape index: {}]   ;;  %s341_s4 = inlined_call_operand.vmem [shape: f32[1,128], index: 4, kind: input, shape index: {}]   ;;  %s342_s5 = inlined_call_operand.hbm [shape: f32[2,128], index: 5, kind: output, shape index: {}]  }
   0x1   :  { %v21_v0 = vld [vmem:[%s337_s0] sm:$0x3]  ;;  %v22_v1 = vld [vmem:[%s337_s0 + $0x2] sm:$0x3] }
   0x2   :  { %v23_v2 = vunpack.c.l.bf16 %v21_v0  ;;  %v24_v3 = vunpack.c.l.bf16 %v22_v1 }
   0x3   :  { %10 = vsyncpa [#allocation3], 0  ;;  %v95_v16 = vld [vmem:[%s340_s3 + $0x38] sm:$0xff]  ;;  %v256_v17 = vmov 0.0   ;;  %v94_v18 = vld [vmem:[%s340_s3 + $0x30] sm:$0xff]  ;;  %vm257_vm1 = vmmov 0  }
   0x4   :  { %v28_v4 = vsel %vm27_vm0, %v23_v2, 0.0  ;;  %v31_v5 = vsel %vm27_vm0, %v24_v3, 0.0  ;;  %208 = vmatprep.subr.mxu0 %v256_v17  ;;  %224 = vmatprep.mubr.msk.f32.mxu0 %vm257_vm1, %v256_v17  ;;  %v93_v19 = vld [vmem:[%s340_s3 + $0x28] sm:$0xff]  ;;  %v92_v20 = vld [vmem:[%s340_s3 + $0x20] sm:$0xff]  ;;  %v91_v21 = vld [vmem:[%s340_s3 + $0x18] sm:$0xff]  ;;  %vm105_vm2 = vcmask 1041409  }
   0x5   :  { %29 = vadd.xlane.f32.xlu0 %v28_v4  ;;  %209 = vmatpush3.msra.mxu0 %v95_v16  ;;  %v90_v22 = vld [vmem:[%s340_s3 + $0x10] sm:$0xff]  ;;  %v89_v23 = vld [vmem:[%s340_s3 + $0x8] sm:$0xff]  ;;  %v88_v24 = vld [vmem:[%s340_s3] sm:$0xff]  ;;  %vm107_vm3 = vcmask 523264   ;;  %s258_s3 = smov [#allocation2]  }
   0x6   :  { %210 = vmatprep.subr.mxu0 %v256_v17  ;;  %v195_v32 = vld [vmem:[%s338_s1] ss:$0 sm:$0xff]  ;;  %s187_s16 = sshll.u32 %s258_s3, 4  ;;  %s188_s16 = int_to_ptr.vmem [resolvable:$true] %s187_s16 }
   0x7   :  { %211 = vmatpush3.msra.mxu0 %v94_v18  ;;  %v196_v34 = vld [vmem:[%s339_s2] ss:$0 sm:$0xff]  ;;  %s234_s17 = scalar_lea.vmem %s188_s16, 32  ;;  %p239_p1 = scmp.lt.s32.totalorder %s188_s16, %s188_s16 }
   0x8   :  { %212 = vmatprep.subr.mxu0 %v256_v17  ;;  %v197_v58 = vld [vmem:[%s341_s4] ss:$0 sm:$0xff]  ;;  %p235_p0 = scmp.ne.s32.totalorder %s188_s16, %s234_s17  ;;  %p240_p2 = scmp.lt.s32.totalorder %s234_s17, %s234_s17 }
   0x9   :  { %32 = vadd.xlane.f32.xlu0 %v31_v5  ;;  %213 = vmatpush3.msra.mxu0 %v93_v19 }
   0xa   :  { %214 = vmatprep.subr.mxu0 %v256_v17  ;;  %p241_p3 = por %p240_p2, %p239_p1 }
   0xb   :  { %215 = vmatpush3.msra.mxu0 %v92_v20 }
   0xc   :  { %216 = vmatprep.subr.mxu0 %v256_v17  ;;  %p242_p4 = pnand %p241_p3, %p235_p0 }
   0xd   :  { %217 = vmatpush3.msra.mxu0 %v91_v21 }
   0xe   :  { %218 = vmatprep.subr.mxu0 %v256_v17 }
   0xf   :  { %219 = vmatpush3.msra.mxu0 %v90_v22 }
  0x10   :  { %220 = vmatprep.subr.mxu0 %v256_v17 }
  0x11   :  { %221 = vmatpush3.msra.mxu0 %v89_v23 }
  0x12   :  { %222 = vmatprep.subr.mxu0 %v256_v17 }
  0x13   :  { %223 = vmatpush3.msra.mxu0 %v88_v24 }
  0x8e   :  { %v30_v6 = vpop.xlane.xlu0 %29 }
  0x8f   :  { %v35_v7 = vmul.f32 0.015625, %v30_v6 }
  0x91   :  { %v37_v8 = vsub.f32 %v23_v2, %v35_v7 }
  0x92   :  { %v33_v9 = vpop.xlane.xlu0 %32 }
  0x93   :  { %v36_v10 = vmul.f32 0.015625, %v33_v9  ;;  %v39_v11 = vmul.f32 %v37_v8, %v37_v8 }
  0x95   :  { %v38_v12 = vsub.f32 %v24_v3, %v36_v10  ;;  %v41_v13 = vsel %vm27_vm0, %v39_v11, 0.0 }
  0x96   :  { %42 = vadd.xlane.f32.xlu1 %v41_v13 }
  0x97   :  { %v40_v14 = vmul.f32 %v38_v12, %v38_v12 }
  0x99   :  { %v44_v15 = vsel %vm27_vm0, %v40_v14, 0.0 }
  0x9a   :  { %45 = vadd.xlane.f32.xlu1 %v44_v15 }
 0x11f   :  { %v43_v25 = vpop.xlane.xlu1 %42 }
 0x120   :  { %v47_v26 = vmul.f32 0.015625, %v43_v25 }
 0x122   :  { %v49_v27 = vadd.f32 1e-05, %v47_v26 }
 0x123   :  { %v46_v28 = vpop.xlane.xlu1 %45 }
 0x124   :  { %230 = vrsqrt.f32 %v49_v27  ;;  %v48_v29 = vmul.f32 0.015625, %v46_v28 }
 0x126   :  { %v50_v30 = vadd.f32 1e-05, %v48_v29 }
 0x128   :  { %232 = vrsqrt.f32 %v50_v30 }
 0x131   :  { %v231_v31 = vpop.eup %230 }
 0x132   :  { %v53_v33 = vmul.f32 %v231_v31, %v37_v8 }
 0x134   :  { %v61_v35 = vmul.f32 %v195_v32, %v53_v33 }
 0x135   :  { %v233_v36 = vpop.eup %232 }
 0x136   :  { %v54_v37 = vmul.f32 %v233_v36, %v38_v12  ;;  %v69_v38 = vadd.f32 %v196_v34, %v61_v35 }
 0x138   :  { %v62_v39 = vmul.f32 %v195_v32, %v54_v37  ;;  %v71_v40 = vsel %vm27_vm0, %v69_v38, 0.0 }
 0x139   :  { %v72_v41 = vrot.slane %v71_v40, 4 }
 0x13a   :  { %v70_v42 = vadd.f32 %v196_v34, %v62_v39 }
 0x13b   :  { %v73_v43 = vadd.f32 %v72_v41, %v71_v40 }
 0x13c   :  { %v78_v44 = vsel %vm27_vm0, %v70_v42, 0.0 }
 0x13d   :  { %v74_v45 = vrot.slane %v73_v43, 2  ;;  %v79_v46 = vrot.slane %v78_v44, 4 }
 0x13f   :  { %v75_v47 = vadd.f32 %v74_v45, %v73_v43  ;;  %v80_v48 = vadd.f32 %v79_v46, %v78_v44 }
 0x141   :  { %v76_v49 = vrot.slane %v75_v47, 1  ;;  %v81_v50 = vrot.slane %v80_v48, 2 }
 0x143   :  { %v82_v51 = vadd.f32 %v81_v50, %v80_v48  ;;  %v77_v52 = vadd.f32 %v76_v49, %v75_v47 }
 0x145   :  { %v83_v53 = vrot.slane %v82_v51, 1  ;;  %v86_v55 = vmul.f32 0.25, %v77_v52 }
 0x147   :  { %v84_v54 = vadd.f32 %v83_v53, %v82_v51 }
 0x149   :  { %v87_v56 = vmul.f32 0.25, %v84_v54 }
 0x14b   :  { %v106_v57 = vsel %vm105_vm2, %v87_v56, %v86_v55 }
 0x14c   :  { %225 = vmatmul.mubr.msk.f32.vlgmr.msra.gmra.mxu0 %vm107_vm3, %v106_v57 }
 0x20c   :  { %v176_v59 = vpop.f32.mrf.mxu0 }
 0x20d   :  { %v177_v60 = vadd.f32 %v197_v58, %v176_v59 }
 0x20e   :  { %v226_v61 = vpop.f32.mrf.mxu0 }
 0x20f   :  { %180 = vst [vmem:[#allocation2] sm:$0x3] %v177_v60 }
 0x210   :  { %245 = shalt.err (!%p242_p4)
}
 0x211   :  { %190 = dma.vmem_to_hbm [thread:$0]  %s188_s16, 32, %s342_s5, [#allocation3]  }
 0x212   :  { %254 = dma.done.wait [#allocation3], 32  }
 0x213   :  { %255 = vsyncadd [#allocation3], 4294967264 }
 0x214   :  { %194 = vsyncpa [#allocation3], 1 }

// kernel: nest_forward.7
= control target key start
LH: loop header
LB: loop body
LE: loop exit
PB: predicated region body
PF: predicated region fallthrough
CT: control target
= control target key end

     0   :  { %s1093_s18 = smov 0   ;;  %s1215_s0 = inlined_call_operand.vmem [shape: bf16[2,24,96], index: 0, kind: input, shape index: {}]   ;;  %s1216_s1 = inlined_call_operand.vmem [shape: bf16[3,96,64], index: 1, kind: input, shape index: {}]   ;;  %s1217_s2 = inlined_call_operand.vmem [shape: f32[1,64], index: 2, kind: input, shape index: {}]   ;;  %s1218_s3 = inlined_call_operand.vmem [shape: f32[1,64], index: 3, kind: input, shape index: {}]   ;;  %s1219_s4 = inlined_call_operand.vmem [shape: f32[1,64], index: 4, kind: input, shape index: {}]   ;;  %s1220_s5 = inlined_call_operand.vmem [shape: bf16[2,2,2,64], index: 5, kind: output, shape index: {}]  }
   0x1 LB: > { %s876_s19 = sadd.s32 4294967295, %s1056_s18   ;;  %p880_p0 = scmp.ge.s32.totalorder %s1056_s18, 1  ;;  %s1056_s18 = sphi %s1093_s18, %s15_s18  }
   0x2   : > { %p187_p1 = scmp.lt.s32.totalorder %s1056_s18, 3 }
   0x4   : > { %p188_p2 = pnand %p880_p0, %p187_p1 }
   0x5   : > { %p214_p3 = scmp.lt.s32.totalorder (!%p188_p2), %s876_s19, 1 }
   0x6   : > { %191 = sbr.rel (%p188_p2) target bundleno = 609 (0x261), region = 40 }
   0xb   : > { %v1024_v0 = vld [vmem:[%s1216_s1 + $0x58] sm:$0xff]   ;;  %v1058_v1 = vmov 0.0   ;;  %v1025_v2 = vld [vmem:[%s1216_s1 + $0x28] sm:$0xff]   ;;  %v1026_v3 = vld [vmem:[%s1216_s1 + $0x50] sm:$0xff]   ;;  %vm1059_vm0 = vmmov 0   ;;  %s1222_s19 = smov (!%p214_p3, %s876_s19), 1 }
   0xc   : > { %962 = vmatprep.subr.bf16.mxu0 %v1058_v1  ;;  %978 = vmatprep.subr.bf16.mxu1 %v1058_v1  ;;  %v1027_v4 = vld [vmem:[%s1216_s1 + $0x20] sm:$0xff]   ;;  %v1028_v5 = vld [vmem:[%s1216_s1 + $0x48] sm:$0xff]   ;;  %s1010_s30 = smul.u32 12, %s1222_s19  ;;  %v1029_v6 = vld [vmem:[%s1216_s1 + $0x18] sm:$0xff]   ;;  %vm261_vm1 = vcmask 1045504   ;;  %vm301_vm2 = vcmask 785408  }
   0xd   : > { %963 = vmatpush3.bf16.msra.mxu0 %v1024_v0  ;;  %974 = vmatprep.mubr.msk.bf16.mxu0 %vm1059_vm0, %v1058_v1  ;;  %v1030_v7 = vld [vmem:[%s1216_s1 + $0x40] sm:$0xff]   ;;  %v1031_v8 = vld [vmem:[%s1216_s1 + $0x10] sm:$0xff]   ;;  %v1032_v11 = vld [vmem:[%s1216_s1 + $0x38] sm:$0xff]   ;;  %vm539_vm3 = vcmask 523264   ;;  %vm614_vm4 = vcmask 1040384   ;;  %vm784_vm5 = vcmask 1041409  }
   0xe   : > { %979 = vmatpush3.bf16.msra.mxu1 %v1025_v2  ;;  %964 = vmatprep.subr.bf16.mxu0 %v1058_v1  ;;  %s1135_s10 = scalar_lea.vmem %s1215_s0, %s1010_s30  ;;  %v1033_v14 = vld [vmem:[%s1216_s1 + $0x8] sm:$0xff]   ;;  %v1034_v15 = vld [vmem:[%s1216_s1 + $0x30] sm:$0xff]   ;;  %v1035_v18 = vld [vmem:[%s1216_s1] sm:$0xff]   ;;  %s882_s20 = sshll.u32 %s1222_s19, 1  ;;  %vm820_vm6 = vcmask 516096  }
   0xf   : > { %980 = vmatprep.subr.bf16.mxu1 %v1058_v1  ;;  %990 = vmatprep.mubr.msk.bf16.mxu1 %vm1059_vm0, %v1058_v1  ;;  %v225_v9 = vld [vmem:[%s1135_s10 + $0x4] sm:$0xf]  ;;  %v238_v10 = vld [vmem:[%s1135_s10] sm:$0xc]  ;;  %v1039_v22 = vld [vmem:[%s1216_s1 + $0x88] sm:$0xff]   ;;  %s222_s23 = scalar_lea.vmem %s1220_s5, %s882_s20 }
  0x10   : > { %v1037_v12 = vld [vmem:[%s1135_s10 + $0x8] ss:$0 sps:$4 sm:$0x33]   ;;  %v895_v13 = vcombine.low %v238_v10, %v225_v9  ;;  %v224_v19 = vld [vmem:[%s1135_s10] sm:$0xf]  ;;  %v1041_v24 = vld [vmem:[%s1216_s1 + $0x78] sm:$0xff]   ;;  %v597_v10 = vlaneseq }
  0x11   : > { %965 = vmatpush3.bf16.msra.mxu0 %v1026_v3  ;;  %v263_v17 = vrot.slane %v1037_v12, 2  ;;  %v904_v21 = vcombine.low %v224_v19, %v225_v9  ;;  %v1040_v23 = vld [vmem:[%s1216_s1 + $0x80] sm:$0xff]   ;;  %v1042_v25 = vld [vmem:[%s1216_s1 + $0x70] sm:$0xff]   ;;  %v1043_v26 = vld [vmem:[%s1216_s1 + $0x68] sm:$0xff]  }
  0x12   : > { %981 = vmatpush3.bf16.msra.mxu1 %v1027_v4  ;;  %966 = vmatprep.subr.bf16.mxu0 %v1058_v1  ;;  %v262_v16 = vrot.slane %v895_v13, 2  ;;  %v1044_v27 = vld [vmem:[%s1216_s1 + $0x60] sm:$0xff]   ;;  %v429_v28 = vld [vmem:[%s1135_s10 + $0x8] sm:$0xf] }
  0x13   : > { %982 = vmatprep.subr.bf16.mxu1 %v1058_v1  ;;  %v924_v29 = vcombine.low %v225_v9, %v429_v28  ;;  %v932_v46 = vld [vmem:[%s1217_s2] ss:$0 sm:$0xff] }
  0x14   : > { %v264_v20 = vsel %vm261_vm1, %v262_v16, %v263_v17  ;;  %v933_v4 = vld [vmem:[%s1218_s3] ss:$0 sm:$0xff]  ;;  %v598_v16 = vshrl.u32 %v597_v10, 7 }
  0x15   : > { %967 = vmatpush3.bf16.msra.mxu0 %v1028_v5 }
  0x16   : > { %983 = vmatpush3.bf16.msra.mxu1 %v1029_v6  ;;  %968 = vmatprep.subr.bf16.mxu0 %v1058_v1  ;;  %v934_v6 = vld [vmem:[%s1219_s4] ss:$0 sm:$0xff] }
  0x17   : > { %984 = vmatprep.subr.bf16.mxu1 %v1058_v1 }
  0x19   : > { %969 = vmatpush3.bf16.msra.mxu0 %v1030_v7 }
  0x1a   : > { %985 = vmatpush3.bf16.msra.mxu1 %v1031_v8  ;;  %970 = vmatprep.subr.bf16.mxu0 %v1058_v1  ;;  %v1060_v8 = vmov 1983009808  }
  0x1b   : > { %986 = vmatprep.subr.bf16.mxu1 %v1058_v1  ;;  %v595_v9 = vunpack.c.l.s4 %v1060_v8 }
  0x1d   : > { %971 = vmatpush3.bf16.msra.mxu0 %v1032_v11 }
  0x1e   : > { %987 = vmatpush3.bf16.msra.mxu1 %v1033_v14  ;;  %972 = vmatprep.subr.bf16.mxu0 %v1058_v1 }
  0x1f   : > { %988 = vmatprep.subr.bf16.mxu1 %v1058_v1 }
  0x21   : > { %973 = vmatpush3.bf16.msra.mxu0 %v1034_v15  ;;  %v596_v15 = vunpack.c.0.s8 %v595_v9 }
  0x22   : > { %989 = vmatpush3.bf16.msra.mxu1 %v1035_v18  ;;  %994 = vmatprep.subr.bf16.mxu0 %v1058_v1 }
  0x24   : > { %975 = vmatmul.mubr.msk.bf16.vlgmr.msra.gmra.mxu0 %vm301_vm2, %v264_v20  ;;  %v599_v20 = vsub.s32 %v596_v15, %v598_v16 }
  0x25   : > { %991 = vmatmul.mubr.msk.bf16.vlgmr.msra.gmra.mxu1 %vm301_vm2, %v904_v21  ;;  %995 = vmatpush3.bf16.msra.mxu0 %v1039_v22  ;;  %v1061_v22 = vmov 1966171168  }
  0x26   : > { %996 = vmatprep.subr.bf16.mxu0 %v1058_v1  ;;  %1006 = vmatprep.mubr.msk.bf16.mxu0 %vm1059_vm0, %v1058_v1 }
  0x29   : > { %997 = vmatpush3.bf16.msra.mxu0 %v1040_v23  ;;  %v668_v23 = vunpack.c.l.s4 %v1061_v22 }
  0x2a   : > { %998 = vmatprep.subr.bf16.mxu0 %v1058_v1 }
  0x2b   : > { %v669_v28 = vunpack.c.0.s8 %v668_v23 }
  0x2d   : > { %999 = vmatpush3.bf16.msra.mxu0 %v1041_v24 }
  0x2e   : > { %1000 = vmatprep.subr.bf16.mxu0 %v1058_v1 }
  0x31   : > { %1001 = vmatpush3.bf16.msra.mxu0 %v1042_v25 }
  0x32   : > { %1002 = vmatprep.subr.bf16.mxu0 %v1058_v1 }
  0x35   : > { %1003 = vmatpush3.bf16.msra.mxu0 %v1043_v26 }
  0x36   : > { %1004 = vmatprep.subr.bf16.mxu0 %v1058_v1 }
  0x39   : > { %1005 = vmatpush3.bf16.msra.mxu0 %v1044_v27 }
  0x3c   : > { %1007 = vmatmul.mubr.msk.bf16.vlgmr.msra.gmra.mxu0 %vm301_vm2, %v924_v29  ;;  %v1062_v29 = vmov 1935823168  }
  0xe4   : > { %v339_v30 = vpop.f32.mrf.mxu0 }
  0xe5   : > { %v422_v31 = vpop.f32.mrf.mxu1 }
  0xe6   : > { %v976_v32 = vpop.f32.mrf.mxu0  ;;  %v423_v40 = vadd.f32 %v422_v31, %v339_v30  ;;  %v724_v30 = vunpack.c.l.s4 %v1062_v29 }
  0xe7   : > { %v992_v33 = vpop.f32.mrf.mxu1 }
  0xe8   : > { %v342_v34 = vpop.f32.mrf.mxu0 }
  0xe9   : > { %v425_v35 = vpop.f32.mrf.mxu1 }
  0xea   : > { %v977_v36 = vpop.f32.mrf.mxu0  ;;  %v426_v41 = vadd.f32 %v425_v35, %v342_v34 }
  0xeb   : > { %v993_v37 = vpop.f32.mrf.mxu1 }
  0xfc   : > { %v519_v38 = vpop.f32.mrf.mxu0 }
  0xfd   : > { %v526_v43 = vadd.f32 %v519_v38, %v423_v40 }
  0xfe   : > { %v1008_v39 = vpop.f32.mrf.mxu0 }
  0xff   : > { %v535_v49 = vadd.f32 %v932_v46, %v526_v43 }
 0x100   : > { %v522_v42 = vpop.f32.mrf.mxu0 }
 0x101   : > { %v527_v44 = vadd.f32 %v522_v42, %v426_v41  ;;  %v540_v50 = vsel %vm539_vm3, %v535_v49, 0.0 }
 0x102   : > { %v1009_v45 = vpop.f32.mrf.mxu0 }
 0x103   : > { %v536_v47 = vadd.f32 %v932_v46, %v527_v44 }
 0x105   : > { %v543_v48 = vsel %vm539_vm3, %v536_v47, 0.0 }
 0x106   : > { %544 = vadd.xlane.f32.xlu0 %v543_v48  ;;  %v725_v48 = vunpack.c.0.s8 %v724_v30 }
 0x10a   : > { %541 = vadd.xlane.f32.xlu0 %v540_v50 }
 0x18f   : > { %v545_v51 = vpop.xlane.xlu0 %544 }
 0x190   : > { %v548_v52 = vmul.f32 0.015625, %v545_v51 }
 0x192   : > { %v550_v53 = vsub.f32 %v536_v47, %v548_v52  ;;  %v672_v47 = vsub.s32 %v669_v28, %v598_v16 }
 0x193   : > { %v542_v54 = vpop.xlane.xlu0 %541 }
 0x194   : > { %v547_v55 = vmul.f32 0.015625, %v542_v54  ;;  %v552_v56 = vmul.f32 %v550_v53, %v550_v53 }
 0x196   : > { %v549_v57 = vsub.f32 %v535_v49, %v547_v55  ;;  %v556_v58 = vsel %vm539_vm3, %v552_v56, 0.0 }
 0x197   : > { %557 = vadd.xlane.f32.xlu1 %v556_v58 }
 0x198   : > { %v551_v59 = vmul.f32 %v549_v57, %v549_v57 }
 0x19a   : > { %v553_v60 = vsel %vm539_vm3, %v551_v59, 0.0 }
 0x19b   : > { %554 = vadd.xlane.f32.xlu1 %v553_v60 }
 0x220   : > { %v558_v61 = vpop.xlane.xlu1 %557 }
 0x221   : > { %v560_v62 = vmul.f32 0.015625, %v558_v61 }
 0x223   : > { %v562_v63 = vadd.f32 1e-06, %v560_v62 }
 0x224   : > { %v555_v0 = vpop.xlane.xlu1 %554 }
 0x225   : > { %1046 = vrsqrt.f32 %v562_v63  ;;  %v559_v1 = vmul.f32 0.015625, %v555_v0 }
 0x227   : > { %v561_v2 = vadd.f32 1e-06, %v559_v1 }
 0x229   : > { %1048 = vrsqrt.f32 %v561_v2 }
 0x232   : > { %v1047_v3 = vpop.eup %1046 }
 0x233   : > { %v566_v5 = vmul.f32 %v1047_v3, %v550_v53 }
 0x235   : > { %v574_v7 = vmul.f32 %v933_v4, %v566_v5 }
 0x236   : > { %v1049_v11 = vpop.eup %1048 }
 0x237   : > { %v582_v12 = vadd.f32 %v934_v6, %v574_v7  ;;  %v565_v13 = vmul.f32 %v1049_v11, %v549_v57  ;;  %v728_v57 = vsub.s32 %v725_v48, %v598_v16 }
 0x239   : > { %v587_v14 = vrot.slane %v582_v12, 4  ;;  %v573_v17 = vmul.f32 %v933_v4, %v565_v13 }
 0x23b   : > { %v581_v18 = vadd.f32 %v934_v6, %v573_v17  ;;  %v590_v19 = vmax.f32 %v582_v12, %v587_v14 }
 0x23d   : > { %v584_v21 = vrot.slane %v581_v18, 4 }
 0x23f   : > { %v589_v24 = vmax.f32 %v581_v18, %v584_v21  ;;  %v591_v25 = vmax.f32 %v590_v19, %v584_v21 }
 0x241   : > { %v600_v26 = vrot.slane %v589_v24, %v599_v20  ;;  %v608_v27 = vrot.slane %v591_v25, %v599_v20 }
 0x243   : > { %v601_v31 = vcombine.high %v600_v26, %v600_v26  ;;  %v609_v32 = vcombine.high %v608_v27, %v608_v27  ;;  %v615_v33 = vsel %vm614_vm4, -inf, %v600_v26  ;;  %v616_v34 = vsel %vm614_vm4, -inf, %v608_v27 }
 0x244   : > { %v935_v35 = vrot.slane %v600_v26, 9  ;;  %v937_v36 = vrot.slane %v608_v27, 9  ;;  %v641_v37 = vrot.slane %v615_v33, %v599_v20  ;;  %v648_v38 = vrot.slane %v616_v34, %v599_v20 }
 0x245   : > { %v936_v39 = vrot.slane %v601_v31, 9  ;;  %v938_v40 = vrot.slane %v609_v32, 9 }
 0x246   : > { %v629_v41 = vmax.f32 %v600_v26, %v935_v35  ;;  %v631_v42 = vmax.f32 %v608_v27, %v937_v36  ;;  %v649_v43 = vrot.slane %v641_v37, 1  ;;  %v650_v44 = vrot.slane %v648_v38, 1 }
 0x247   : > { %v630_v45 = vmax.f32 %v601_v31, %v936_v39  ;;  %v632_v46 = vmax.f32 %v609_v32, %v938_v40 }
 0x248   : > { %v655_v49 = vmax.f32 %v629_v41, %v641_v37  ;;  %v657_v50 = vmax.f32 %v631_v42, %v648_v38 }
 0x249   : > { %v656_v51 = vmax.f32 %v630_v45, %v649_v43  ;;  %v658_v52 = vmax.f32 %v632_v46, %v650_v44 }
 0x24a   : > { %v659_v53 = vpack.c.bf16 %v655_v49, %v655_v49  ;;  %v661_v54 = vpack.c.bf16 %v657_v50, %v657_v50 }
 0x24b   : > { %v660_v55 = vpack.c.bf16 %v656_v51, %v656_v51  ;;  %v662_v56 = vpack.c.bf16 %v658_v52, %v658_v52 }
 0x24c   : > { %v673_v58 = vrot.slane %v659_v53, %v672_v47  ;;  %v701_v59 = vrot.slane %v661_v54, %v672_v47 }
 0x24d   : > { %v687_v60 = vrot.slane %v660_v55, %v672_v47  ;;  %v715_v61 = vrot.slane %v662_v56, %v672_v47 }
 0x24e   : > { %v680_v62 = vrot.slane %v673_v58, %v672_v47  ;;  %v708_v63 = vrot.slane %v701_v59, %v672_v47 }
 0x24f   : > { %v694_v0 = vrot.slane %v687_v60, %v672_v47  ;;  %v722_v1 = vrot.slane %v715_v61, %v672_v47 }
 0x250   : > { %v729_v2 = vrot.slane %v680_v62, %v728_v57  ;;  %v757_v3 = vrot.slane %v708_v63, %v728_v57 }
 0x251   : > { %v743_v4 = vrot.slane %v694_v0, %v728_v57  ;;  %v771_v5 = vrot.slane %v722_v1, %v728_v57 }
 0x252   : > { %v736_v6 = vrot.slane %v729_v2, %v728_v57  ;;  %v764_v8 = vrot.slane %v757_v3, %v728_v57 }
 0x253   : > { %v750_v7 = vrot.slane %v743_v4, %v728_v57  ;;  %v778_v9 = vrot.slane %v771_v5, %v728_v57 }
 0x254   : > { %v779_v12 = vunpack.c.l.b16 %v736_v6  ;;  %v781_v13 = vunpack.c.l.b16 %v764_v8 }
 0x255   : > { %v780_v10 = vunpack.c.l.b16 %v750_v7  ;;  %v782_v11 = vunpack.c.l.b16 %v778_v9 }
 0x257   : > { %v783_v14 = vrot.slane %v780_v10, 7  ;;  %v786_v15 = vrot.slane %v782_v11, 7 }
 0x259   : > { %v785_v16 = vsel %vm784_vm5, %v783_v14, %v779_v12  ;;  %v787_v17 = vsel %vm784_vm5, %v786_v15, %v781_v13 }
 0x25a   : > { %v788_v18 = vpack.c.b16 %v785_v16, %v785_v16  ;;  %v789_v19 = vpack.c.b16 %v787_v17, %v787_v17 }
 0x25c   : > { %v796_v20 = vrot.slane %v788_v18, %v672_v47  ;;  %v810_v21 = vrot.slane %v789_v19, %v672_v47 }
 0x25e   : > { %v803_v22 = vrot.slane %v796_v20, %v672_v47  ;;  %v817_v23 = vrot.slane %v810_v21, %v672_v47 }
 0x260   : > { %821 = vst.msk [vmem:[%s222_s23] sm:$0x1] %vm820_vm6, %v803_v22  ;;  %822 = vst.msk [vmem:[%s222_s23 + $0x1] sm:$0x1] %vm820_vm6, %v817_v23 }
 0x261 PF: > { %s15_s18 = sadd.s32 1, %s1056_s18  }
 0x262   : > { %p12_p4 = scmp.ge.s32.totalorder %s15_s18, 4  }
 0x264   :  { %14 = sbr.rel (!%p12_p4) target bundleno = 1 (0x1), region = 72 }

// kernel: nest_forward.6
= control target key start
LH: loop header
LB: loop body
LE: loop exit
PB: predicated region body
PF: predicated region fallthrough
CT: control target
= control target key end

     0   :  { %vm64_vm0 = vcmask 261120   ;;  %vm3072_vm1 = vmmov 0   ;;  %s3073_s26 = smov 96   ;;  %vm241_vm2 = vcmask 130048   ;;  %vm734_vm3 = vcmask 1041408   ;;  %s3075_s27 = smov 80   ;;  %s3768_s0 = inlined_call_operand.vmem [shape: bf16[32,32], index: 0, kind: input, shape index: {}]   ;;  %s3769_s1 = inlined_call_operand.vmem [shape: f32[16,32], index: 1, kind: input, shape index: {}]   ;;  %s3770_s4 = inlined_call_operand.vmem [shape: bf16[32,96], index: 4, kind: input, shape index: {}]   ;;  %s3771_s2 = inlined_call_operand.vmem [shape: f32[1,32], index: 2, kind: input, shape index: {}]   ;;  %s3772_s3 = inlined_call_operand.vmem [shape: f32[1,32], index: 3, kind: input, shape index: {}]   ;;  %s3773_s5 = inlined_call_operand.vmem [shape: f32[1,96], index: 5, kind: input, shape index: {}]   ;;  %s3774_s6 = inlined_call_operand.vmem [shape: bf16[32,32], index: 6, kind: input, shape index: {}]   ;;  %s3775_s7 = inlined_call_operand.vmem [shape: f32[1,32], index: 7, kind: input, shape index: {}]   ;;  %s3776_s10 = inlined_call_operand.vmem [shape: bf16[32,128], index: 10, kind: input, shape index: {}]   ;;  %s3777_s8 = inlined_call_operand.vmem [shape: f32[1,32], index: 8, kind: input, shape index: {}]   ;;  %s3778_s9 = inlined_call_operand.vmem [shape: f32[1,32], index: 9, kind: input, shape index: {}]   ;;  %s3779_s12 = inlined_call_operand.vmem [shape: bf16[128,32], index: 12, kind: input, shape index: {}]   ;;  %s3780_s11 = inlined_call_operand.vmem [shape: f32[1,128], index: 11, kind: input, shape index: {}]   ;;  %s3781_s13 = inlined_call_operand.vmem [shape: f32[1,32], index: 13, kind: input, shape index: {}]   ;;  %s3782_s14 = inlined_call_operand.vmem [shape: bf16[32,32], index: 14, kind: output, shape index: {}]  }
   0x1   :  { %v2612_v0 = vld [vmem:[%s3768_s0] sm:$0xff]   ;;  %v2619_v2 = vld [vmem:[%s3768_s0 + $0x8] sm:$0xff]   ;;  %vm631_vm4 = vcmask 27648   ;;  %s3076_s28 = smov 112   ;;  %vm730_vm5 = vcmask 31744   ;;  %s3077_s29 = smov 48  }
   0x2   :  { %v56_v1 = vld [vmem:[%s3769_s1] sm:$0xff]  ;;  %v2613_v3 = vunpack.c.l.bf16 %v2612_v0  ;;  %v2617_v4 = vunpack.c.l.bf16 %v2619_v2  ;;  %v2614_v5 = vunpack.c.h.bf16 %v2612_v0  ;;  %v57_v6 = vld [vmem:[%s3769_s1 + $0x8] sm:$0xff]  ;;  %v2618_v7 = vunpack.c.h.bf16 %v2619_v2  ;;  %s3078_s16 = smov 16  }
   0x3   :  { %v2961_v36 = vld [vmem:[%s3770_s4 + $0x8] sm:$0xff]   ;;  %v2962_v37 = vld [vmem:[%s3770_s4] sm:$0xff]   ;;  %vm2526_vm10 = vcmask 257024  }
   0x4   :  { %v3167_v8 = vadd.f32 %v2613_v3, %v56_v1  ;;  %v3169_v9 = vadd.f32 %v2617_v4, %v56_v1  ;;  %v3171_v10 = vadd.f32 %v2614_v5, %v57_v6  ;;  %v3173_v11 = vadd.f32 %v2618_v7, %v57_v6  ;;  %2706 = vmatprep.subr.bf16.mxu0 %v2961_v36  ;;  %v2535_v52 = vld [vmem:[%s3771_s2] ss:$0 sm:$0xff] }
   0x5   :  { %2707 = vmatpush3.bf16.msra.mxu0 %v2961_v36  ;;  %v2536_v57 = vld [vmem:[%s3772_s3] ss:$0 sm:$0xff]  ;;  %v3071_v6 = vmov 0.0  }
   0x6   :  { %v65_v12 = vsel %vm64_vm0, %v3167_v8, 0.0  ;;  %v71_v13 = vsel %vm64_vm0, %v3169_v9, 0.0  ;;  %v68_v14 = vsel %vm64_vm0, %v3171_v10, 0.0  ;;  %v74_v15 = vsel %vm64_vm0, %v3173_v11, 0.0  ;;  %2708 = vmatprep.subr.bf16.mxu0 %v2962_v37  ;;  %2726 = vmatprep.subr.bf16.mxu1 %v3071_v6 }
   0x7   :  { %66 = vadd.xlane.f32.xlu0 %v65_v12  ;;  %72 = vadd.xlane.f32.xlu1 %v71_v13  ;;  %v2537_v12 = vld [vmem:[%s3773_s5] ss:$0 sm:$0xff]  ;;  %s3074_s5 = smov 64  }
   0x8   :  { %2728 = vmatprep.mubr.msk.bf16.mxu1 %vm3072_vm1, %v3071_v6 }
   0x9   :  { %2709 = vmatpush3.bf16.msra.mxu0 %v2962_v37 }
   0xa   :  { %2714 = vmatprep.subr.bf16.mxu0 %v3071_v6 }
   0xb   :  { %69 = vadd.xlane.f32.xlu0 %v68_v14  ;;  %75 = vadd.xlane.f32.xlu1 %v74_v15 }
  0x90   :  { %v67_v16 = vpop.xlane.xlu0 %66  ;;  %v73_v17 = vpop.xlane.xlu1 %72 }
  0x91   :  { %v78_v18 = vmul.f32 0.03125, %v67_v16  ;;  %v80_v19 = vmul.f32 0.03125, %v73_v17 }
  0x93   :  { %v82_v20 = vsub.f32 %v3167_v8, %v78_v18  ;;  %v84_v21 = vsub.f32 %v3169_v9, %v80_v19 }
  0x94   :  { %v70_v22 = vpop.xlane.xlu0 %69  ;;  %v76_v23 = vpop.xlane.xlu1 %75 }
  0x95   :  { %v79_v24 = vmul.f32 0.03125, %v70_v22  ;;  %v81_v25 = vmul.f32 0.03125, %v76_v23  ;;  %v86_v26 = vmul.f32 %v82_v20, %v82_v20  ;;  %v88_v27 = vmul.f32 %v84_v21, %v84_v21 }
  0x97   :  { %v83_v28 = vsub.f32 %v3171_v10, %v79_v24  ;;  %v85_v29 = vsub.f32 %v3173_v11, %v81_v25  ;;  %v90_v30 = vsel %vm64_vm0, %v86_v26, 0.0  ;;  %v96_v31 = vsel %vm64_vm0, %v88_v27, 0.0 }
  0x98   :  { %91 = vadd.xlane.f32.xlu0 %v90_v30 }
  0x99   :  { %v87_v32 = vmul.f32 %v83_v28, %v83_v28  ;;  %v89_v33 = vmul.f32 %v85_v29, %v85_v29 }
  0x9b   :  { %v93_v34 = vsel %vm64_vm0, %v87_v32, 0.0  ;;  %v99_v35 = vsel %vm64_vm0, %v89_v33, 0.0 }
  0x9c   :  { %97 = vadd.xlane.f32.xlu0 %v96_v31  ;;  %94 = vadd.xlane.f32.xlu1 %v93_v34 }
  0xa0   :  { %100 = vadd.xlane.f32.xlu1 %v99_v35 }
 0x121   :  { %v92_v38 = vpop.xlane.xlu0 %91 }
 0x122   :  { %v102_v39 = vmul.f32 0.03125, %v92_v38 }
 0x124   :  { %v106_v40 = vadd.f32 1e-06, %v102_v39 }
 0x125   :  { %v95_v41 = vpop.xlane.xlu1 %94  ;;  %v98_v42 = vpop.xlane.xlu0 %97 }
 0x126   :  { %2975 = vrsqrt.f32 %v106_v40  ;;  %v103_v43 = vmul.f32 0.03125, %v95_v41  ;;  %v104_v44 = vmul.f32 0.03125, %v98_v42 }
 0x128   :  { %v107_v45 = vadd.f32 1e-06, %v103_v43  ;;  %v108_v46 = vadd.f32 1e-06, %v104_v44 }
 0x129   :  { %v101_v47 = vpop.xlane.xlu1 %100 }
 0x12a   :  { %2977 = vrsqrt.f32 %v107_v45  ;;  %v105_v48 = vmul.f32 0.03125, %v101_v47 }
 0x12b   :  { %2979 = vrsqrt.f32 %v108_v46 }
 0x12c   :  { %v109_v49 = vadd.f32 1e-06, %v105_v48 }
 0x12e   :  { %2981 = vrsqrt.f32 %v109_v49 }
 0x133   :  { %v2976_v50 = vpop.eup %2975 }
 0x134   :  { %v114_v51 = vmul.f32 %v2976_v50, %v82_v20 }
 0x136   :  { %v124_v56 = vmul.f32 %v2535_v52, %v114_v51 }
 0x137   :  { %v2978_v53 = vpop.eup %2977 }
 0x138   :  { %v2980_v54 = vpop.eup %2979  ;;  %v115_v55 = vmul.f32 %v2978_v53, %v83_v28  ;;  %v134_v61 = vadd.f32 %v2536_v57, %v124_v56 }
 0x139   :  { %v116_v58 = vmul.f32 %v2980_v54, %v84_v21 }
 0x13a   :  { %v125_v59 = vmul.f32 %v2535_v52, %v115_v55 }
 0x13b   :  { %v2982_v60 = vpop.eup %2981  ;;  %v126_v0 = vmul.f32 %v2535_v52, %v116_v58 }
 0x13c   :  { %v135_v62 = vadd.f32 %v2536_v57, %v125_v59  ;;  %v117_v63 = vmul.f32 %v2982_v60, %v85_v29 }
 0x13d   :  { %v136_v3 = vadd.f32 %v2536_v57, %v126_v0 }
 0x13e   :  { %v138_v1 = vpack.c.bf16 %v135_v62, %v134_v61  ;;  %v127_v2 = vmul.f32 %v2535_v52, %v117_v63 }
 0x140   :  { %2710 = vmatprep.mubr.msk.bf16.mxu0 %vm64_vm0, %v138_v1  ;;  %v137_v4 = vadd.f32 %v2536_v57, %v127_v2 }
 0x142   :  { %v139_v5 = vpack.c.bf16 %v137_v4, %v136_v3 }
 0x144   :  { %2711 = vmatmul.mubr.msk.bf16.vlgmr.msra.gmra.mxu0 %vm64_vm0, %v139_v5 }
 0x145   :  { %2716 = vmatprep.mubr.msk.bf16.mxu0 %vm3072_vm1, %v3071_v6 }
 0x204   :  { %v2712_v7 = vpop.f32.mrf.mxu0 }
 0x205   :  { %v212_v16 = vadd.f32 %v2712_v7, %v2537_v12 }
 0x206   :  { %v203_v13 = vpop.f32.mrf.mxu0 }
 0x207   :  { %v204_v14 = vadd.f32 %v2537_v12, %v203_v13  ;;  %v3219_v22 = vpack.c.bf16 %v212_v16, %v212_v16  ;;  %v224_v27 = vcombine.high %v212_v16, %v212_v16 }
 0x208   :  { %v2713_v15 = vpop.f32.mrf.mxu0 }
 0x209   :  { %v222_v17 = vcombine.high %v204_v14, %v204_v14  ;;  %v3214_v18 = vpack.c.bf16 %v204_v14, %v204_v14  ;;  %v215_v23 = vadd.f32 %v2713_v15, %v2537_v12  ;;  %v3232_v29 = vpack.c.bf16 %v224_v27, %v224_v27 }
 0x20a   :  { %v206_v19 = vpop.f32.mrf.mxu0 }
 0x20b   :  { %v3216_v20 = vpack.c.bf16 %v222_v17, %v222_v17  ;;  %v207_v21 = vadd.f32 %v2537_v12, %v206_v19  ;;  %239 = vrot.lane.b32.xlu0 %v3214_v18, %s3073_s26  ;;  %v3225_v26 = vpack.c.bf16 %v215_v23, %v215_v23  ;;  %v225_v30 = vcombine.high %v215_v23, %v215_v23 }
 0x20d   :  { %289 = vrot.lane.b32.xlu1 %v3216_v20, %s3073_s26  ;;  %v223_v24 = vcombine.high %v207_v21, %v207_v21  ;;  %v3222_v25 = vpack.c.bf16 %v207_v21, %v207_v21  ;;  %v3237_v31 = vpack.c.bf16 %v225_v30, %v225_v30 }
 0x20f   :  { %436 = vrot.lane.b32.xlu0 %v3219_v22, %s3073_s26  ;;  %v3228_v28 = vpack.c.bf16 %v223_v24, %v223_v24 }
 0x211   :  { %338 = vrot.lane.b32.xlu1 %v3222_v25, %s3073_s26 }
 0x213   :  { %534 = vrot.lane.b32.xlu0 %v3225_v26, %s3073_s26 }
 0x215   :  { %387 = vrot.lane.b32.xlu1 %v3228_v28, %s3073_s26 }
 0x217   :  { %728 = vrot.lane.b32.xlu0 %v3214_v18, %s3074_s5 }
 0x219   :  { %485 = vrot.lane.b32.xlu1 %v3232_v29, %s3073_s26 }
 0x21d   :  { %583 = vrot.lane.b32.xlu1 %v3237_v31, %s3073_s26 }
 0x221   :  { %778 = vrot.lane.b32.xlu1 %v3216_v20, %s3074_s5 }
 0x225   :  { %826 = vrot.lane.b32.xlu1 %v3222_v25, %s3074_s5 }
 0x229   :  { %874 = vrot.lane.b32.xlu1 %v3228_v28, %s3074_s5 }
 0x27d   :  { %v240_v32 = vpop.permute.xlu0 %239 }
 0x27e   :  { %v246_v33 = vsel %vm241_vm2, %v240_v32, 0 }
 0x27f   :  { %2715 = vmatpush3.bf16.xpose.msra.mxu0 %v246_v33  ;;  %v290_v34 = vpop.permute.xlu1 %289 }
 0x280   :  { %2720 = vmatprep.subr.bf16.mxu0 %v3071_v6  ;;  %v295_v37 = vsel %vm241_vm2, %v290_v34, 0 }
 0x281   :  { %v437_v38 = vpop.permute.xlu0 %436 }
 0x282   :  { %v442_v40 = vsel %vm241_vm2, %v437_v38, 0 }
 0x283   :  { %v339_v35 = vpop.permute.xlu1 %338 }
 0x284   :  { %v344_v36 = vsel %vm241_vm2, %v339_v35, 0 }
 0x285   :  { %2727 = vmatpush3.bf16.xpose.msra.mxu1 %v344_v36  ;;  %v535_v42 = vpop.permute.xlu0 %534 }
 0x286   :  { %2717 = vmatmul.mubr.msk.bf16.vlgmr.msra.gmra.mxu0 %vm241_vm2, %v3214_v18  ;;  %2738 = vmatprep.subr.bf16.mxu1 %v3071_v6  ;;  %v540_v44 = vsel %vm241_vm2, %v535_v42, 0 }
 0x287   :  { %2721 = vmatpush3.bf16.xpose.msra.mxu0 %v295_v37  ;;  %2722 = vmatprep.mubr.msk.bf16.mxu0 %vm3072_vm1, %v3071_v6  ;;  %v388_v39 = vpop.permute.xlu1 %387 }
 0x288   :  { %2732 = vmatprep.subr.bf16.mxu0 %v3071_v6  ;;  %v393_v41 = vsel %vm241_vm2, %v388_v39, 0 }
 0x289   :  { %v729_v46 = vpop.permute.xlu0 %728 }
 0x28a   :  { %v736_v48 = vsel %vm734_vm3, %v729_v46, 0 }
 0x28b   :  { %v486_v43 = vpop.permute.xlu1 %485 }
 0x28c   :  { %2729 = vmatmul.mubr.msk.bf16.vlgmr.msra.gmra.mxu1 %vm241_vm2, %v3222_v25  ;;  %v491_v45 = vsel %vm241_vm2, %v486_v43, 0 }
 0x28d   :  { %2739 = vmatpush3.bf16.xpose.msra.mxu1 %v442_v40  ;;  %2740 = vmatprep.mubr.msk.bf16.mxu1 %vm3072_vm1, %v3071_v6 }
 0x28e   :  { %2723 = vmatmul.mubr.msk.bf16.vlgmr.msra.gmra.mxu0 %vm241_vm2, %v3216_v20  ;;  %2750 = vmatprep.subr.bf16.mxu1 %v3071_v6 }
 0x28f   :  { %2733 = vmatpush3.bf16.xpose.msra.mxu0 %v393_v41  ;;  %2734 = vmatprep.mubr.msk.bf16.mxu0 %vm3072_vm1, %v3071_v6  ;;  %v584_v47 = vpop.permute.xlu1 %583 }
 0x290   :  { %2744 = vmatprep.subr.bf16.mxu0 %v3071_v6  ;;  %v589_v49 = vsel %vm241_vm2, %v584_v47, 0 }
 0x293   :  { %v779_v50 = vpop.permute.xlu1 %778 }
 0x294   :  { %2741 = vmatmul.mubr.msk.bf16.vlgmr.msra.gmra.mxu1 %vm241_vm2, %v3219_v22  ;;  %v784_v51 = vsel %vm734_vm3, %v779_v50, 0 }
 0x295   :  { %2751 = vmatpush3.bf16.xpose.msra.mxu1 %v540_v44  ;;  %2752 = vmatprep.mubr.msk.bf16.mxu1 %vm3072_vm1, %v3071_v6 }
 0x296   :  { %2735 = vmatmul.mubr.msk.bf16.vlgmr.msra.gmra.mxu0 %vm241_vm2, %v3228_v28  ;;  %2762 = vmatprep.subr.bf16.mxu1 %v3071_v6 }
 0x297   :  { %2745 = vmatpush3.bf16.xpose.msra.mxu0 %v491_v45  ;;  %2746 = vmatprep.mubr.msk.bf16.mxu0 %vm3072_vm1, %v3071_v6  ;;  %v3316_v41 = vpop.permute.xlu1 %826 }
 0x298   :  { %2756 = vmatprep.subr.bf16.mxu0 %v3071_v6 }
 0x29b   :  { %v3318_v45 = vpop.permute.xlu1 %874 }
 0x29c   :  { %2753 = vmatmul.mubr.msk.bf16.vlgmr.msra.gmra.mxu1 %vm241_vm2, %v3225_v26 }
 0x29d   :  { %2763 = vmatpush3.bf16.msra.mxu1 %v736_v48  ;;  %2764 = vmatprep.mubr.msk.bf16.mxu1 %vm3072_vm1, %v3071_v6 }
 0x29e   :  { %2747 = vmatmul.mubr.msk.bf16.vlgmr.msra.gmra.mxu0 %vm241_vm2, %v3232_v29  ;;  %2774 = vmatprep.subr.bf16.mxu1 %v3071_v6 }
 0x29f   :  { %2757 = vmatpush3.bf16.xpose.msra.mxu0 %v589_v49  ;;  %2758 = vmatprep.mubr.msk.bf16.mxu0 %vm3072_vm1, %v3071_v6 }
 0x2a0   :  { %2768 = vmatprep.subr.bf16.mxu0 %v3071_v6 }
 0x2a6   :  { %2759 = vmatmul.mubr.msk.bf16.vlgmr.msra.gmra.mxu0 %vm241_vm2, %v3237_v31 }
 0x2a7   :  { %2769 = vmatpush3.bf16.msra.mxu0 %v784_v51  ;;  %2770 = vmatprep.mubr.msk.bf16.mxu0 %vm3072_vm1, %v3071_v6 }
 0x2a8   :  { %2780 = vmatprep.subr.bf16.mxu0 %v3071_v6 }
 0x346   :  { %v282_v52 = vpop.f32.mrf.mxu0 }
 0x347   :  { %v632_v53 = vsel %vm631_vm4, %v282_v52, -inf }
 0x348   :  { %633 = vmax.xlane.f32.xlu0 %v632_v53  ;;  %v2718_v54 = vpop.f32.mrf.mxu0 }
 0x34a   :  { %v285_v55 = vpop.f32.mrf.mxu0 }
 0x34c   :  { %v2719_v56 = vpop.f32.mrf.mxu0  ;;  %v380_v57 = vpop.f32.mrf.mxu1 }
 0x34d   :  { %v638_v58 = vsel %vm631_vm4, %v380_v57, -inf }
 0x34e   :  { %v331_v59 = vpop.f32.mrf.mxu0  ;;  %639 = vmax.xlane.f32.xlu0 %v638_v58  ;;  %v2730_v60 = vpop.f32.mrf.mxu1 }
 0x34f   :  { %v635_v61 = vsel %vm631_vm4, %v331_v59, -inf }
 0x350   :  { %636 = vmax.xlane.f32.xlu1 %v635_v61  ;;  %v2724_v62 = vpop.f32.mrf.mxu0  ;;  %v383_v63 = vpop.f32.mrf.mxu1 }
 0x352   :  { %v334_v0 = vpop.f32.mrf.mxu0  ;;  %v2731_v1 = vpop.f32.mrf.mxu1 }
 0x354   :  { %v2725_v2 = vpop.f32.mrf.mxu0  ;;  %v478_v3 = vpop.f32.mrf.mxu1 }
 0x355   :  { %v644_v4 = vsel %vm631_vm4, %v478_v3, -inf }
 0x356   :  { %645 = vmax.xlane.f32.xlu0 %v644_v4  ;;  %v3302_v5 = vpop.f32.mrf.mxu0  ;;  %v2742_v7 = vpop.f32.mrf.mxu1 }
 0x357   :  { %v641_v14 = vsel %vm631_vm4, %v3302_v5, -inf }
 0x358   :  { %v2736_v12 = vpop.f32.mrf.mxu0  ;;  %v481_v13 = vpop.f32.mrf.mxu1 }
 0x35a   :  { %v2743_v15 = vpop.f32.mrf.mxu1  ;;  %642 = vmax.xlane.f32.xlu0 %v641_v14  ;;  %v432_v16 = vpop.f32.mrf.mxu0 }
 0x35c   :  { %v2737_v17 = vpop.f32.mrf.mxu0  ;;  %v576_v19 = vpop.f32.mrf.mxu1 }
 0x35d   :  { %v650_v21 = vsel %vm631_vm4, %v576_v19, -inf }
 0x35e   :  { %v2754_v23 = vpop.f32.mrf.mxu1  ;;  %651 = vmax.xlane.f32.xlu0 %v650_v21  ;;  %v527_v24 = vpop.f32.mrf.mxu0 }
 0x35f   :  { %v647_v39 = vsel %vm631_vm4, %v527_v24, -inf }
 0x360   :  { %v2748_v27 = vpop.f32.mrf.mxu0  ;;  %v579_v30 = vpop.f32.mrf.mxu1 }
 0x361   :  { %970 = vrot.lane.b32.xlu1 %v3232_v29, %s3074_s5 }
 0x362   :  { %v530_v32 = vpop.f32.mrf.mxu0  ;;  %v2755_v33 = vpop.f32.mrf.mxu1 }
 0x364   :  { %v2749_v34 = vpop.f32.mrf.mxu0 }
 0x366   :  { %v3309_v35 = vpop.f32.mrf.mxu0 }
 0x367   :  { %v653_v40 = vsel %vm631_vm4, %v3309_v35, -inf }
 0x368   :  { %v2760_v36 = vpop.f32.mrf.mxu0 }
 0x36a   :  { %v628_v37 = vpop.f32.mrf.mxu0 }
 0x36c   :  { %v2761_v38 = vpop.f32.mrf.mxu0 }
 0x374   :  { %922 = vrot.lane.b32.xlu0 %v3219_v22, %s3074_s5 }
 0x385   :  { %648 = vmax.xlane.f32.xlu1 %v647_v39 }
 0x389   :  { %654 = vmax.xlane.f32.xlu1 %v653_v40 }
 0x3d1   :  { %v634_v42 = vpop.xlane.xlu0 %633 }
 0x3d2   :  { %v656_v43 = vsub.f32 %v282_v52, %v634_v42  ;;  %v832_v42 = vsel %vm734_vm3, %v3316_v41, 0  ;;  %v880_v41 = vsel %vm734_vm3, %v3318_v45, 0 }
 0x3d4   :  { %v664_v44 = vmul.f32 1.442695, %v656_v43 }
 0x3d6   :  { %2983 = vpow2.f32 %v664_v44 }
 0x3d7   :  { %v640_v46 = vpop.xlane.xlu0 %639 }
 0x3d8   :  { %v658_v47 = vsub.f32 %v380_v57, %v640_v46 }
 0x3d9   :  { %v637_v48 = vpop.xlane.xlu1 %636 }
 0x3da   :  { %v668_v49 = vmul.f32 1.442695, %v658_v47  ;;  %v657_v50 = vsub.f32 %v331_v59, %v637_v48 }
 0x3dc   :  { %2985 = vpow2.f32 %v668_v49  ;;  %v666_v51 = vmul.f32 1.442695, %v657_v50 }
 0x3dd   :  { %v3341_v1 = vpop.permute.xlu1 %970 }
 0x3de   :  { %2987 = vpow2.f32 %v666_v51 }
 0x3df   :  { %v646_v53 = vpop.xlane.xlu0 %645 }
 0x3e0   :  { %v660_v54 = vsub.f32 %v478_v3, %v646_v53 }
 0x3e2   :  { %v672_v55 = vmul.f32 1.442695, %v660_v54 }
 0x3e3   :  { %v3320_v56 = vpop.eup %2983  ;;  %v643_v63 = vpop.xlane.xlu0 %642 }
 0x3e4   :  { %2989 = vpow2.f32 %v672_v55  ;;  %v680_v52 = vsel %vm631_vm4, %v3320_v56, 0.0  ;;  %v659_v0 = vsub.f32 %v3302_v5, %v643_v63 }
 0x3e5   :  { %681 = vadd.xlane.f32.xlu0 %v680_v52 }
 0x3e6   :  { %v670_v3 = vmul.f32 1.442695, %v659_v0 }
 0x3e7   :  { %v652_v2 = vpop.xlane.xlu0 %651 }
 0x3e8   :  { %v662_v7 = vsub.f32 %v576_v19, %v652_v2  ;;  %2991 = vpow2.f32 %v670_v3  ;;  %v976_v2 = vsel %vm734_vm3, %v3341_v1, 0 }
 0x3e9   :  { %v3324_v58 = vpop.eup %2985 }
 0x3ea   :  { %v686_v57 = vsel %vm631_vm4, %v3324_v58, 0.0  ;;  %v676_v14 = vmul.f32 1.442695, %v662_v7 }
 0x3eb   :  { %v3328_v60 = vpop.eup %2987  ;;  %687 = vadd.xlane.f32.xlu0 %v686_v57  ;;  %v923_v33 = vpop.permute.xlu0 %922 }
 0x3ec   :  { %v683_v59 = vsel %vm631_vm4, %v3328_v60, 0.0  ;;  %v928_v50 = vsel %vm734_vm3, %v923_v33, 0 }
 0x3ed   :  { %684 = vadd.xlane.f32.xlu1 %v683_v59 }
 0x3f1   :  { %v3332_v61 = vpop.eup %2989 }
 0x3f2   :  { %v692_v62 = vsel %vm631_vm4, %v3332_v61, 0.0 }
 0x3f3   :  { %693 = vadd.xlane.f32.xlu0 %v692_v62 }
 0x3f5   :  { %v3343_v15 = vpop.eup %2991 }
 0x3f6   :  { %v689_v5 = vsel %vm631_vm4, %v3343_v15, 0.0 }
 0x3fe   :  { %1066 = vrot.lane.b32.xlu1 %v3237_v31, %s3074_s5 }
 0x409   :  { %1018 = vrot.lane.b32.xlu0 %v3225_v26, %s3074_s5 }
 0x40e   :  { %v649_v4 = vpop.xlane.xlu1 %648 }
 0x40f   :  { %v661_v12 = vsub.f32 %v527_v24, %v649_v4 }
 0x411   :  { %v674_v13 = vmul.f32 1.442695, %v661_v12 }
 0x412   :  { %v655_v23 = vpop.xlane.xlu1 %654 }
 0x413   :  { %2993 = vpow2.f32 %v674_v13  ;;  %v663_v24 = vsub.f32 %v3309_v35, %v655_v23 }
 0x414   :  { %2995 = vpow2.f32 %v676_v14 }
 0x415   :  { %v678_v27 = vmul.f32 1.442695, %v663_v24 }
 0x417   :  { %2997 = vpow2.f32 %v678_v27 }
 0x420   :  { %v3347_v16 = vpop.eup %2993 }
 0x421   :  { %v3349_v17 = vpop.eup %2995  ;;  %v695_v21 = vsel %vm631_vm4, %v3347_v16, 0.0 }
 0x422   :  { %690 = vadd.xlane.f32.xlu1 %v689_v5  ;;  %v698_v19 = vsel %vm631_vm4, %v3349_v17, 0.0 }
 0x424   :  { %v3372_v30 = vpop.eup %2997 }
 0x425   :  { %v701_v32 = vsel %vm631_vm4, %v3372_v30, 0.0 }
 0x426   :  { %696 = vadd.xlane.f32.xlu1 %v695_v21 }
 0x428   :  { %699 = vadd.xlane.f32.xlu0 %v698_v19 }
 0x437   :  { %1166 = vrot.lane.b32.xlu1 %v3216_v20, %s3075_s27 }
 0x43e   :  { %1116 = vrot.lane.b32.xlu0 %v3214_v18, %s3075_s27 }
 0x442   :  { %1114 = vrot.lane.b32.xlu0 %v3214_v18, %s3076_s28 }
 0x446   :  { %1216 = vrot.lane.b32.xlu0 %v3222_v25, %s3075_s27 }
 0x44a   :  { %1214 = vrot.lane.b32.xlu0 %v3222_v25, %s3076_s28 }
 0x44e   :  { %1316 = vrot.lane.b32.xlu0 %v3219_v22, %s3075_s27 }
 0x452   :  { %1314 = vrot.lane.b32.xlu0 %v3219_v22, %s3076_s28 }
 0x456   :  { %1416 = vrot.lane.b32.xlu0 %v3225_v26, %s3075_s27 }
 0x45a   :  { %1414 = vrot.lane.b32.xlu0 %v3225_v26, %s3076_s28 }
 0x45b   :  { %702 = vadd.xlane.f32.xlu1 %v701_v32 }
 0x46c   :  { %1164 = vrot.lane.b32.xlu1 %v3216_v20, %s3076_s28 }
 0x46e   :  { %v682_v34 = vpop.xlane.xlu0 %681 }
 0x46f   :  { %2999 = vrcp.f32 %v682_v34 }
 0x470   :  { %1266 = vrot.lane.b32.xlu1 %v3228_v28, %s3075_s27 }
 0x474   :  { %v688_v35 = vpop.xlane.xlu0 %687  ;;  %1264 = vrot.lane.b32.xlu1 %v3228_v28, %s3076_s28 }
 0x475   :  { %3001 = vrcp.f32 %v688_v35 }
 0x476   :  { %v685_v36 = vpop.xlane.xlu1 %684 }
 0x477   :  { %3003 = vrcp.f32 %v685_v36 }
 0x478   :  { %1366 = vrot.lane.b32.xlu1 %v3232_v29, %s3075_s27 }
 0x47c   :  { %v3000_v37 = vpop.eup %2999  ;;  %v694_v38 = vpop.xlane.xlu0 %693  ;;  %1364 = vrot.lane.b32.xlu1 %v3232_v29, %s3076_s28 }
 0x47d   :  { %3005 = vrcp.f32 %v694_v38  ;;  %v712_v39 = vmul.f32 %v3000_v37, %v3320_v56  ;;  %v1067_v56 = vpop.permute.xlu1 %1066 }
 0x47f   :  { %v720_v40 = vpack.c.bf16 %v712_v39, %v712_v39 }
 0x480   :  { %1466 = vrot.lane.b32.xlu1 %v3237_v31, %s3075_s27  ;;  %v1019_v45 = vpop.permute.xlu0 %1018 }
 0x481   :  { %2765 = vmatmul.mubr.msk.bf16.vlgmr.msra.gmra.mxu1 %vm730_vm5, %v720_v40  ;;  %v1024_v55 = vsel %vm734_vm3, %v1019_v45, 0 }
 0x482   :  { %v3002_v43 = vpop.eup %3001  ;;  %2775 = vmatpush3.bf16.msra.mxu1 %v832_v42  ;;  %2776 = vmatprep.mubr.msk.bf16.mxu1 %vm3072_vm1, %v3071_v6 }
 0x483   :  { %2786 = vmatprep.subr.bf16.mxu1 %v3071_v6  ;;  %v714_v44 = vmul.f32 %v3002_v43, %v3324_v58 }
 0x484   :  { %v3004_v46 = vpop.eup %3003  ;;  %1464 = vrot.lane.b32.xlu1 %v3237_v31, %s3076_s28 }
 0x485   :  { %v713_v47 = vmul.f32 %v3004_v46, %v3328_v60  ;;  %v722_v49 = vpack.c.bf16 %v714_v44, %v714_v44 }
 0x487   :  { %v721_v48 = vpack.c.bf16 %v713_v47, %v713_v47 }
 0x489   :  { %2771 = vmatmul.mubr.msk.bf16.vlgmr.msra.gmra.mxu0 %vm730_vm5, %v721_v48  ;;  %2777 = vmatmul.mubr.msk.bf16.vlgmr.msra.gmra.mxu1 %vm730_vm5, %v722_v49 }
 0x48a   :  { %v3006_v51 = vpop.eup %3005  ;;  %2781 = vmatpush3.bf16.msra.mxu0 %v880_v41  ;;  %2787 = vmatpush3.bf16.msra.mxu1 %v928_v50 }
 0x48b   :  { %2788 = vmatprep.mubr.msk.bf16.mxu1 %vm3072_vm1, %v3071_v6  ;;  %2798 = vmatprep.subr.bf16.mxu1 %v3071_v6  ;;  %v716_v53 = vmul.f32 %v3006_v51, %v3332_v61 }
 0x48c   :  { %2782 = vmatprep.mubr.msk.bf16.mxu0 %vm3072_vm1, %v3071_v6  ;;  %2792 = vmatprep.subr.bf16.mxu0 %v3071_v6 }
 0x48d   :  { %v724_v54 = vpack.c.bf16 %v716_v53, %v716_v53 }
 0x491   :  { %2789 = vmatmul.mubr.msk.bf16.vlgmr.msra.gmra.mxu1 %vm730_vm5, %v724_v54 }
 0x492   :  { %2799 = vmatpush3.bf16.msra.mxu1 %v1024_v55  ;;  %2800 = vmatprep.mubr.msk.bf16.mxu1 %vm3072_vm1, %v3071_v6 }
 0x493   :  { %2810 = vmatprep.subr.bf16.mxu1 %v3071_v6 }
 0x4ab   :  { %v691_v52 = vpop.xlane.xlu1 %690 }
 0x4ac   :  { %3007 = vrcp.f32 %v691_v52 }
 0x4af   :  { %v697_v58 = vpop.xlane.xlu1 %696 }
 0x4b0   :  { %3009 = vrcp.f32 %v697_v58 }
 0x4b1   :  { %v700_v57 = vpop.xlane.xlu0 %699 }
 0x4b2   :  { %3011 = vrcp.f32 %v700_v57 }
 0x4b3   :  { %v1167_v27 = vpop.permute.xlu1 %1166 }
 0x4b4   :  { %v1172_v39 = vsel %vm241_vm2, %v1167_v27, 0 }
 0x4b5   :  { %v1117_v60 = vpop.permute.xlu0 %1116 }
 0x4b6   :  { %v1122_v14 = vsel %vm241_vm2, %v1117_v60, 0 }
 0x4b9   :  { %v3008_v59 = vpop.eup %3007  ;;  %v1115_v62 = vpop.permute.xlu0 %1114 }
 0x4ba   :  { %v715_v61 = vmul.f32 %v3008_v59, %v3343_v15  ;;  %v1072_v15 = vsel %vm734_vm3, %v1067_v56, 0 }
 0x4bc   :  { %v723_v63 = vpack.c.bf16 %v715_v61, %v715_v61 }
 0x4bd   :  { %v3010_v0 = vpop.eup %3009  ;;  %v1217_v12 = vpop.permute.xlu0 %1216 }
 0x4be   :  { %2783 = vmatmul.mubr.msk.bf16.vlgmr.msra.gmra.mxu0 %vm730_vm5, %v723_v63  ;;  %v717_v7 = vmul.f32 %v3010_v0, %v3347_v16  ;;  %v1222_v16 = vsel %vm241_vm2, %v1217_v12, 0 }
 0x4bf   :  { %v3012_v3 = vpop.eup %3011  ;;  %2793 = vmatpush3.bf16.msra.mxu0 %v976_v2  ;;  %2794 = vmatprep.mubr.msk.bf16.mxu0 %vm3072_vm1, %v3071_v6 }
 0x4c0   :  { %v718_v4 = vmul.f32 %v3012_v3, %v3349_v17  ;;  %2804 = vmatprep.subr.bf16.mxu0 %v3071_v6  ;;  %v725_v1 = vpack.c.bf16 %v717_v7, %v717_v7 }
 0x4c1   :  { %v1215_v5 = vpop.permute.xlu0 %1214 }
 0x4c2   :  { %v726_v13 = vpack.c.bf16 %v718_v4, %v718_v4 }
 0x4c4   :  { %2801 = vmatmul.mubr.msk.bf16.vlgmr.msra.gmra.mxu1 %vm730_vm5, %v726_v13 }
 0x4c5   :  { %2811 = vmatpush3.bf16.xpose.msra.mxu1 %v1122_v14  ;;  %2812 = vmatprep.mubr.msk.bf16.mxu1 %vm3072_vm1, %v3071_v6  ;;  %v1317_v17 = vpop.permute.xlu0 %1316 }
 0x4c6   :  { %2795 = vmatmul.mubr.msk.bf16.vlgmr.msra.gmra.mxu0 %vm730_vm5, %v725_v1  ;;  %2822 = vmatprep.subr.bf16.mxu1 %v3071_v6  ;;  %v1322_v19 = vsel %vm241_vm2, %v1317_v17, 0 }
 0x4c7   :  { %2805 = vmatpush3.bf16.msra.mxu0 %v1072_v15  ;;  %2806 = vmatprep.mubr.msk.bf16.mxu0 %vm3072_vm1, %v3071_v6 }
 0x4c8   :  { %2816 = vmatprep.subr.bf16.mxu0 %v3071_v6 }
 0x4c9   :  { %v1315_v21 = vpop.permute.xlu0 %1314 }
 0x4cc   :  { %2813 = vmatmul.mubr.msk.bf16.vlgmr.msra.gmra.mxu1 %vm241_vm2, %v1115_v62 }
 0x4cd   :  { %2823 = vmatpush3.bf16.xpose.msra.mxu1 %v1222_v16  ;;  %2824 = vmatprep.mubr.msk.bf16.mxu1 %vm3072_vm1, %v3071_v6  ;;  %v1417_v23 = vpop.permute.xlu0 %1416 }
 0x4ce   :  { %2834 = vmatprep.subr.bf16.mxu1 %v3071_v6  ;;  %v1422_v24 = vsel %vm241_vm2, %v1417_v23, 0 }
 0x4d1   :  { %v1415_v32 = vpop.permute.xlu0 %1414 }
 0x4d4   :  { %2825 = vmatmul.mubr.msk.bf16.vlgmr.msra.gmra.mxu1 %vm241_vm2, %v1215_v5 }
 0x4d5   :  { %2835 = vmatpush3.bf16.xpose.msra.mxu1 %v1322_v19  ;;  %2836 = vmatprep.mubr.msk.bf16.mxu1 %vm3072_vm1, %v3071_v6 }
 0x4d6   :  { %2846 = vmatprep.subr.bf16.mxu1 %v3071_v6 }
 0x4dc   :  { %2837 = vmatmul.mubr.msk.bf16.vlgmr.msra.gmra.mxu1 %vm241_vm2, %v1315_v21 }
 0x4dd   :  { %2847 = vmatpush3.bf16.xpose.msra.mxu1 %v1422_v24  ;;  %2848 = vmatprep.mubr.msk.bf16.mxu1 %vm3072_vm1, %v3071_v6 }
 0x4de   :  { %2858 = vmatprep.subr.bf16.mxu1 %v3071_v6 }
 0x4e4   :  { %2849 = vmatmul.mubr.msk.bf16.vlgmr.msra.gmra.mxu1 %vm241_vm2, %v1415_v32  ;;  %v703_v33 = vpop.xlane.xlu1 %702 }
 0x4e5   :  { %3013 = vrcp.f32 %v703_v33  ;;  %2860 = vmatprep.mubr.msk.bf16.mxu1 %vm3072_vm1, %v3071_v6 }
 0x4e8   :  { %v1165_v34 = vpop.permute.xlu1 %1164 }
 0x4ec   :  { %v1267_v37 = vpop.permute.xlu1 %1266 }
 0x4ed   :  { %v1272_v42 = vsel %vm241_vm2, %v1267_v37, 0 }
 0x4f0   :  { %v1265_v40 = vpop.permute.xlu1 %1264 }
 0x4f2   :  { %v3014_v35 = vpop.eup %3013 }
 0x4f3   :  { %v719_v36 = vmul.f32 %v3014_v35, %v3372_v30 }
 0x4f4   :  { %v1367_v43 = vpop.permute.xlu1 %1366 }
 0x4f5   :  { %v727_v38 = vpack.c.bf16 %v719_v36, %v719_v36  ;;  %v1372_v44 = vsel %vm241_vm2, %v1367_v43, 0 }
 0x4f7   :  { %2807 = vmatmul.mubr.msk.bf16.vlgmr.msra.gmra.mxu0 %vm730_vm5, %v727_v38 }
 0x4f8   :  { %2817 = vmatpush3.bf16.xpose.msra.mxu0 %v1172_v39  ;;  %2818 = vmatprep.mubr.msk.bf16.mxu0 %vm3072_vm1, %v3071_v6  ;;  %v1365_v30 = vpop.permute.xlu1 %1364 }
 0x4f9   :  { %2828 = vmatprep.subr.bf16.mxu0 %v3071_v6 }
 0x4fc   :  { %v1467_v46 = vpop.permute.xlu1 %1466 }
 0x4fd   :  { %v1472_v47 = vsel %vm241_vm2, %v1467_v46, 0 }
 0x4ff   :  { %2819 = vmatmul.mubr.msk.bf16.vlgmr.msra.gmra.mxu0 %vm241_vm2, %v1165_v34 }
 0x500   :  { %2829 = vmatpush3.bf16.xpose.msra.mxu0 %v1272_v42  ;;  %2830 = vmatprep.mubr.msk.bf16.mxu0 %vm3072_vm1, %v3071_v6  ;;  %v1465_v48 = vpop.permute.xlu1 %1464 }
 0x501   :  { %2840 = vmatprep.subr.bf16.mxu0 %v3071_v6 }
 0x507   :  { %2831 = vmatmul.mubr.msk.bf16.vlgmr.msra.gmra.mxu0 %vm241_vm2, %v1265_v40 }
 0x508   :  { %2841 = vmatpush3.bf16.xpose.msra.mxu0 %v1372_v44  ;;  %2842 = vmatprep.mubr.msk.bf16.mxu0 %vm3072_vm1, %v3071_v6 }
 0x509   :  { %2852 = vmatprep.subr.bf16.mxu0 %v3071_v6 }
 0x50f   :  { %2843 = vmatmul.mubr.msk.bf16.vlgmr.msra.gmra.mxu0 %vm241_vm2, %v1365_v30 }
 0x510   :  { %2853 = vmatpush3.bf16.xpose.msra.mxu0 %v1472_v47  ;;  %2854 = vmatprep.mubr.msk.bf16.mxu0 %vm3072_vm1, %v3071_v6 }
 0x511   :  { %2864 = vmatprep.subr.bf16.mxu0 %v3071_v6 }
 0x517   :  { %2855 = vmatmul.mubr.msk.bf16.vlgmr.msra.gmra.mxu0 %vm241_vm2, %v1465_v48 }
 0x518   :  { %2866 = vmatprep.mubr.msk.bf16.mxu0 %vm3072_vm1, %v3071_v6 }
 0x541   :  { %v3479_v49 = vpop.f32.mrf.mxu1 }
 0x543   :  { %v2766_v41 = vpop.f32.mrf.mxu1 }
 0x545   :  { %v775_v50 = vpop.f32.mrf.mxu1 }
 0x547   :  { %v2767_v51 = vpop.f32.mrf.mxu1 }
 0x549   :  { %v3481_v53 = vpop.f32.mrf.mxu0  ;;  %v3483_v45 = vpop.f32.mrf.mxu1 }
 0x54a   :  { %v2002_v54 = vcombine.low %v3479_v49, %v3481_v53  ;;  %v2574_v53 = vld [vmem:[%s3775_s7] ss:$0 sm:$0xff] }
 0x54b   :  { %v2772_v55 = vpop.f32.mrf.mxu0  ;;  %v2778_v56 = vpop.f32.mrf.mxu1 }
 0x54d   :  { %v823_v52 = vpop.f32.mrf.mxu0  ;;  %v871_v58 = vpop.f32.mrf.mxu1 }
 0x54f   :  { %v2773_v57 = vpop.f32.mrf.mxu0  ;;  %v2779_v60 = vpop.f32.mrf.mxu1 }
 0x551   :  { %v3487_v59 = vpop.f32.mrf.mxu1 }
 0x553   :  { %v2790_v61 = vpop.f32.mrf.mxu1 }
 0x555   :  { %v967_v62 = vpop.f32.mrf.mxu1 }
 0x557   :  { %v2791_v63 = vpop.f32.mrf.mxu1 }
 0x57e   :  { %v3489_v0 = vpop.f32.mrf.mxu0 }
 0x57f   :  { %v2003_v2 = vcombine.low %v3483_v45, %v3489_v0 }
 0x580   :  { %v2784_v3 = vpop.f32.mrf.mxu0 }
 0x582   :  { %v919_v4 = vpop.f32.mrf.mxu0 }
 0x584   :  { %v2785_v7 = vpop.f32.mrf.mxu0  ;;  %v3493_v12 = vpop.f32.mrf.mxu1 }
 0x586   :  { %v3495_v13 = vpop.f32.mrf.mxu0  ;;  %v2802_v14 = vpop.f32.mrf.mxu1 }
 0x587   :  { %v2004_v1 = vcombine.low %v3487_v59, %v3495_v13 }
 0x588   :  { %v2796_v15 = vpop.f32.mrf.mxu0  ;;  %v1063_v5 = vpop.f32.mrf.mxu1 }
 0x58a   :  { %v1015_v16 = vpop.f32.mrf.mxu0  ;;  %v2803_v17 = vpop.f32.mrf.mxu1 }
 0x58c   :  { %v2797_v21 = vpop.f32.mrf.mxu0  ;;  %v1158_v19 = vpop.f32.mrf.mxu1 }
 0x58d   :  { %v1514_v23 = vsel %vm631_vm4, %v1158_v19, -inf }
 0x58e   :  { %1515 = vmax.xlane.f32.xlu0 %v1514_v23  ;;  %v2814_v24 = vpop.f32.mrf.mxu1 }
 0x590   :  { %v1161_v27 = vpop.f32.mrf.mxu1 }
 0x592   :  { %v2815_v32 = vpop.f32.mrf.mxu1 }
 0x594   :  { %v1258_v33 = vpop.f32.mrf.mxu1 }
 0x595   :  { %v1520_v34 = vsel %vm631_vm4, %v1258_v33, -inf }
 0x596   :  { %1521 = vmax.xlane.f32.xlu0 %v1520_v34  ;;  %v2826_v35 = vpop.f32.mrf.mxu1 }
 0x598   :  { %v1261_v36 = vpop.f32.mrf.mxu1 }
 0x59a   :  { %v2827_v37 = vpop.f32.mrf.mxu1 }
 0x59c   :  { %v3501_v38 = vpop.f32.mrf.mxu1 }
 0x59d   :  { %v1526_v3 = vsel %vm631_vm4, %v3501_v38, -inf }
 0x59e   :  { %v2838_v39 = vpop.f32.mrf.mxu1 }
 0x5a0   :  { %v1361_v40 = vpop.f32.mrf.mxu1 }
 0x5a2   :  { %v2839_v42 = vpop.f32.mrf.mxu1 }
 0x5a4   :  { %v3503_v43 = vpop.f32.mrf.mxu1 }
 0x5a5   :  { %v1532_v14 = vsel %vm631_vm4, %v3503_v43, -inf }
 0x5a6   :  { %v2850_v30 = vpop.f32.mrf.mxu1 }
 0x5a8   :  { %v1461_v44 = vpop.f32.mrf.mxu1 }
 0x5aa   :  { %v2851_v46 = vpop.f32.mrf.mxu1 }
 0x5b7   :  { %v3505_v47 = vpop.f32.mrf.mxu0 }
 0x5b8   :  { %v2005_v48 = vcombine.low %v3493_v12, %v3505_v47 }
 0x5b9   :  { %v2808_v41 = vpop.f32.mrf.mxu0 }
 0x5bb   :  { %v1111_v50 = vpop.f32.mrf.mxu0 }
 0x5bd   :  { %v2809_v51 = vpop.f32.mrf.mxu0 }
 0x5bf   :  { %v1208_v55 = vpop.f32.mrf.mxu0 }
 0x5c0   :  { %v1517_v56 = vsel %vm631_vm4, %v1208_v55, -inf }
 0x5c1   :  { %1518 = vmax.xlane.f32.xlu1 %v1517_v56  ;;  %v2820_v52 = vpop.f32.mrf.mxu0 }
 0x5c3   :  { %v1211_v58 = vpop.f32.mrf.mxu0 }
 0x5c5   :  { %v2821_v57 = vpop.f32.mrf.mxu0 }
 0x5c7   :  { %v3510_v60 = vpop.f32.mrf.mxu0 }
 0x5c8   :  { %v1523_v61 = vsel %vm631_vm4, %v3510_v60, -inf }
 0x5c9   :  { %1524 = vmax.xlane.f32.xlu0 %v1523_v61  ;;  %v2832_v62 = vpop.f32.mrf.mxu0 }
 0x5cb   :  { %v1311_v63 = vpop.f32.mrf.mxu0 }
 0x5cd   :  { %1527 = vmax.xlane.f32.xlu0 %v1526_v3  ;;  %v2833_v4 = vpop.f32.mrf.mxu0 }
 0x5cf   :  { %v3516_v7 = vpop.f32.mrf.mxu0 }
 0x5d0   :  { %v1529_v15 = vsel %vm631_vm4, %v3516_v7, -inf }
 0x5d1   :  { %1533 = vmax.xlane.f32.xlu0 %v1532_v14  ;;  %1530 = vmax.xlane.f32.xlu1 %v1529_v15  ;;  %v2844_v5 = vpop.f32.mrf.mxu0 }
 0x5d3   :  { %v1411_v16 = vpop.f32.mrf.mxu0 }
 0x5d5   :  { %v2845_v17 = vpop.f32.mrf.mxu0 }
 0x5d7   :  { %v3522_v21 = vpop.f32.mrf.mxu0 }
 0x5d8   :  { %v1535_v32 = vsel %vm631_vm4, %v3522_v21, -inf }
 0x5d9   :  { %v2856_v23 = vpop.f32.mrf.mxu0 }
 0x5db   :  { %v1511_v24 = vpop.f32.mrf.mxu0 }
 0x5dd   :  { %v2857_v27 = vpop.f32.mrf.mxu0 }
 0x5e2   :  { %1658 = vrot.lane.b32.xlu1 %v3216_v20, %s3077_s29 }
 0x5e6   :  { %1706 = vrot.lane.b32.xlu1 %v3222_v25, %s3077_s29 }
 0x5e7   :  { %1610 = vrot.lane.b32.xlu0 %v3214_v18, %s3077_s29 }
 0x60a   :  { %1536 = vmax.xlane.f32.xlu1 %v1535_v32 }
 0x617   :  { %v1516_v34 = vpop.xlane.xlu0 %1515 }
 0x618   :  { %v1538_v35 = vsub.f32 %v1158_v19, %v1516_v34 }
 0x61a   :  { %v1546_v36 = vmul.f32 1.442695, %v1538_v35 }
 0x61b   :  { %1754 = vrot.lane.b32.xlu1 %v3228_v28, %s3077_s29 }
 0x61c   :  { %3015 = vpow2.f32 %v1546_v36 }
 0x61f   :  { %v1522_v37 = vpop.xlane.xlu0 %1521 }
 0x620   :  { %v1540_v39 = vsub.f32 %v1258_v33, %v1522_v37 }
 0x622   :  { %v1550_v20 = vmul.f32 1.442695, %v1540_v39 }
 0x624   :  { %3017 = vpow2.f32 %v1550_v20 }
 0x629   :  { %v3534_v40 = vpop.eup %3015 }
 0x62a   :  { %v1562_v18 = vsel %vm631_vm4, %v3534_v40, 0.0 }
 0x62b   :  { %1563 = vadd.xlane.f32.xlu0 %v1562_v18 }
 0x631   :  { %v3538_v25 = vpop.eup %3017 }
 0x632   :  { %v1568_v19 = vsel %vm631_vm4, %v3538_v25, 0.0 }
 0x633   :  { %1569 = vadd.xlane.f32.xlu0 %v1568_v19 }
 0x649   :  { %1802 = vrot.lane.b32.xlu0 %v3219_v22, %s3077_s29 }
 0x64a   :  { %v1519_v28 = vpop.xlane.xlu1 %1518 }
 0x64b   :  { %v1539_v42 = vsub.f32 %v1208_v55, %v1519_v28 }
 0x64d   :  { %v1548_v33 = vmul.f32 1.442695, %v1539_v42 }
 0x64f   :  { %3019 = vpow2.f32 %v1548_v33 }
 0x652   :  { %v1525_v30 = vpop.xlane.xlu0 %1524 }
 0x653   :  { %v1541_v4 = vsub.f32 %v3510_v60, %v1525_v30 }
 0x655   :  { %v1552_v14 = vmul.f32 1.442695, %v1541_v4 }
 0x656   :  { %v1528_v44 = vpop.xlane.xlu0 %1527 }
 0x657   :  { %v1542_v46 = vsub.f32 %v3501_v38, %v1528_v44 }
 0x659   :  { %v1554_v41 = vmul.f32 1.442695, %v1542_v46 }
 0x65a   :  { %v1534_v50 = vpop.xlane.xlu0 %1533  ;;  %v1531_v51 = vpop.xlane.xlu1 %1530 }
 0x65b   :  { %3021 = vpow2.f32 %v1554_v41  ;;  %v1544_v56 = vsub.f32 %v3503_v43, %v1534_v50  ;;  %v1543_v15 = vsub.f32 %v3516_v7, %v1531_v51 }
 0x65c   :  { %v3546_v52 = vpop.eup %3019 }
 0x65d   :  { %v1558_v58 = vmul.f32 1.442695, %v1544_v56  ;;  %v1565_v22 = vsel %vm631_vm4, %v3546_v52, 0.0  ;;  %v1556_v5 = vmul.f32 1.442695, %v1543_v15 }
 0x65e   :  { %v1611_v57 = vpop.permute.xlu0 %1610  ;;  %1566 = vadd.xlane.f32.xlu1 %v1565_v22  ;;  %v1659_v55 = vpop.permute.xlu1 %1658 }
 0x65f   :  { %3023 = vpow2.f32 %v1558_v58  ;;  %v1616_v61 = vsel %vm734_vm3, %v1611_v57, 0  ;;  %v1664_v38 = vsel %vm734_vm3, %v1659_v55, 0 }
 0x660   :  { %2859 = vmatpush3.bf16.msra.mxu1 %v1616_v61  ;;  %2865 = vmatpush3.bf16.msra.mxu0 %v1664_v38  ;;  %3025 = vpow2.f32 %v1552_v14 }
 0x661   :  { %2870 = vmatprep.subr.bf16.mxu1 %v3071_v6  ;;  %2876 = vmatprep.subr.bf16.mxu0 %v3071_v6  ;;  %3027 = vpow2.f32 %v1556_v5 }
 0x662   :  { %v1707_v17 = vpop.permute.xlu1 %1706 }
 0x663   :  { %v1712_v39 = vsel %vm734_vm3, %v1707_v17, 0 }
 0x668   :  { %v3554_v43 = vpop.eup %3021 }
 0x669   :  { %v1574_v62 = vsel %vm631_vm4, %v3554_v43, 0.0 }
 0x66a   :  { %1575 = vadd.xlane.f32.xlu0 %v1574_v62 }
 0x66c   :  { %v3558_v63 = vpop.eup %3023 }
 0x66d   :  { %v1580_v3 = vsel %vm631_vm4, %v3558_v63, 0.0  ;;  %v3568_v16 = vpop.eup %3025 }
 0x66e   :  { %1581 = vadd.xlane.f32.xlu0 %v1580_v3  ;;  %v1571_v23 = vsel %vm631_vm4, %v3568_v16, 0.0  ;;  %v3572_v24 = vpop.eup %3027 }
 0x66f   :  { %1850 = vrot.lane.b32.xlu1 %v3232_v29, %s3077_s29  ;;  %v1577_v7 = vsel %vm631_vm4, %v3572_v24, 0.0 }
 0x684   :  { %1898 = vrot.lane.b32.xlu0 %v3225_v26, %s3077_s29 }
 0x693   :  { %1572 = vadd.xlane.f32.xlu1 %v1571_v23  ;;  %v1537_v29 = vpop.xlane.xlu1 %1536 }
 0x694   :  { %v1545_v60 = vsub.f32 %v3522_v21, %v1537_v29 }
 0x696   :  { %v1560_v27 = vmul.f32 1.442695, %v1545_v60 }
 0x697   :  { %1578 = vadd.xlane.f32.xlu1 %v1577_v7 }
 0x698   :  { %3029 = vpow2.f32 %v1560_v27 }
 0x6a5   :  { %v3577_v26 = vpop.eup %3029 }
 0x6a6   :  { %v1583_v32 = vsel %vm631_vm4, %v3577_v26, 0.0 }
 0x6a7   :  { %1584 = vadd.xlane.f32.xlu1 %v1583_v32 }
 0x6b4   :  { %v1564_v34 = vpop.xlane.xlu0 %1563 }
 0x6b5   :  { %3031 = vrcp.f32 %v1564_v34 }
 0x6b8   :  { %1946 = vrot.lane.b32.xlu1 %v3237_v31, %s3077_s29 }
 0x6bc   :  { %v1570_v35 = vpop.xlane.xlu0 %1569 }
 0x6bd   :  { %3033 = vrcp.f32 %v1570_v35 }
 0x6c0   :  { %v1803_v31 = vpop.permute.xlu0 %1802 }
 0x6c1   :  { %v1808_v28 = vsel %vm734_vm3, %v1803_v31, 0 }
 0x6c2   :  { %v3032_v21 = vpop.eup %3031 }
 0x6c3   :  { %v1594_v36 = vmul.f32 %v3032_v21, %v3534_v40  ;;  %v1755_v40 = vpop.permute.xlu1 %1754 }
 0x6c4   :  { %v1760_v41 = vsel %vm734_vm3, %v1755_v40, 0 }
 0x6c5   :  { %v1602_v37 = vpack.c.bf16 %v1594_v36, %v1594_v36 }
 0x6c7   :  { %2861 = vmatmul.mubr.msk.bf16.vlgmr.msra.gmra.mxu1 %vm730_vm5, %v1602_v37 }
 0x6c8   :  { %2871 = vmatpush3.bf16.msra.mxu1 %v1712_v39  ;;  %2872 = vmatprep.mubr.msk.bf16.mxu1 %vm3072_vm1, %v3071_v6 }
 0x6c9   :  { %2882 = vmatprep.subr.bf16.mxu1 %v3071_v6 }
 0x6ca   :  { %v3034_v20 = vpop.eup %3033 }
 0x6cb   :  { %v1596_v18 = vmul.f32 %v3034_v20, %v3538_v25 }
 0x6cd   :  { %v1604_v19 = vpack.c.bf16 %v1596_v18, %v1596_v18 }
 0x6cf   :  { %2873 = vmatmul.mubr.msk.bf16.vlgmr.msra.gmra.mxu1 %vm730_vm5, %v1604_v19 }
 0x6d0   :  { %2883 = vmatpush3.bf16.msra.mxu1 %v1808_v28  ;;  %2884 = vmatprep.mubr.msk.bf16.mxu1 %vm3072_vm1, %v3071_v6 }
 0x6d1   :  { %2894 = vmatprep.subr.bf16.mxu1 %v3071_v6 }
 0x6e7   :  { %v1567_v42 = vpop.xlane.xlu1 %1566 }
 0x6e8   :  { %3035 = vrcp.f32 %v1567_v42 }
 0x6eb   :  { %v1851_v61 = vpop.permute.xlu1 %1850 }
 0x6ec   :  { %v1856_v15 = vsel %vm734_vm3, %v1851_v61, 0 }
 0x6f3   :  { %v1576_v33 = vpop.xlane.xlu0 %1575 }
 0x6f4   :  { %3037 = vrcp.f32 %v1576_v33 }
 0x6f5   :  { %v3036_v30 = vpop.eup %3035 }
 0x6f6   :  { %v1595_v25 = vmul.f32 %v3036_v30, %v3546_v52 }
 0x6f7   :  { %v1582_v44 = vpop.xlane.xlu0 %1581 }
 0x6f8   :  { %3039 = vrcp.f32 %v1582_v44  ;;  %v1603_v46 = vpack.c.bf16 %v1595_v25, %v1595_v25  ;;  %v2963_v25 = vld [vmem:[%s3774_s6 + $0x8] sm:$0xff]  }
 0x6fa   :  { %2867 = vmatmul.mubr.msk.bf16.vlgmr.msra.gmra.mxu0 %vm730_vm5, %v1603_v46 }
 0x6fb   :  { %2877 = vmatpush3.bf16.msra.mxu0 %v1760_v41  ;;  %2878 = vmatprep.mubr.msk.bf16.mxu0 %vm3072_vm1, %v3071_v6  ;;  %v1899_v56 = vpop.permute.xlu0 %1898 }
 0x6fc   :  { %2888 = vmatprep.subr.bf16.mxu0 %v3071_v6  ;;  %v1904_v52 = vsel %vm734_vm3, %v1899_v56, 0 }
 0x701   :  { %v3038_v50 = vpop.eup %3037 }
 0x702   :  { %v1598_v51 = vmul.f32 %v3038_v50, %v3554_v43 }
 0x704   :  { %v1606_v58 = vpack.c.bf16 %v1598_v51, %v1598_v51 }
 0x705   :  { %v3040_v22 = vpop.eup %3039 }
 0x706   :  { %2885 = vmatmul.mubr.msk.bf16.vlgmr.msra.gmra.mxu1 %vm730_vm5, %v1606_v58  ;;  %v1600_v57 = vmul.f32 %v3040_v22, %v3558_v63 }
 0x707   :  { %2895 = vmatpush3.bf16.msra.mxu1 %v1904_v52  ;;  %2896 = vmatprep.mubr.msk.bf16.mxu1 %vm3072_vm1, %v3071_v6 }
 0x708   :  { %v1608_v55 = vpack.c.bf16 %v1600_v57, %v1600_v57  ;;  %2906 = vmatprep.subr.bf16.mxu1 %v2963_v25 }
 0x70e   :  { %2897 = vmatmul.mubr.msk.bf16.vlgmr.msra.gmra.mxu1 %vm730_vm5, %v1608_v55  ;;  %v2964_v55 = vld [vmem:[%s3774_s6] sm:$0xff]  }
 0x70f   :  { %2907 = vmatpush3.bf16.msra.mxu1 %v2963_v25 }
 0x710   :  { %2908 = vmatprep.subr.bf16.mxu1 %v2964_v55 }
 0x713   :  { %2909 = vmatpush3.bf16.msra.mxu1 %v2964_v55 }
 0x71c   :  { %v1573_v38 = vpop.xlane.xlu1 %1572 }
 0x71d   :  { %3041 = vrcp.f32 %v1573_v38 }
 0x720   :  { %v1579_v43 = vpop.xlane.xlu1 %1578 }
 0x721   :  { %3043 = vrcp.f32 %v1579_v43 }
 0x72a   :  { %v3042_v62 = vpop.eup %3041 }
 0x72b   :  { %v1597_v3 = vmul.f32 %v3042_v62, %v3568_v16 }
 0x72d   :  { %v1605_v4 = vpack.c.bf16 %v1597_v3, %v1597_v3 }
 0x72e   :  { %v3044_v14 = vpop.eup %3043 }
 0x72f   :  { %2879 = vmatmul.mubr.msk.bf16.vlgmr.msra.gmra.mxu0 %vm730_vm5, %v1605_v4  ;;  %v1599_v63 = vmul.f32 %v3044_v14, %v3572_v24 }
 0x730   :  { %2889 = vmatpush3.bf16.msra.mxu0 %v1856_v15  ;;  %v1585_v5 = vpop.xlane.xlu1 %1584  ;;  %2890 = vmatprep.mubr.msk.bf16.mxu0 %vm3072_vm1, %v3071_v6 }
 0x731   :  { %3045 = vrcp.f32 %v1585_v5  ;;  %2900 = vmatprep.subr.bf16.mxu0 %v3071_v6  ;;  %v1607_v16 = vpack.c.bf16 %v1599_v63, %v1599_v63 }
 0x734   :  { %v1947_v17 = vpop.permute.xlu1 %1946 }
 0x735   :  { %v1952_v23 = vsel %vm734_vm3, %v1947_v17, 0 }
 0x737   :  { %2891 = vmatmul.mubr.msk.bf16.vlgmr.msra.gmra.mxu0 %vm730_vm5, %v1607_v16 }
 0x738   :  { %2901 = vmatpush3.bf16.msra.mxu0 %v1952_v23  ;;  %2902 = vmatprep.mubr.msk.bf16.mxu0 %vm3072_vm1, %v3071_v6 }
 0x73e   :  { %v3046_v29 = vpop.eup %3045 }
 0x73f   :  { %v1601_v60 = vmul.f32 %v3046_v29, %v3577_v26 }
 0x741   :  { %v1609_v27 = vpack.c.bf16 %v1601_v60, %v1601_v60 }
 0x743   :  { %2903 = vmatmul.mubr.msk.bf16.vlgmr.msra.gmra.mxu0 %vm730_vm5, %v1609_v27 }
 0x787   :  { %v1652_v7 = vpop.f32.mrf.mxu1 }
 0x789   :  { %v2862_v32 = vpop.f32.mrf.mxu1 }
 0x78b   :  { %v1655_v34 = vpop.f32.mrf.mxu1 }
 0x78d   :  { %v2863_v24 = vpop.f32.mrf.mxu1 }
 0x78f   :  { %v1748_v35 = vpop.f32.mrf.mxu1 }
 0x791   :  { %v2874_v21 = vpop.f32.mrf.mxu1 }
 0x793   :  { %v1751_v36 = vpop.f32.mrf.mxu1 }
 0x795   :  { %v2875_v37 = vpop.f32.mrf.mxu1 }
 0x7ba   :  { %v1700_v39 = vpop.f32.mrf.mxu0 }
 0x7bb   :  { %v2018_v46 = vcombine.low %v1652_v7, %v1700_v39 }
 0x7bc   :  { %v2868_v20 = vpop.f32.mrf.mxu0 }
 0x7be   :  { %v1703_v18 = vpop.f32.mrf.mxu0 }
 0x7c0   :  { %v2869_v31 = vpop.f32.mrf.mxu0 }
 0x7c6   :  { %v1844_v19 = vpop.f32.mrf.mxu1 }
 0x7c8   :  { %v2886_v6 = vpop.f32.mrf.mxu1 }
 0x7ca   :  { %v1847_v28 = vpop.f32.mrf.mxu1 }
 0x7cc   :  { %v2887_v40 = vpop.f32.mrf.mxu1 }
 0x7ce   :  { %v1940_v26 = vpop.f32.mrf.mxu1 }
 0x7d0   :  { %v2898_v42 = vpop.f32.mrf.mxu1 }
 0x7d2   :  { %v1943_v33 = vpop.f32.mrf.mxu1 }
 0x7d4   :  { %v2899_v30 = vpop.f32.mrf.mxu1 }
 0x7ef   :  { %v1796_v44 = vpop.f32.mrf.mxu0 }
 0x7f0   :  { %v2019_v41 = vcombine.low %v1748_v35, %v1796_v44 }
 0x7f1   :  { %v2880_v50 = vpop.f32.mrf.mxu0 }
 0x7f2   :  { %v2951_v51 = vpack.i.bf16 %v2019_v41, %v2018_v46 }
 0x7f3   :  { %v1799_v56 = vpop.f32.mrf.mxu0 }
 0x7f4   :  { %2952 = vrot.lane.b32.xlu0 %v2951_v51, %s3078_s16  ;;  %v2965_v51 = vld [vmem:[%s3776_s10 + $0x8] sm:$0xff]   ;;  %v2966_v56 = vld [vmem:[%s3776_s10] sm:$0xff]  }
 0x7f5   :  { %v2881_v58 = vpop.f32.mrf.mxu0  ;;  %2914 = vmatprep.subr.bf16.mxu0 %v2965_v51 }
 0x7f6   :  { %2915 = vmatpush3.bf16.msra.mxu0 %v2965_v51 }
 0x7f7   :  { %v1892_v22 = vpop.f32.mrf.mxu0  ;;  %2916 = vmatprep.subr.bf16.mxu0 %v2966_v56 }
 0x7f8   :  { %v2020_v43 = vcombine.low %v1844_v19, %v1892_v22 }
 0x7f9   :  { %v2892_v52 = vpop.f32.mrf.mxu0 }
 0x7fa   :  { %2917 = vmatpush3.bf16.msra.mxu0 %v2966_v56 }
 0x7fb   :  { %v1895_v57 = vpop.f32.mrf.mxu0 }
 0x7fd   :  { %v2893_v61 = vpop.f32.mrf.mxu0 }
 0x803   :  { %v1988_v38 = vpop.f32.mrf.mxu0 }
 0x804   :  { %v2021_v62 = vcombine.low %v1940_v26, %v1988_v38 }
 0x805   :  { %v2904_v3 = vpop.f32.mrf.mxu0 }
 0x806   :  { %v2956_v4 = vpack.i.bf16 %v2021_v62, %v2020_v43 }
 0x807   :  { %v1991_v14 = vpop.f32.mrf.mxu0 }
 0x808   :  { %2957 = vrot.lane.b32.xlu1 %v2956_v4, %s3078_s16 }
 0x809   :  { %v2905_v15 = vpop.f32.mrf.mxu0 }
 0x866   :  { %v2953_v5 = vpop.permute.xlu0 %2952 }
 0x867   :  { %v2955_v63 = vunpack.i.h.bf16 %v2953_v5  ;;  %v2954_v17 = vunpack.i.l.bf16 %v2953_v5 }
 0x869   :  { %v2035_v23 = vsel %vm241_vm2, %v2003_v2, %v2955_v63  ;;  %v2034_v16 = vsel %vm241_vm2, %v2002_v54, %v2954_v17  ;;  %v2579_v63 = vld [vmem:[%s3777_s8] ss:$0 sm:$0xff] }
 0x86a   :  { %v2038_v29 = vpack.c.bf16 %v2035_v23, %v2034_v16 }
 0x86c   :  { %2910 = vmatprep.mubr.msk.bf16.mxu1 %vm64_vm0, %v2038_v29 }
 0x87a   :  { %v2958_v60 = vpop.permute.xlu1 %2957 }
 0x87b   :  { %v2960_v27 = vunpack.i.h.bf16 %v2958_v60  ;;  %v2959_v7 = vunpack.i.l.bf16 %v2958_v60 }
 0x87d   :  { %v2037_v32 = vsel %vm241_vm2, %v2005_v48, %v2960_v27  ;;  %v2036_v45 = vsel %vm241_vm2, %v2004_v1, %v2959_v7  ;;  %v2580_v27 = vld [vmem:[%s3778_s9] ss:$0 sm:$0xff] }
 0x87e   :  { %v2039_v0 = vpack.c.bf16 %v2037_v32, %v2036_v45 }
 0x880   :  { %2911 = vmatmul.mubr.msk.bf16.vlgmr.msra.gmra.mxu1 %vm64_vm0, %v2039_v0 }
 0x940   :  { %v2912_v49 = vpop.f32.mrf.mxu1 }
 0x941   :  { %v2112_v2 = vadd.f32 %v2912_v49, %v2574_v53 }
 0x942   :  { %v2103_v54 = vpop.f32.mrf.mxu1 }
 0x943   :  { %v2104_v34 = vadd.f32 %v2574_v53, %v2103_v54  ;;  %v3652_v59 = vadd.f32 %v2112_v2, %v3169_v9 }
 0x944   :  { %v2913_v24 = vpop.f32.mrf.mxu1 }
 0x945   :  { %v3649_v12 = vadd.f32 %v2104_v34, %v3167_v8  ;;  %v2115_v13 = vadd.f32 %v2913_v24, %v2574_v53  ;;  %v2130_v36 = vsel %vm64_vm0, %v3652_v59, 0.0 }
 0x946   :  { %v2106_v47 = vpop.f32.mrf.mxu1 }
 0x947   :  { %v2107_v1 = vadd.f32 %v2574_v53, %v2106_v47  ;;  %v2124_v48 = vsel %vm64_vm0, %v3649_v12, 0.0  ;;  %v3660_v21 = vadd.f32 %v2115_v13, %v3173_v11  ;;  %v2967_v13 = vld [vmem:[%s3779_s12 + $0x38] sm:$0xff]  }
 0x948   :  { %2125 = vadd.xlane.f32.xlu0 %v2124_v48  ;;  %2922 = vmatprep.subr.bf16.mxu1 %v2967_v13  ;;  %v2969_v48 = vld [vmem:[%s3779_s12 + $0x28] sm:$0xff]  }
 0x949   :  { %v3657_v35 = vadd.f32 %v2107_v1, %v3171_v10  ;;  %v2133_v9 = vsel %vm64_vm0, %v3660_v21, 0.0  ;;  %2923 = vmatpush3.bf16.msra.mxu1 %v2967_v13  ;;  %v2968_v1 = vld [vmem:[%s3779_s12 + $0x30] sm:$0xff]  }
 0x94a   :  { %2924 = vmatprep.subr.bf16.mxu1 %v2968_v1 }
 0x94b   :  { %v2127_v8 = vsel %vm64_vm0, %v3657_v35, 0.0 }
 0x94c   :  { %2128 = vadd.xlane.f32.xlu1 %v2127_v8  ;;  %2131 = vadd.xlane.f32.xlu0 %v2130_v36  ;;  %v2970_v8 = vld [vmem:[%s3779_s12 + $0x20] sm:$0xff]   ;;  %v2971_v36 = vld [vmem:[%s3779_s12 + $0x18] sm:$0xff]  }
 0x94d   :  { %2925 = vmatpush3.bf16.msra.mxu1 %v2968_v1 }
 0x94e   :  { %2926 = vmatprep.subr.bf16.mxu1 %v2969_v48 }
 0x950   :  { %2134 = vadd.xlane.f32.xlu0 %v2133_v9  ;;  %v2972_v9 = vld [vmem:[%s3779_s12 + $0x10] sm:$0xff]  }
 0x951   :  { %2927 = vmatpush3.bf16.msra.mxu1 %v2969_v48 }
 0x952   :  { %2928 = vmatprep.subr.bf16.mxu1 %v2970_v8 }
 0x955   :  { %2929 = vmatpush3.bf16.msra.mxu1 %v2970_v8 }
 0x956   :  { %2930 = vmatprep.subr.bf16.mxu1 %v2971_v36 }
 0x959   :  { %2931 = vmatpush3.bf16.msra.mxu1 %v2971_v36 }
 0x95a   :  { %2932 = vmatprep.subr.bf16.mxu1 %v2972_v9 }
 0x95d   :  { %2933 = vmatpush3.bf16.msra.mxu1 %v2972_v9 }
 0x9d1   :  { %v2126_v37 = vpop.xlane.xlu0 %2125 }
 0x9d2   :  { %v2136_v39 = vmul.f32 0.03125, %v2126_v37  ;;  %v2973_v37 = vld [vmem:[%s3779_s12 + $0x8] sm:$0xff]  }
 0x9d3   :  { %2934 = vmatprep.subr.bf16.mxu1 %v2973_v37 }
 0x9d4   :  { %v2140_v10 = vsub.f32 %v3649_v12, %v2136_v39  ;;  %2935 = vmatpush3.bf16.msra.mxu1 %v2973_v37  ;;  %v2974_v39 = vld [vmem:[%s3779_s12] sm:$0xff]  }
 0x9d5   :  { %v2129_v20 = vpop.xlane.xlu1 %2128  ;;  %v2132_v18 = vpop.xlane.xlu0 %2131  ;;  %2936 = vmatprep.subr.bf16.mxu1 %v2974_v39 }
 0x9d6   :  { %v2137_v11 = vmul.f32 0.03125, %v2129_v20  ;;  %v2138_v31 = vmul.f32 0.03125, %v2132_v18  ;;  %v2144_v19 = vmul.f32 %v2140_v10, %v2140_v10 }
 0x9d8   :  { %v2141_v6 = vsub.f32 %v3657_v35, %v2137_v11  ;;  %v2142_v28 = vsub.f32 %v3652_v59, %v2138_v31  ;;  %v2148_v40 = vsel %vm64_vm0, %v2144_v19, 0.0  ;;  %2937 = vmatpush3.bf16.msra.mxu1 %v2974_v39 }
 0x9d9   :  { %2149 = vadd.xlane.f32.xlu0 %v2148_v40  ;;  %v2135_v26 = vpop.xlane.xlu0 %2134 }
 0x9da   :  { %v2139_v42 = vmul.f32 0.03125, %v2135_v26  ;;  %v2145_v33 = vmul.f32 %v2141_v6, %v2141_v6  ;;  %v2146_v30 = vmul.f32 %v2142_v28, %v2142_v28 }
 0x9dc   :  { %v2143_v25 = vsub.f32 %v3660_v21, %v2139_v42  ;;  %v2151_v44 = vsel %vm64_vm0, %v2145_v33, 0.0  ;;  %v2154_v46 = vsel %vm64_vm0, %v2146_v30, 0.0 }
 0x9dd   :  { %2152 = vadd.xlane.f32.xlu1 %v2151_v44  ;;  %2155 = vadd.xlane.f32.xlu0 %v2154_v46 }
 0x9de   :  { %v2147_v41 = vmul.f32 %v2143_v25, %v2143_v25 }
 0x9e0   :  { %v2157_v50 = vsel %vm64_vm0, %v2147_v41, 0.0 }
 0x9e1   :  { %2158 = vadd.xlane.f32.xlu1 %v2157_v50 }
 0xa62   :  { %v2150_v58 = vpop.xlane.xlu0 %2149 }
 0xa63   :  { %v2160_v22 = vmul.f32 0.03125, %v2150_v58 }
 0xa65   :  { %v2164_v52 = vadd.f32 1e-06, %v2160_v22 }
 0xa66   :  { %v2153_v57 = vpop.xlane.xlu1 %2152  ;;  %v2156_v55 = vpop.xlane.xlu0 %2155 }
 0xa67   :  { %3047 = vrsqrt.f32 %v2164_v52  ;;  %v2161_v61 = vmul.f32 0.03125, %v2153_v57  ;;  %v2162_v38 = vmul.f32 0.03125, %v2156_v55 }
 0xa69   :  { %v2165_v43 = vadd.f32 1e-06, %v2161_v61  ;;  %v2166_v62 = vadd.f32 1e-06, %v2162_v38 }
 0xa6a   :  { %v2159_v3 = vpop.xlane.xlu1 %2158 }
 0xa6b   :  { %3049 = vrsqrt.f32 %v2165_v43  ;;  %v2163_v4 = vmul.f32 0.03125, %v2159_v3 }
 0xa6c   :  { %3051 = vrsqrt.f32 %v2166_v62 }
 0xa6d   :  { %v2167_v14 = vadd.f32 1e-06, %v2163_v4 }
 0xa6f   :  { %3053 = vrsqrt.f32 %v2167_v14 }
 0xa74   :  { %v3048_v15 = vpop.eup %3047 }
 0xa75   :  { %v2172_v5 = vmul.f32 %v3048_v15, %v2140_v10  ;;  %v2581_v10 = vld [vmem:[%s3780_s11] ss:$0 sm:$0xff] }
 0xa77   :  { %v2182_v29 = vmul.f32 %v2579_v63, %v2172_v5 }
 0xa78   :  { %v3050_v17 = vpop.eup %3049 }
 0xa79   :  { %v3052_v23 = vpop.eup %3051  ;;  %v2173_v16 = vmul.f32 %v3050_v17, %v2141_v6  ;;  %v2192_v0 = vadd.f32 %v2580_v27, %v2182_v29 }
 0xa7a   :  { %v2174_v60 = vmul.f32 %v3052_v23, %v2142_v28 }
 0xa7b   :  { %v2183_v7 = vmul.f32 %v2579_v63, %v2173_v16 }
 0xa7c   :  { %v3054_v32 = vpop.eup %3053  ;;  %v2184_v53 = vmul.f32 %v2579_v63, %v2174_v60 }
 0xa7d   :  { %v2175_v45 = vmul.f32 %v3054_v32, %v2143_v25  ;;  %v2193_v49 = vadd.f32 %v2580_v27, %v2183_v7 }
 0xa7e   :  { %v2194_v34 = vadd.f32 %v2580_v27, %v2184_v53 }
 0xa7f   :  { %v2196_v54 = vpack.c.bf16 %v2193_v49, %v2192_v0  ;;  %v2185_v2 = vmul.f32 %v2579_v63, %v2175_v45 }
 0xa81   :  { %2918 = vmatprep.mubr.msk.bf16.mxu0 %vm64_vm0, %v2196_v54  ;;  %v2195_v24 = vadd.f32 %v2580_v27, %v2185_v2 }
 0xa83   :  { %v2197_v47 = vpack.c.bf16 %v2195_v24, %v2194_v34 }
 0xa85   :  { %2919 = vmatmul.mubr.msk.bf16.vlgmr.msra.gmra.mxu0 %vm64_vm0, %v2197_v47 }
 0xb45   :  { %v2920_v20 = vpop.f32.mrf.mxu0 }
 0xb46   :  { %v3717_v18 = vadd.f32 %v2920_v20, %v2581_v10 }
 0xb47   :  { %v2261_v11 = vpop.f32.mrf.mxu0 }
 0xb48   :  { %v3720_v31 = vmul.f32 0.70710677, %v3717_v18  ;;  %v3722_v19 = vadd.f32 %v2581_v10, %v2261_v11 }
 0xb49   :  { %v2921_v6 = vpop.f32.mrf.mxu0 }
 0xb4a   :  { %v2290_v28 = vand.u32 2147483647, %v3720_v31  ;;  %v3726_v40 = vmul.f32 0.70710677, %v3722_v19  ;;  %v3728_v26 = vadd.f32 %v2921_v6, %v2581_v10  ;;  %vm2282_vm6 = vcmp.ge.f32.partialorder %v3720_v31, 0.0 }
 0xb4b   :  { %v2264_v42 = vpop.f32.mrf.mxu0 }
 0xb4c   :  { %v2294_v33 = vmul.f32 0.3275911, %v2290_v28  ;;  %v2288_v30 = vand.u32 2147483647, %v3726_v40  ;;  %v3732_v25 = vmul.f32 0.70710677, %v3728_v26  ;;  %v3734_v44 = vadd.f32 %v2581_v10, %v2264_v42 }
 0xb4d   :  { %v2346_v61 = vsub.f32 0.0, %v2290_v28  ;;  %vm2280_vm7 = vcmp.ge.f32.partialorder %v3726_v40, 0.0 }
 0xb4e   :  { %v2298_v46 = vadd.f32 1.0, %v2294_v33  ;;  %v2292_v41 = vmul.f32 0.3275911, %v2288_v30  ;;  %v2291_v50 = vand.u32 2147483647, %v3732_v25  ;;  %v2344_v38 = vsub.f32 0.0, %v2288_v30 }
 0xb4f   :  { %v3738_v51 = vmul.f32 0.70710677, %v3734_v44  ;;  %v2350_v43 = vmul.f32 %v2346_v61, %v2290_v28  ;;  %vm2283_vm8 = vcmp.ge.f32.partialorder %v3732_v25, 0.0 }
 0xb50   :  { %3055 = vrcp.f32 %v2298_v46  ;;  %v2296_v56 = vadd.f32 1.0, %v2292_v41  ;;  %v2295_v58 = vmul.f32 0.3275911, %v2291_v50  ;;  %v2347_v62 = vsub.f32 0.0, %v2291_v50 }
 0xb51   :  { %v2289_v22 = vand.u32 2147483647, %v3738_v51  ;;  %v2348_v4 = vmul.f32 %v2344_v38, %v2288_v30  ;;  %v2356_v5 = vmul.f32 1.442695, %v2350_v43  ;;  %vm2281_vm9 = vcmp.ge.f32.partialorder %v3738_v51, 0.0 }
 0xb52   :  { %3057 = vrcp.f32 %v2296_v56  ;;  %v2299_v52 = vadd.f32 1.0, %v2295_v58  ;;  %v2351_v63 = vmul.f32 %v2347_v62, %v2291_v50 }
 0xb53   :  { %v2293_v57 = vmul.f32 0.3275911, %v2289_v22  ;;  %v2345_v15 = vsub.f32 0.0, %v2289_v22  ;;  %v2352_v29 = vmul.f32 1.442695, %v2348_v4 }
 0xb54   :  { %3059 = vrcp.f32 %v2299_v52  ;;  %v2358_v0 = vmul.f32 1.442695, %v2351_v63  ;;  %v3079_v63 = vmov -1.0  }
 0xb55   :  { %v2297_v55 = vadd.f32 1.0, %v2293_v57  ;;  %v2349_v7 = vmul.f32 %v2345_v15, %v2289_v22 }
 0xb57   :  { %3061 = vrcp.f32 %v2297_v55  ;;  %v2354_v47 = vmul.f32 1.442695, %v2349_v7 }
 0xb58   :  { %3063 = vpow2.f32 %v2356_v5 }
 0xb59   :  { %3065 = vpow2.f32 %v2352_v29 }
 0xb5a   :  { %3067 = vpow2.f32 %v2358_v0 }
 0xb5b   :  { %3069 = vpow2.f32 %v2354_v47 }
 0xb5d   :  { %v3056_v3 = vpop.eup %3055 }
 0xb5e   :  { %v2310_v14 = vmul.f32 1.0614054, %v3056_v3 }
 0xb5f   :  { %v3058_v17 = vpop.eup %3057 }
 0xb60   :  { %v2588_v23 = vadd.f32 -1.4531521, %v2310_v14  ;;  %v2308_v16 = vmul.f32 1.0614054, %v3058_v17 }
 0xb61   :  { %v3060_v60 = vpop.eup %3059 }
 0xb62   :  { %v2318_v27 = vmul.f32 %v3056_v3, %v2588_v23  ;;  %v2586_v32 = vadd.f32 -1.4531521, %v2308_v16  ;;  %v2311_v45 = vmul.f32 1.0614054, %v3060_v60  ;;  %v2284_v23 = vsel %vm2280_vm7, 1.0, %v3079_v63 }
 0xb64   :  { %v2322_v49 = vadd.f32 1.4214138, %v2318_v27  ;;  %v3062_v53 = vpop.eup %3061  ;;  %v2316_v54 = vmul.f32 %v3058_v17, %v2586_v32  ;;  %v2589_v2 = vadd.f32 -1.4531521, %v2311_v45  ;;  %v2287_v27 = vsel %vm2283_vm8, 1.0, %v3079_v63 }
 0xb65   :  { %v2309_v24 = vmul.f32 1.0614054, %v3062_v53  ;;  %v3064_v50 = vpop.eup %3063  ;;  %v2285_v45 = vsel %vm2281_vm9, 1.0, %v3079_v63 }
 0xb66   :  { %v2326_v34 = vmul.f32 %v3056_v3, %v2322_v49  ;;  %v2320_v13 = vadd.f32 1.4214138, %v2316_v54  ;;  %v2319_v1 = vmul.f32 %v3060_v60, %v2589_v2  ;;  %v3066_v57 = vpop.eup %3065  ;;  %v2372_v54 = vmul.f32 0.5, %v3722_v19 }
 0xb67   :  { %v2587_v8 = vadd.f32 -1.4531521, %v2309_v24  ;;  %v3068_v43 = vpop.eup %3067  ;;  %v2373_v2 = vmul.f32 0.5, %v3734_v44  ;;  %v2374_v24 = vmul.f32 0.5, %v3717_v18 }
 0xb68   :  { %v2592_v48 = vadd.f32 -0.28449672, %v2326_v34  ;;  %v2324_v36 = vmul.f32 %v3058_v17, %v2320_v13  ;;  %v2323_v9 = vadd.f32 1.4214138, %v2319_v1  ;;  %v3070_v5 = vpop.eup %3069 }
 0xb69   :  { %v2317_v39 = vmul.f32 %v3062_v53, %v2587_v8 }
 0xb6a   :  { %v2334_v37 = vmul.f32 %v3056_v3, %v2592_v48  ;;  %v2590_v10 = vadd.f32 -0.28449672, %v2324_v36  ;;  %v2327_v20 = vmul.f32 %v3060_v60, %v2323_v9  ;;  %v2594_v36 = vld [vmem:[%s3781_s13] ss:$0 sm:$0xff] }
 0xb6b   :  { %v2321_v6 = vadd.f32 1.4214138, %v2317_v39 }
 0xb6c   :  { %v2338_v11 = vadd.f32 0.2548296, %v2334_v37  ;;  %v2332_v28 = vmul.f32 %v3058_v17, %v2590_v10  ;;  %v2593_v42 = vadd.f32 -0.28449672, %v2327_v20 }
 0xb6d   :  { %v2325_v30 = vmul.f32 %v3062_v53, %v2321_v6 }
 0xb6e   :  { %v2342_v33 = vmul.f32 %v3056_v3, %v2338_v11  ;;  %v2336_v46 = vadd.f32 0.2548296, %v2332_v28  ;;  %v2335_v41 = vmul.f32 %v3060_v60, %v2593_v42 }
 0xb6f   :  { %v2591_v56 = vadd.f32 -0.28449672, %v2325_v30 }
 0xb70   :  { %v2362_v58 = vmul.f32 %v3064_v50, %v2342_v33  ;;  %v2340_v22 = vmul.f32 %v3058_v17, %v2336_v46  ;;  %v2339_v52 = vadd.f32 0.2548296, %v2335_v41  ;;  %v2286_v17 = vsel %vm2282_vm6, 1.0, %v3079_v63 }
 0xb71   :  { %v2333_v55 = vmul.f32 %v3062_v53, %v2591_v56 }
 0xb72   :  { %v2360_v61 = vmul.f32 %v3066_v57, %v2340_v22  ;;  %v2343_v38 = vmul.f32 %v3060_v60, %v2339_v52  ;;  %v2366_v4 = vsub.f32 1.0, %v2362_v58 }
 0xb73   :  { %v2337_v62 = vadd.f32 0.2548296, %v2333_v55 }
 0xb74   :  { %v2364_v3 = vsub.f32 1.0, %v2360_v61  ;;  %v2363_v14 = vmul.f32 %v3068_v43, %v2343_v38  ;;  %v2370_v31 = vmul.f32 %v2366_v4, %v2286_v17 }
 0xb75   :  { %v2341_v15 = vmul.f32 %v3062_v53, %v2337_v62  ;;  %v2375_v53 = vmul.f32 0.5, %v3728_v26 }
 0xb76   :  { %v2367_v16 = vsub.f32 1.0, %v2363_v14  ;;  %v2368_v29 = vmul.f32 %v2364_v3, %v2284_v23  ;;  %v2378_v25 = vadd.f32 1.0, %v2370_v31 }
 0xb77   :  { %v2361_v60 = vmul.f32 %v3070_v5, %v2341_v15 }
 0xb78   :  { %v2371_v7 = vmul.f32 %v2367_v16, %v2287_v27  ;;  %v2376_v0 = vadd.f32 1.0, %v2368_v29  ;;  %v2382_v1 = vmul.f32 %v2378_v25, %v2374_v24 }
 0xb79   :  { %v2365_v40 = vsub.f32 1.0, %v2361_v60 }
 0xb7a   :  { %v2379_v32 = vadd.f32 1.0, %v2371_v7  ;;  %v2380_v51 = vmul.f32 %v2376_v0, %v2372_v54 }
 0xb7b   :  { %v2369_v49 = vmul.f32 %v2365_v40, %v2285_v45 }
 0xb7c   :  { %v2383_v47 = vmul.f32 %v2379_v32, %v2375_v53 }
 0xb7d   :  { %v2377_v34 = vadd.f32 1.0, %v2369_v49 }
 0xb7e   :  { %v2385_v8 = vpack.c.bf16 %v2383_v47, %v2382_v1 }
 0xb7f   :  { %v2381_v13 = vmul.f32 %v2377_v34, %v2373_v2 }
 0xb81   :  { %v2384_v48 = vpack.c.bf16 %v2381_v13, %v2380_v51 }
 0xb83   :  { %2938 = vmatprep.mubr.bf16.mxu1 %v2384_v48 }
 0xb84   :  { %2939 = vmatmul.mubr.bf16.vlgmr.msra.gmra.mxu1 %v2385_v8 }
 0xc44   :  { %v2940_v26 = vpop.f32.mrf.mxu1 }
 0xc45   :  { %v2500_v9 = vadd.f32 %v2940_v26, %v2594_v36 }
 0xc46   :  { %v2491_v19 = vpop.f32.mrf.mxu1 }
 0xc47   :  { %v2508_v44 = vadd.f32 %v2500_v9, %v3652_v59  ;;  %v2492_v37 = vadd.f32 %v2594_v36, %v2491_v19 }
 0xc48   :  { %v2941_v18 = vpop.f32.mrf.mxu1 }
 0xc49   :  { %v2609_v39 = vpack.c.bf16 %v2508_v44, %v2508_v44  ;;  %v2506_v10 = vadd.f32 %v2492_v37, %v3649_v12  ;;  %v2503_v20 = vadd.f32 %v2941_v18, %v2594_v36 }
 0xc4a   :  { %v2494_v11 = vpop.f32.mrf.mxu1 }
 0xc4b   :  { %2529 = vst.msk [vmem:[%s3782_s14 + $0x8] sm:$0xf] %vm2526_vm10, %v2609_v39  ;;  %v2607_v6 = vpack.c.bf16 %v2506_v10, %v2506_v10  ;;  %v2509_v28 = vadd.f32 %v2503_v20, %v3660_v21  ;;  %v2495_v42 = vadd.f32 %v2594_v36, %v2494_v11 }
 0xc4d   :  { %2527 = vst.msk [vmem:[%s3782_s14] sm:$0xf] %vm2526_vm10, %v2607_v6  ;;  %v2610_v59 = vpack.c.bf16 %v2509_v28, %v2509_v28  ;;  %v2507_v33 = vadd.f32 %v2495_v42, %v3657_v35 }
 0xc4f   :  { %2530 = vst.msk [vmem:[%s3782_s14 + $0xc] sm:$0xf] %vm2526_vm10, %v2610_v59  ;;  %v2608_v12 = vpack.c.bf16 %v2507_v33, %v2507_v33 }
 0xc51   :  { %2528 = vst.msk [vmem:[%s3782_s14 + $0x4] sm:$0xf] %vm2526_vm10, %v2608_v12 }

// kernel: nest_forward.8
= control target key start
LH: loop header
LB: loop body
LE: loop exit
PB: predicated region body
PF: predicated region fallthrough
CT: control target
= control target key end

     0   :  { %vm62_vm0 = vcmask 523264   ;;  %v2021_v8 = vmov 839922192   ;;  %v72_v10 = vlaneseq  ;;  %v2022_v11 = vmov 1985246804   ;;  %s2028_s17 = smov 112   ;;  %s2479_s0 = inlined_call_operand.vmem [shape: bf16[8,64], index: 0, kind: input, shape index: {}]   ;;  %s2480_s1 = inlined_call_operand.vmem [shape: f32[4,64], index: 1, kind: input, shape index: {}]   ;;  %s2481_s4 = inlined_call_operand.vmem [shape: bf16[64,192], index: 4, kind: input, shape index: {}]   ;;  %s2482_s2 = inlined_call_operand.vmem [shape: f32[1,64], index: 2, kind: input, shape index: {}]   ;;  %s2483_s3 = inlined_call_operand.vmem [shape: f32[1,64], index: 3, kind: input, shape index: {}]   ;;  %s2484_s5 = inlined_call_operand.vmem [shape: f32[1,192], index: 5, kind: input, shape index: {}]   ;;  %s2485_s6 = inlined_call_operand.vmem [shape: bf16[64,64], index: 6, kind: input, shape index: {}]   ;;  %s2486_s7 = inlined_call_operand.vmem [shape: f32[1,64], index: 7, kind: input, shape index: {}]   ;;  %s2487_s10 = inlined_call_operand.vmem [shape: bf16[64,256], index: 10, kind: input, shape index: {}]   ;;  %s2488_s8 = inlined_call_operand.vmem [shape: f32[1,64], index: 8, kind: input, shape index: {}]   ;;  %s2489_s9 = inlined_call_operand.vmem [shape: f32[1,64], index: 9, kind: input, shape index: {}]   ;;  %s2490_s12 = inlined_call_operand.vmem [shape: bf16[256,64], index: 12, kind: input, shape index: {}]   ;;  %s2491_s11 = inlined_call_operand.vmem [shape: f32[1,256], index: 11, kind: input, shape index: {}]   ;;  %s2492_s13 = inlined_call_operand.vmem [shape: f32[1,64], index: 13, kind: input, shape index: {}]   ;;  %s2493_s14 = inlined_call_operand.vmem [shape: bf16[8,64], index: 14, kind: output, shape index: {}]  }
   0x1   :  { %v48_v0 = vld [vmem:[%s2479_s0] sm:$0xf]  ;;  %v70_v9 = vunpack.c.l.s4 %v2021_v8  ;;  %v77_v12 = vunpack.c.l.s4 %v2022_v11  ;;  %v1933_v28 = vld [vmem:[%s2481_s4 + $0x34] ss:$8 sps:$4 sm:$0xff]   ;;  %v1935_v29 = vld [vmem:[%s2481_s4 + $0x30] ss:$8 sps:$4 sm:$0xff]  }
   0x2   :  { %v53_v1 = vld [vmem:[%s2480_s1] sm:$0xf]  ;;  %v49_v2 = vunpack.c.l.bf16 %v48_v0  ;;  %v2122_v14 = vshrl.u32 %v72_v10, 7  ;;  %214 = vmatprep.subr.bf16.mxu1 %v1933_v28  ;;  %v1936_v30 = vld [vmem:[%s2481_s4 + $0x24] ss:$8 sps:$4 sm:$0xff]   ;;  %v2023_v35 = vmov 0  }
   0x3   :  { %v71_v13 = vunpack.c.0.s8 %v70_v9  ;;  %v78_v15 = vunpack.c.0.s8 %v77_v12  ;;  %215 = vmatpush1.bf16.msra.mxu1 %v1935_v29  ;;  %v1938_v31 = vld [vmem:[%s2481_s4 + $0x20] ss:$8 sps:$4 sm:$0xff]   ;;  %v1939_v32 = vld [vmem:[%s2481_s4 + $0x14] ss:$8 sps:$4 sm:$0xff]   ;;  %v1941_v33 = vld [vmem:[%s2481_s4 + $0x10] ss:$8 sps:$4 sm:$0xff]   ;;  %238 = vmatprep.mubr.bf16.mxu1 %v2023_v35 }
   0x4   :  { %v51_v3 = vcombine.high %v49_v2, %v49_v2  ;;  %v2115_v4 = vadd.f32 %v53_v1, %v49_v2  ;;  %216 = vmatprep.subr.bf16.mxu1 %v1936_v30  ;;  %v1942_v34 = vld [vmem:[%s2481_s4 + $0x4] ss:$8 sps:$4 sm:$0xff]   ;;  %v1944_v36 = vld [vmem:[%s2481_s4] ss:$8 sps:$4 sm:$0xff]   ;;  %v2024_v55 = vmov 0.0   ;;  %v155_v56 = vsub.s32 0, %v2122_v14 }
   0x5   :  { %v2125_v16 = vsub.s32 %v71_v13, %v2122_v14  ;;  %v2128_v17 = vsub.s32 %v78_v15, %v2122_v14  ;;  %v1688_v40 = vld [vmem:[%s2482_s2] ss:$0 sm:$0xff]  ;;  %1824 = vmatprep.subr.bf16.mxu0 %v2024_v55  ;;  %v159_v58 = vsub.s32 1, %v2122_v14  ;;  %vm2025_vm1 = vmmov 0   ;;  %s2026_s4 = smov 64   ;;  %s2029_s18 = smov 32  }
   0x6   :  { %v2117_v5 = vadd.f32 %v53_v1, %v51_v3  ;;  %v1689_v42 = vld [vmem:[%s2483_s3] ss:$0 sm:$0xff]  ;;  %v124_v45 = vcombine.high %v1688_v40, %v1688_v40  ;;  %1826 = vmatprep.mubr.msk.bf16.mxu0 %vm2025_vm1, %v2024_v55  ;;  %vm385_vm2 = vcmask 1041408   ;;  %vm258_vm3 = vcmask 130048   ;;  %s2030_s19 = smov 96   ;;  %s2031_s20 = smov 16  }
   0x7   :  { %217 = vmatpush1.bf16.msra.mxu1 %v1938_v31  ;;  %v134_v48 = vcombine.high %v1689_v42, %v1689_v42  ;;  %v151_v57 = vld [vmem:[%s2484_s5] sm:$0x3]  ;;  %vm354_vm4 = vcmask 27648   ;;  %s2027_s5 = smov 48   ;;  %vm381_vm5 = vcmask 31744   ;;  %s2032_s21 = smov 80  }
   0x8   :  { %v60_v6 = vcombine.low %v2115_v4, %v2117_v5  ;;  %218 = vmatprep.subr.bf16.mxu1 %v1939_v32  ;;  %v156_v59 = vrot.slane %v151_v57, %v155_v56  ;;  %v160_v60 = vrot.slane %v151_v57, %v159_v58  ;;  %vm1160_vm6 = vcmask 261120  }
   0x9   :  { %vm1162_vm7 = vcmask 392192   ;;  %vm1682_vm10 = vcmask 519168  }
   0xa   :  { %v63_v7 = vsel %vm62_vm0, %v60_v6, 0.0 }
   0xb   :  { %64 = vadd.xlane.f32.xlu0 %v63_v7  ;;  %219 = vmatpush1.bf16.msra.mxu1 %v1941_v33 }
   0xc   :  { %220 = vmatprep.subr.bf16.mxu1 %v1942_v34 }
   0xf   :  { %221 = vmatpush1.bf16.msra.mxu1 %v1944_v36 }
  0x10   :  { %1812 = vmatprep.subr.bf16.mxu1 %v2024_v55 }
  0x94   :  { %v65_v18 = vpop.xlane.xlu0 %64 }
  0x95   :  { %v67_v19 = vmul.f32 0.015625, %v65_v18 }
  0x97   :  { %v75_v20 = vrot.slane %v67_v19, %v2125_v16  ;;  %v82_v21 = vrot.slane %v67_v19, %v2128_v17 }
  0x99   :  { %v85_v22 = vsub.f32 %v2115_v4, %v75_v20  ;;  %v86_v23 = vsub.f32 %v2117_v5, %v82_v21 }
  0x9b   :  { %v87_v24 = vmul.f32 %v85_v22, %v85_v22  ;;  %v88_v25 = vmul.f32 %v86_v23, %v86_v23 }
  0x9d   :  { %v91_v26 = vcombine.low %v87_v24, %v88_v25 }
  0x9f   :  { %v93_v27 = vsel %vm62_vm0, %v91_v26, 0.0 }
  0xa0   :  { %94 = vadd.xlane.f32.xlu0 %v93_v27 }
 0x129   :  { %v95_v37 = vpop.xlane.xlu0 %94 }
 0x12a   :  { %v96_v38 = vmul.f32 0.015625, %v95_v37 }
 0x12c   :  { %v97_v39 = vadd.f32 1e-06, %v96_v38 }
 0x12e   :  { %1977 = vrsqrt.f32 %v97_v39 }
 0x13b   :  { %v1978_v41 = vpop.eup %1977 }
 0x13c   :  { %v106_v43 = vrot.slane %v1978_v41, %v2125_v16  ;;  %v113_v44 = vrot.slane %v1978_v41, %v2128_v17 }
 0x13e   :  { %v116_v46 = vmul.f32 %v106_v43, %v85_v22  ;;  %v117_v47 = vmul.f32 %v113_v44, %v86_v23 }
 0x140   :  { %v126_v49 = vmul.f32 %v1688_v40, %v116_v46  ;;  %v127_v50 = vmul.f32 %v124_v45, %v117_v47 }
 0x142   :  { %v136_v51 = vadd.f32 %v1689_v42, %v126_v49  ;;  %v137_v52 = vadd.f32 %v134_v48, %v127_v50 }
 0x144   :  { %v140_v53 = vcombine.low %v136_v51, %v137_v52 }
 0x146   :  { %v142_v54 = vpack.c.bf16 %v140_v53, %v140_v53 }
 0x148   :  { %1698 = vmatmul.mubr.msk.bf16.vlgmr.msra.gmra.mxu1 %vm62_vm0, %v142_v54 }
 0x149   :  { %1814 = vmatprep.mubr.msk.bf16.mxu1 %vm2025_vm1, %v2024_v55 }
 0x208   :  { %v240_v61 = vpop.f32.mrf.mxu1 }
 0x209   :  { %v241_v62 = vadd.f32 %v240_v61, %v156_v59 }
 0x20a   :  { %v242_v63 = vpop.f32.mrf.mxu1 }
 0x20b   :  { %v248_v0 = vcombine.high %v241_v62, %v241_v62  ;;  %v2184_v1 = vpack.c.bf16 %v241_v62, %v241_v62  ;;  %v243_v2 = vadd.f32 %v242_v63, %v160_v60 }
 0x20c   :  { %v244_v3 = vpop.f32.mrf.mxu1 }
 0x20d   :  { %v2186_v6 = vpack.c.bf16 %v243_v2, %v243_v2  ;;  %256 = vrot.lane.b32.xlu1 %v2184_v1, %s2026_s4  ;;  %v2189_v8 = vpack.c.bf16 %v248_v0, %v248_v0  ;;  %v251_v13 = vcombine.high %v243_v2, %v243_v2 }
 0x20e   :  { %v245_v7 = vpop.f32.mrf.mxu1 }
 0x20f   :  { %v387_v9 = vsel %vm385_vm2, %v2186_v6, 0  ;;  %v2203_v18 = vpack.c.bf16 %v251_v13, %v251_v13 }
 0x210   :  { %1825 = vmatpush3.bf16.msra.mxu0 %v387_v9 }
 0x211   :  { %306 = vrot.lane.b32.xlu1 %v2189_v8, %s2026_s4  ;;  %1836 = vmatprep.subr.bf16.mxu0 %v2024_v55  ;;  %v433_v19 = vsel %vm385_vm2, %v2203_v18, 0 }
 0x27f   :  { %v257_v10 = vpop.permute.xlu1 %256 }
 0x280   :  { %v263_v11 = vsel %vm258_vm3, %v257_v10, 0 }
 0x281   :  { %1813 = vmatpush3.bf16.xpose.msra.mxu1 %v263_v11 }
 0x282   :  { %1818 = vmatprep.subr.bf16.mxu1 %v2024_v55 }
 0x283   :  { %v307_v12 = vpop.permute.xlu1 %306 }
 0x284   :  { %v312_v15 = vsel %vm258_vm3, %v307_v12, 0 }
 0x288   :  { %1815 = vmatmul.mubr.msk.bf16.vlgmr.msra.gmra.mxu1 %vm258_vm3, %v2184_v1 }
 0x289   :  { %1819 = vmatpush3.bf16.xpose.msra.mxu1 %v312_v15  ;;  %1820 = vmatprep.mubr.msk.bf16.mxu1 %vm2025_vm1, %v2024_v55 }
 0x28a   :  { %1830 = vmatprep.subr.bf16.mxu1 %v2024_v55 }
 0x290   :  { %1821 = vmatmul.mubr.msk.bf16.vlgmr.msra.gmra.mxu1 %vm258_vm3, %v2189_v8 }
 0x291   :  { %1831 = vmatpush3.bf16.msra.mxu1 %v433_v19  ;;  %1832 = vmatprep.mubr.msk.bf16.mxu1 %vm2025_vm1, %v2024_v55 }
 0x292   :  { %1842 = vmatprep.subr.bf16.mxu1 %v2024_v55 }
 0x348   :  { %v299_v20 = vpop.f32.mrf.mxu1 }
 0x349   :  { %v355_v21 = vsel %vm354_vm4, %v299_v20, -inf }
 0x34a   :  { %356 = vmax.xlane.f32.xlu0 %v355_v21  ;;  %v1816_v22 = vpop.f32.mrf.mxu1 }
 0x34c   :  { %v302_v23 = vpop.f32.mrf.mxu1 }
 0x34e   :  { %v1817_v24 = vpop.f32.mrf.mxu1 }
 0x350   :  { %v348_v25 = vpop.f32.mrf.mxu1 }
 0x351   :  { %v358_v26 = vsel %vm354_vm4, %v348_v25, -inf }
 0x352   :  { %359 = vmax.xlane.f32.xlu1 %v358_v26  ;;  %v1822_v27 = vpop.f32.mrf.mxu1 }
 0x354   :  { %v351_v28 = vpop.f32.mrf.mxu1 }
 0x356   :  { %v1823_v29 = vpop.f32.mrf.mxu1 }
 0x360   :  { %477 = vrot.lane.b32.xlu0 %v2184_v1, %s2027_s5 }
 0x363   :  { %475 = vrot.lane.b32.xlu1 %v2184_v1, %s2028_s17 }
 0x3d3   :  { %v357_v30 = vpop.xlane.xlu0 %356 }
 0x3d4   :  { %v361_v31 = vsub.f32 %v299_v20, %v357_v30 }
 0x3d6   :  { %v363_v32 = vmul.f32 1.442695, %v361_v31 }
 0x3d7   :  { %v478_v41 = vpop.permute.xlu0 %477 }
 0x3d8   :  { %1979 = vpow2.f32 %v363_v32  ;;  %v483_v47 = vsel %vm258_vm3, %v478_v41, 0 }
 0x3db   :  { %v360_v33 = vpop.xlane.xlu1 %359 }
 0x3dc   :  { %v362_v34 = vsub.f32 %v348_v25, %v360_v33 }
 0x3de   :  { %v365_v36 = vmul.f32 1.442695, %v362_v34 }
 0x3df   :  { %v476_v52 = vpop.permute.xlu1 %475 }
 0x3e0   :  { %1981 = vpow2.f32 %v365_v36 }
 0x3e5   :  { %v1980_v37 = vpop.eup %1979 }
 0x3e6   :  { %v367_v38 = vsel %vm354_vm4, %v1980_v37, 0.0 }
 0x3e7   :  { %368 = vadd.xlane.f32.xlu0 %v367_v38 }
 0x3ed   :  { %v1982_v39 = vpop.eup %1981 }
 0x3ee   :  { %v370_v40 = vsel %vm354_vm4, %v1982_v39, 0.0 }
 0x3ef   :  { %371 = vadd.xlane.f32.xlu0 %v370_v40 }
 0x405   :  { %527 = vrot.lane.b32.xlu0 %v2189_v8, %s2027_s5 }
 0x409   :  { %525 = vrot.lane.b32.xlu0 %v2189_v8, %s2028_s17 }
 0x470   :  { %v369_v42 = vpop.xlane.xlu0 %368 }
 0x471   :  { %1983 = vrcp.f32 %v369_v42 }
 0x478   :  { %v372_v43 = vpop.xlane.xlu0 %371 }
 0x479   :  { %1985 = vrcp.f32 %v372_v43 }
 0x47c   :  { %v528_v50 = vpop.permute.xlu0 %527 }
 0x47d   :  { %v533_v53 = vsel %vm258_vm3, %v528_v50, 0 }
 0x47e   :  { %v1984_v44 = vpop.eup %1983 }
 0x47f   :  { %v375_v45 = vmul.f32 %v1984_v44, %v1980_v37 }
 0x480   :  { %v526_v54 = vpop.permute.xlu0 %525 }
 0x481   :  { %v377_v46 = vpack.c.bf16 %v375_v45, %v375_v45 }
 0x483   :  { %1827 = vmatmul.mubr.msk.bf16.vlgmr.msra.gmra.mxu0 %vm381_vm5, %v377_v46 }
 0x484   :  { %1837 = vmatpush3.bf16.xpose.msra.mxu0 %v483_v47  ;;  %1838 = vmatprep.mubr.msk.bf16.mxu0 %vm2025_vm1, %v2024_v55 }
 0x485   :  { %1848 = vmatprep.subr.bf16.mxu0 %v2024_v55 }
 0x486   :  { %v1986_v48 = vpop.eup %1985 }
 0x487   :  { %v376_v49 = vmul.f32 %v1986_v48, %v1982_v39 }
 0x489   :  { %v378_v51 = vpack.c.bf16 %v376_v49, %v376_v49 }
 0x48b   :  { %1833 = vmatmul.mubr.msk.bf16.vlgmr.msra.gmra.mxu1 %vm381_vm5, %v378_v51  ;;  %1839 = vmatmul.mubr.msk.bf16.vlgmr.msra.gmra.mxu0 %vm258_vm3, %v476_v52 }
 0x48c   :  { %1843 = vmatpush3.bf16.xpose.msra.mxu1 %v533_v53  ;;  %1844 = vmatprep.mubr.msk.bf16.mxu1 %vm2025_vm1, %v2024_v55 }
 0x48d   :  { %1854 = vmatprep.subr.bf16.mxu1 %v2024_v55  ;;  %1850 = vmatprep.mubr.msk.bf16.mxu0 %vm2025_vm1, %v2024_v55 }
 0x493   :  { %1845 = vmatmul.mubr.msk.bf16.vlgmr.msra.gmra.mxu1 %vm258_vm3, %v526_v54 }
 0x494   :  { %1856 = vmatprep.mubr.msk.bf16.mxu1 %vm2025_vm1, %v2024_v55 }
 0x543   :  { %v2240_v57 = vpop.f32.mrf.mxu0 }
 0x545   :  { %v1828_v59 = vpop.f32.mrf.mxu0 }
 0x547   :  { %v426_v60 = vpop.f32.mrf.mxu0 }
 0x549   :  { %v1829_v61 = vpop.f32.mrf.mxu0 }
 0x54b   :  { %v2242_v62 = vpop.f32.mrf.mxu1  ;;  %v519_v63 = vpop.f32.mrf.mxu0 }
 0x54c   :  { %v1139_v0 = vcombine.low %v2240_v57, %v2242_v62  ;;  %v575_v2 = vsel %vm354_vm4, %v519_v63, -inf }
 0x54d   :  { %576 = vmax.xlane.f32.xlu0 %v575_v2  ;;  %v1834_v3 = vpop.f32.mrf.mxu1  ;;  %v1840_v7 = vpop.f32.mrf.mxu0 }
 0x54f   :  { %v472_v9 = vpop.f32.mrf.mxu1  ;;  %v522_v10 = vpop.f32.mrf.mxu0 }
 0x551   :  { %v1835_v11 = vpop.f32.mrf.mxu1  ;;  %v1841_v12 = vpop.f32.mrf.mxu0 }
 0x553   :  { %v569_v13 = vpop.f32.mrf.mxu1 }
 0x554   :  { %v578_v15 = vsel %vm354_vm4, %v569_v13, -inf }
 0x555   :  { %579 = vmax.xlane.f32.xlu1 %v578_v15  ;;  %v1846_v19 = vpop.f32.mrf.mxu1 }
 0x557   :  { %v572_v20 = vpop.f32.mrf.mxu1 }
 0x559   :  { %v1847_v21 = vpop.f32.mrf.mxu1 }
 0x563   :  { %600 = vrot.lane.b32.xlu0 %v2186_v6, %s2028_s17 }
 0x566   :  { %649 = vrot.lane.b32.xlu1 %v2203_v18, %s2028_s17 }
 0x56a   :  { %749 = vrot.lane.b32.xlu1 %v2189_v8, %s2029_s18 }
 0x56e   :  { %747 = vrot.lane.b32.xlu1 %v2189_v8, %s2030_s19 }
 0x5d6   :  { %v577_v22 = vpop.xlane.xlu0 %576 }
 0x5d7   :  { %v581_v23 = vsub.f32 %v519_v63, %v577_v22 }
 0x5d9   :  { %v583_v24 = vmul.f32 1.442695, %v581_v23 }
 0x5da   :  { %v601_v25 = vpop.permute.xlu0 %600 }
 0x5db   :  { %1987 = vpow2.f32 %v583_v24  ;;  %v606_v26 = vsel %vm385_vm2, %v601_v25, 0 }
 0x5dc   :  { %1849 = vmatpush3.bf16.msra.mxu0 %v606_v26 }
 0x5dd   :  { %1860 = vmatprep.subr.bf16.mxu0 %v2024_v55 }
 0x5de   :  { %v580_v27 = vpop.xlane.xlu1 %579 }
 0x5df   :  { %v582_v28 = vsub.f32 %v569_v13, %v580_v27 }
 0x5e1   :  { %v585_v29 = vmul.f32 1.442695, %v582_v28 }
 0x5e2   :  { %v650_v30 = vpop.permute.xlu1 %649 }
 0x5e3   :  { %1989 = vpow2.f32 %v585_v29  ;;  %v655_v31 = vsel %vm385_vm2, %v650_v30, 0 }
 0x5e4   :  { %1855 = vmatpush3.bf16.msra.mxu1 %v655_v31 }
 0x5e5   :  { %1866 = vmatprep.subr.bf16.mxu1 %v2024_v55 }
 0x5e6   :  { %v750_v46 = vpop.permute.xlu1 %749 }
 0x5e7   :  { %v755_v49 = vsel %vm258_vm3, %v750_v46, 0 }
 0x5e8   :  { %v1988_v32 = vpop.eup %1987 }
 0x5e9   :  { %v587_v33 = vsel %vm354_vm4, %v1988_v32, 0.0 }
 0x5ea   :  { %588 = vadd.xlane.f32.xlu0 %v587_v33  ;;  %v748_v50 = vpop.permute.xlu1 %747 }
 0x5f0   :  { %v1990_v34 = vpop.eup %1989 }
 0x5f1   :  { %v590_v36 = vsel %vm354_vm4, %v1990_v34, 0.0 }
 0x5f2   :  { %591 = vadd.xlane.f32.xlu0 %v590_v36 }
 0x608   :  { %699 = vrot.lane.b32.xlu0 %v2184_v1, %s2029_s18 }
 0x60c   :  { %697 = vrot.lane.b32.xlu0 %v2184_v1, %s2030_s19 }
 0x673   :  { %v589_v37 = vpop.xlane.xlu0 %588 }
 0x674   :  { %1991 = vrcp.f32 %v589_v37 }
 0x67b   :  { %v592_v38 = vpop.xlane.xlu0 %591 }
 0x67c   :  { %1993 = vrcp.f32 %v592_v38 }
 0x67f   :  { %v700_v41 = vpop.permute.xlu0 %699 }
 0x680   :  { %v705_v43 = vsel %vm258_vm3, %v700_v41, 0 }
 0x681   :  { %v1992_v39 = vpop.eup %1991 }
 0x682   :  { %v595_v40 = vmul.f32 %v1992_v39, %v1988_v32 }
 0x683   :  { %v698_v48 = vpop.permute.xlu0 %697 }
 0x684   :  { %v597_v42 = vpack.c.bf16 %v595_v40, %v595_v40 }
 0x686   :  { %1851 = vmatmul.mubr.msk.bf16.vlgmr.msra.gmra.mxu0 %vm381_vm5, %v597_v42 }
 0x687   :  { %1861 = vmatpush3.bf16.xpose.msra.mxu0 %v705_v43  ;;  %1862 = vmatprep.mubr.msk.bf16.mxu0 %vm2025_vm1, %v2024_v55 }
 0x688   :  { %1872 = vmatprep.subr.bf16.mxu0 %v2024_v55 }
 0x689   :  { %v1994_v44 = vpop.eup %1993 }
 0x68a   :  { %v596_v45 = vmul.f32 %v1994_v44, %v1990_v34 }
 0x68c   :  { %v598_v47 = vpack.c.bf16 %v596_v45, %v596_v45 }
 0x68e   :  { %1857 = vmatmul.mubr.msk.bf16.vlgmr.msra.gmra.mxu1 %vm381_vm5, %v598_v47  ;;  %1863 = vmatmul.mubr.msk.bf16.vlgmr.msra.gmra.mxu0 %vm258_vm3, %v698_v48 }
 0x68f   :  { %1867 = vmatpush3.bf16.xpose.msra.mxu1 %v755_v49  ;;  %1868 = vmatprep.mubr.msk.bf16.mxu1 %vm2025_vm1, %v2024_v55 }
 0x690   :  { %1878 = vmatprep.subr.bf16.mxu1 %v2024_v55  ;;  %1874 = vmatprep.mubr.msk.bf16.mxu0 %vm2025_vm1, %v2024_v55 }
 0x696   :  { %1869 = vmatmul.mubr.msk.bf16.vlgmr.msra.gmra.mxu1 %vm258_vm3, %v748_v50 }
 0x697   :  { %1880 = vmatprep.mubr.msk.bf16.mxu1 %vm2025_vm1, %v2024_v55 }
 0x746   :  { %v2282_v51 = vpop.f32.mrf.mxu0 }
 0x748   :  { %v1852_v52 = vpop.f32.mrf.mxu0 }
 0x74a   :  { %v645_v53 = vpop.f32.mrf.mxu0 }
 0x74c   :  { %v1853_v54 = vpop.f32.mrf.mxu0 }
 0x74e   :  { %v2284_v59 = vpop.f32.mrf.mxu1  ;;  %v741_v60 = vpop.f32.mrf.mxu0 }
 0x74f   :  { %v1143_v61 = vcombine.low %v2282_v51, %v2284_v59  ;;  %v797_v63 = vsel %vm354_vm4, %v741_v60, -inf }
 0x750   :  { %798 = vmax.xlane.f32.xlu0 %v797_v63  ;;  %v1858_v2 = vpop.f32.mrf.mxu1  ;;  %v1864_v3 = vpop.f32.mrf.mxu0 }
 0x752   :  { %v694_v7 = vpop.f32.mrf.mxu1  ;;  %v744_v9 = vpop.f32.mrf.mxu0 }
 0x754   :  { %v1859_v10 = vpop.f32.mrf.mxu1  ;;  %v1865_v11 = vpop.f32.mrf.mxu0 }
 0x756   :  { %v791_v12 = vpop.f32.mrf.mxu1 }
 0x757   :  { %v800_v13 = vsel %vm354_vm4, %v791_v12, -inf }
 0x758   :  { %801 = vmax.xlane.f32.xlu1 %v800_v13  ;;  %v1870_v15 = vpop.f32.mrf.mxu1 }
 0x75a   :  { %v794_v19 = vpop.f32.mrf.mxu1 }
 0x75c   :  { %v1871_v20 = vpop.f32.mrf.mxu1 }
 0x769   :  { %869 = vrot.lane.b32.xlu1 %v2203_v18, %s2030_s19 }
 0x76d   :  { %919 = vrot.lane.b32.xlu1 %v2184_v1, %s2031_s20 }
 0x771   :  { %969 = vrot.lane.b32.xlu1 %v2189_v8, %s2031_s20 }
 0x775   :  { %967 = vrot.lane.b32.xlu1 %v2189_v8, %s2032_s21 }
 0x7d9   :  { %v799_v21 = vpop.xlane.xlu0 %798 }
 0x7da   :  { %v803_v22 = vsub.f32 %v741_v60, %v799_v21 }
 0x7dc   :  { %v805_v23 = vmul.f32 1.442695, %v803_v22 }
 0x7de   :  { %1995 = vpow2.f32 %v805_v23 }
 0x7e1   :  { %v802_v24 = vpop.xlane.xlu1 %801 }
 0x7e2   :  { %v804_v25 = vsub.f32 %v791_v12, %v802_v24 }
 0x7e4   :  { %v807_v26 = vmul.f32 1.442695, %v804_v25 }
 0x7e5   :  { %v870_v27 = vpop.permute.xlu1 %869 }
 0x7e6   :  { %1997 = vpow2.f32 %v807_v26  ;;  %v875_v28 = vsel %vm385_vm2, %v870_v27, 0 }
 0x7e7   :  { %1879 = vmatpush3.bf16.msra.mxu1 %v875_v28 }
 0x7e8   :  { %1890 = vmatprep.subr.bf16.mxu1 %v2024_v55 }
 0x7e9   :  { %v920_v39 = vpop.permute.xlu1 %919 }
 0x7ea   :  { %v925_v41 = vsel %vm258_vm3, %v920_v39, 0  ;;  %v1946_v39 = vld [vmem:[%s2485_s6 + $0x10] sm:$0xff]  }
 0x7eb   :  { %v1996_v29 = vpop.eup %1995 }
 0x7ec   :  { %v809_v30 = vsel %vm354_vm4, %v1996_v29, 0.0 }
 0x7ed   :  { %810 = vadd.xlane.f32.xlu0 %v809_v30  ;;  %v970_v43 = vpop.permute.xlu1 %969 }
 0x7ee   :  { %v975_v46 = vsel %vm258_vm3, %v970_v43, 0 }
 0x7f1   :  { %v968_v47 = vpop.permute.xlu1 %967 }
 0x7f3   :  { %v1998_v31 = vpop.eup %1997 }
 0x7f4   :  { %v812_v8 = vsel %vm354_vm4, %v1998_v31, 0.0 }
 0x7f5   :  { %813 = vadd.xlane.f32.xlu0 %v812_v8 }
 0x80b   :  { %821 = vrot.lane.b32.xlu0 %v2186_v6, %s2030_s19 }
 0x80f   :  { %917 = vrot.lane.b32.xlu0 %v2184_v1, %s2032_s21 }
 0x876   :  { %v811_v32 = vpop.xlane.xlu0 %810 }
 0x877   :  { %1999 = vrcp.f32 %v811_v32 }
 0x87e   :  { %v814_v33 = vpop.xlane.xlu0 %813 }
 0x87f   :  { %2001 = vrcp.f32 %v814_v33 }
 0x882   :  { %v822_v34 = vpop.permute.xlu0 %821 }
 0x883   :  { %v827_v36 = vsel %vm385_vm2, %v822_v34, 0 }
 0x884   :  { %v2000_v37 = vpop.eup %1999  ;;  %1873 = vmatpush3.bf16.msra.mxu0 %v827_v36 }
 0x885   :  { %1884 = vmatprep.subr.bf16.mxu0 %v2024_v55  ;;  %v817_v38 = vmul.f32 %v2000_v37, %v1996_v29 }
 0x886   :  { %v918_v45 = vpop.permute.xlu0 %917 }
 0x887   :  { %v819_v40 = vpack.c.bf16 %v817_v38, %v817_v38  ;;  %v1945_v38 = vld [vmem:[%s2485_s6 + $0x18] sm:$0xff]  }
 0x889   :  { %1875 = vmatmul.mubr.msk.bf16.vlgmr.msra.gmra.mxu0 %vm381_vm5, %v819_v40  ;;  %v1947_v40 = vld [vmem:[%s2485_s6 + $0x8] sm:$0xff]  }
 0x88a   :  { %1885 = vmatpush3.bf16.xpose.msra.mxu0 %v925_v41  ;;  %1886 = vmatprep.mubr.msk.bf16.mxu0 %vm2025_vm1, %v2024_v55 }
 0x88b   :  { %1896 = vmatprep.subr.bf16.mxu0 %v2024_v55 }
 0x88c   :  { %v2002_v1 = vpop.eup %2001 }
 0x88d   :  { %v818_v42 = vmul.f32 %v2002_v1, %v1998_v31 }
 0x88f   :  { %v820_v44 = vpack.c.bf16 %v818_v42, %v818_v42 }
 0x891   :  { %1881 = vmatmul.mubr.msk.bf16.vlgmr.msra.gmra.mxu1 %vm381_vm5, %v820_v44  ;;  %1887 = vmatmul.mubr.msk.bf16.vlgmr.msra.gmra.mxu0 %vm258_vm3, %v918_v45 }
 0x892   :  { %1891 = vmatpush3.bf16.xpose.msra.mxu1 %v975_v46  ;;  %1892 = vmatprep.mubr.msk.bf16.mxu1 %vm2025_vm1, %v2024_v55 }
 0x893   :  { %1902 = vmatprep.subr.bf16.mxu1 %v2024_v55  ;;  %1898 = vmatprep.mubr.msk.bf16.mxu0 %vm2025_vm1, %v2024_v55 }
 0x899   :  { %1893 = vmatmul.mubr.msk.bf16.vlgmr.msra.gmra.mxu1 %vm258_vm3, %v968_v47 }
 0x89a   :  { %1904 = vmatprep.mubr.msk.bf16.mxu1 %vm2025_vm1, %v2024_v55 }
 0x949   :  { %v863_v48 = vpop.f32.mrf.mxu0 }
 0x94b   :  { %v1876_v49 = vpop.f32.mrf.mxu0 }
 0x94d   :  { %v866_v50 = vpop.f32.mrf.mxu0 }
 0x94f   :  { %v1877_v52 = vpop.f32.mrf.mxu0 }
 0x951   :  { %v911_v53 = vpop.f32.mrf.mxu1  ;;  %v961_v54 = vpop.f32.mrf.mxu0 }
 0x952   :  { %v1017_v60 = vsel %vm354_vm4, %v961_v54, -inf  ;;  %v1149_v20 = vcombine.low %v863_v48, %v911_v53 }
 0x953   :  { %1018 = vmax.xlane.f32.xlu0 %v1017_v60  ;;  %v1882_v63 = vpop.f32.mrf.mxu1  ;;  %v1888_v2 = vpop.f32.mrf.mxu0 }
 0x954   :  { %v1715_v63 = vld [vmem:[%s2486_s7] ss:$0 sm:$0xff] }
 0x955   :  { %v914_v3 = vpop.f32.mrf.mxu1  ;;  %v964_v7 = vpop.f32.mrf.mxu0 }
 0x957   :  { %v1883_v9 = vpop.f32.mrf.mxu1  ;;  %v1889_v10 = vpop.f32.mrf.mxu0 }
 0x959   :  { %v1011_v11 = vpop.f32.mrf.mxu1 }
 0x95a   :  { %v1020_v12 = vsel %vm354_vm4, %v1011_v11, -inf }
 0x95b   :  { %1021 = vmax.xlane.f32.xlu1 %v1020_v12  ;;  %v1894_v13 = vpop.f32.mrf.mxu1 }
 0x95d   :  { %v1014_v15 = vpop.f32.mrf.mxu1 }
 0x95f   :  { %v1895_v19 = vpop.f32.mrf.mxu1 }
 0x96c   :  { %1089 = vrot.lane.b32.xlu1 %v2203_v18, %s2032_s21 }
 0x970   :  { %1144 = vrot.lane.b32.xlu1 %v1143_v61, %s2031_s20 }
 0x974   :  { %1150 = vrot.lane.b32.xlu1 %v1149_v20, %s2029_s18 }
 0x9dc   :  { %v1019_v21 = vpop.xlane.xlu0 %1018 }
 0x9dd   :  { %v1023_v22 = vsub.f32 %v961_v54, %v1019_v21 }
 0x9df   :  { %v1025_v23 = vmul.f32 1.442695, %v1023_v22 }
 0x9e1   :  { %2003 = vpow2.f32 %v1025_v23 }
 0x9e4   :  { %v1022_v24 = vpop.xlane.xlu1 %1021 }
 0x9e5   :  { %v1024_v25 = vsub.f32 %v1011_v11, %v1022_v24 }
 0x9e7   :  { %v1027_v26 = vmul.f32 1.442695, %v1024_v25  ;;  %v1951_v25 = vld [vmem:[%s2487_s10 + $0x34] ss:$8 sps:$4 sm:$0xff]  }
 0x9e8   :  { %v1090_v27 = vpop.permute.xlu1 %1089 }
 0x9e9   :  { %2005 = vpow2.f32 %v1027_v26  ;;  %v1095_v28 = vsel %vm385_vm2, %v1090_v27, 0  ;;  %v1949_v26 = vld [vmem:[%s2487_s10 + $0x30] ss:$8 sps:$4 sm:$0xff]   ;;  %v1954_v27 = vld [vmem:[%s2487_s10 + $0x24] ss:$8 sps:$4 sm:$0xff]  }
 0x9ea   :  { %1903 = vmatpush3.bf16.msra.mxu1 %v1095_v28  ;;  %v1952_v28 = vld [vmem:[%s2487_s10 + $0x20] ss:$8 sps:$4 sm:$0xff]  }
 0x9eb   :  { %1408 = vmatprep.subr.bf16.mxu1 %v1951_v25 }
 0x9ec   :  { %v1145_v49 = vpop.permute.xlu1 %1144 }
 0x9ee   :  { %v2004_v18 = vpop.eup %2003 }
 0x9ef   :  { %v1029_v29 = vsel %vm354_vm4, %v2004_v18, 0.0 }
 0x9f0   :  { %1030 = vadd.xlane.f32.xlu0 %v1029_v29  ;;  %v1151_v50 = vpop.permute.xlu1 %1150  ;;  %v1957_v29 = vld [vmem:[%s2487_s10 + $0x14] ss:$8 sps:$4 sm:$0xff]  }
 0x9f6   :  { %v2006_v51 = vpop.eup %2005 }
 0x9f7   :  { %v1032_v59 = vsel %vm354_vm4, %v2006_v51, 0.0 }
 0x9f8   :  { %1033 = vadd.xlane.f32.xlu0 %v1032_v59  ;;  %v1958_v59 = vld [vmem:[%s2487_s10] ss:$8 sps:$4 sm:$0xff]  }
 0xa0e   :  { %1041 = vrot.lane.b32.xlu0 %v2186_v6, %s2032_s21 }
 0xa79   :  { %v1031_v61 = vpop.xlane.xlu0 %1030 }
 0xa7a   :  { %2007 = vrcp.f32 %v1031_v61 }
 0xa81   :  { %v1034_v30 = vpop.xlane.xlu0 %1033 }
 0xa82   :  { %2009 = vrcp.f32 %v1034_v30 }
 0xa85   :  { %v1042_v31 = vpop.permute.xlu0 %1041 }
 0xa86   :  { %v1047_v8 = vsel %vm385_vm2, %v1042_v31, 0 }
 0xa87   :  { %v2008_v32 = vpop.eup %2007  ;;  %1897 = vmatpush3.bf16.msra.mxu0 %v1047_v8  ;;  %v1721_v8 = vld [vmem:[%s2488_s8] ss:$0 sm:$0xff] }
 0xa88   :  { %v1037_v33 = vmul.f32 %v2008_v32, %v2004_v18  ;;  %1908 = vmatprep.subr.bf16.mxu0 %v2024_v55  ;;  %v1955_v18 = vld [vmem:[%s2487_s10 + $0x10] ss:$8 sps:$4 sm:$0xff]  }
 0xa8a   :  { %v1039_v34 = vpack.c.bf16 %v1037_v33, %v1037_v33  ;;  %v1722_v33 = vld [vmem:[%s2489_s9] ss:$0 sm:$0xff] }
 0xa8c   :  { %1899 = vmatmul.mubr.msk.bf16.vlgmr.msra.gmra.mxu0 %vm381_vm5, %v1039_v34 }
 0xa8d   :  { %1916 = vmatprep.mubr.msk.bf16.mxu0 %vm2025_vm1, %v2024_v55  ;;  %1909 = vmatpush3.bf16.msra.mxu0 %v1945_v38 }
 0xa8e   :  { %1910 = vmatprep.subr.bf16.mxu0 %v2024_v55 }
 0xa8f   :  { %v2010_v36 = vpop.eup %2009 }
 0xa90   :  { %v1038_v6 = vmul.f32 %v2010_v36, %v2006_v51  ;;  %v1960_v51 = vld [vmem:[%s2487_s10 + $0x4] ss:$8 sps:$4 sm:$0xff]  }
 0xa91   :  { %1911 = vmatpush3.bf16.msra.mxu0 %v1946_v39  ;;  %v1328_v39 = vcombine.high %v1722_v33, %v1722_v33 }
 0xa92   :  { %v1040_v37 = vpack.c.bf16 %v1038_v6, %v1038_v6  ;;  %1912 = vmatprep.subr.bf16.mxu0 %v2024_v55  ;;  %v1318_v6 = vcombine.high %v1721_v8, %v1721_v8 }
 0xa94   :  { %1905 = vmatmul.mubr.msk.bf16.vlgmr.msra.gmra.mxu1 %vm381_vm5, %v1040_v37 }
 0xa95   :  { %1432 = vmatprep.mubr.bf16.mxu1 %v2023_v35  ;;  %1913 = vmatpush3.bf16.msra.mxu0 %v1947_v40  ;;  %v1948_v35 = vld [vmem:[%s2485_s6] sm:$0xff]  }
 0xa96   :  { %1914 = vmatprep.subr.bf16.mxu0 %v2024_v55  ;;  %v1159_v55 = vsel %vm258_vm3, %v1139_v0, %v1145_v49  ;;  %1409 = vmatpush1.bf16.msra.mxu1 %v1949_v26  ;;  %v1968_v49 = vld [vmem:[%s2490_s12 + $0x20] sm:$0xff]  }
 0xa97   :  { %v1161_v52 = vsel %vm1160_vm6, %v1159_v55, %v1151_v50  ;;  %1410 = vmatprep.subr.bf16.mxu1 %v1954_v27  ;;  %v1969_v50 = vld [vmem:[%s2490_s12 + $0x58] sm:$0xff]  }
 0xa98   :  { %v1970_v55 = vld [vmem:[%s2490_s12 + $0x18] sm:$0xff]  }
 0xa99   :  { %1915 = vmatpush3.bf16.msra.mxu0 %v1948_v35 }
 0xa9a   :  { %1411 = vmatpush1.bf16.msra.mxu1 %v1952_v28 }
 0xa9b   :  { %1412 = vmatprep.subr.bf16.mxu1 %v1957_v29 }
 0xa9e   :  { %1413 = vmatpush1.bf16.msra.mxu1 %v1955_v18 }
 0xa9f   :  { %1414 = vmatprep.subr.bf16.mxu1 %v1960_v51 }
 0xaa2   :  { %1415 = vmatpush1.bf16.msra.mxu1 %v1958_v59 }
 0xb4c   :  { %v1083_v41 = vpop.f32.mrf.mxu0 }
 0xb4e   :  { %v1900_v1 = vpop.f32.mrf.mxu0 }
 0xb50   :  { %v1086_v42 = vpop.f32.mrf.mxu0 }
 0xb52   :  { %v1901_v43 = vpop.f32.mrf.mxu0 }
 0xb54   :  { %v1131_v44 = vpop.f32.mrf.mxu1 }
 0xb55   :  { %v1155_v45 = vcombine.low %v1083_v41, %v1131_v44  ;;  %v1961_v44 = vld [vmem:[%s2490_s12 + $0x78] sm:$0xff]  }
 0xb56   :  { %v1906_v46 = vpop.f32.mrf.mxu1  ;;  %1790 = vmatprep.subr.bf16.mxu0 %v1961_v44 }
 0xb57   :  { %1156 = vrot.lane.b32.xlu0 %v1155_v45, %s2027_s5  ;;  %v1964_v45 = vld [vmem:[%s2490_s12 + $0x30] sm:$0xff]   ;;  %v1965_v46 = vld [vmem:[%s2490_s12 + $0x68] sm:$0xff]  }
 0xb58   :  { %v1134_v47 = vpop.f32.mrf.mxu1 }
 0xb59   :  { %v1966_v47 = vld [vmem:[%s2490_s12 + $0x28] sm:$0xff]  }
 0xb5a   :  { %v1907_v48 = vpop.f32.mrf.mxu1 }
 0xb5b   :  { %v1967_v48 = vld [vmem:[%s2490_s12 + $0x60] sm:$0xff]  }
 0xbc9   :  { %v1157_v53 = vpop.permute.xlu0 %1156 }
 0xbca   :  { %v1163_v54 = vsel %vm1162_vm7, %v1161_v52, %v1157_v53  ;;  %v1971_v52 = vld [vmem:[%s2490_s12 + $0x50] sm:$0xff]  }
 0xbcb   :  { %v1164_v60 = vpack.c.bf16 %v1163_v54, %v1163_v54  ;;  %v1972_v53 = vld [vmem:[%s2490_s12 + $0x10] sm:$0xff]   ;;  %v1973_v54 = vld [vmem:[%s2490_s12 + $0x48] sm:$0xff]  }
 0xbcd   :  { %1917 = vmatmul.mubr.msk.bf16.vlgmr.msra.gmra.mxu0 %vm62_vm0, %v1164_v60  ;;  %v1974_v60 = vld [vmem:[%s2490_s12 + $0x8] sm:$0xff]  }
 0xc8d   :  { %v1241_v2 = vpop.f32.mrf.mxu0 }
 0xc8e   :  { %v1242_v3 = vadd.f32 %v1715_v63, %v1241_v2  ;;  %v1975_v63 = vld [vmem:[%s2490_s12 + $0x40] sm:$0xff]  }
 0xc8f   :  { %v1918_v7 = vpop.f32.mrf.mxu0  ;;  %v1976_v2 = vld [vmem:[%s2490_s12] sm:$0xff]  }
 0xc90   :  { %v1248_v9 = vcombine.high %v1242_v3, %v1242_v3  ;;  %v2370_v11 = vadd.f32 %v1242_v3, %v2115_v4  ;;  %v1345_v3 = vld [vmem:[%s2491_s11] sm:$0x3] }
 0xc91   :  { %v1244_v10 = vpop.f32.mrf.mxu0  ;;  %v1350_v7 = vrot.slane %v1345_v3, %v155_v56 }
 0xc92   :  { %v2373_v57 = vadd.f32 %v1248_v9, %v2117_v5  ;;  %v1354_v9 = vrot.slane %v1345_v3, %v159_v58 }
 0xc93   :  { %v1919_v62 = vpop.f32.mrf.mxu0 }
 0xc94   :  { %v1256_v0 = vcombine.low %v2370_v11, %v2373_v57 }
 0xc96   :  { %v1258_v12 = vsel %vm62_vm0, %v1256_v0, 0.0 }
 0xc97   :  { %1259 = vadd.xlane.f32.xlu1 %v1258_v12 }
 0xd20   :  { %v1260_v13 = vpop.xlane.xlu1 %1259 }
 0xd21   :  { %v1261_v15 = vmul.f32 0.015625, %v1260_v13 }
 0xd23   :  { %v1269_v19 = vrot.slane %v1261_v15, %v2125_v16  ;;  %v1276_v20 = vrot.slane %v1261_v15, %v2128_v17 }
 0xd25   :  { %v1279_v21 = vsub.f32 %v2370_v11, %v1269_v19  ;;  %v1280_v4 = vsub.f32 %v2373_v57, %v1276_v20 }
 0xd27   :  { %v1281_v22 = vmul.f32 %v1279_v21, %v1279_v21  ;;  %v1282_v5 = vmul.f32 %v1280_v4, %v1280_v4 }
 0xd29   :  { %v1285_v23 = vcombine.low %v1281_v22, %v1282_v5 }
 0xd2b   :  { %v1287_v24 = vsel %vm62_vm0, %v1285_v23, 0.0 }
 0xd2c   :  { %1288 = vadd.xlane.f32.xlu0 %v1287_v24 }
 0xdb5   :  { %v1289_v61 = vpop.xlane.xlu0 %1288 }
 0xdb6   :  { %v1290_v30 = vmul.f32 0.015625, %v1289_v61 }
 0xdb8   :  { %v1291_v31 = vadd.f32 1e-06, %v1290_v30 }
 0xdba   :  { %2011 = vrsqrt.f32 %v1291_v31 }
 0xdc7   :  { %v2012_v32 = vpop.eup %2011 }
 0xdc8   :  { %v1300_v34 = vrot.slane %v2012_v32, %v2125_v16  ;;  %v1307_v36 = vrot.slane %v2012_v32, %v2128_v17  ;;  %v1962_v16 = vld [vmem:[%s2490_s12 + $0x38] sm:$0xff]   ;;  %v1963_v17 = vld [vmem:[%s2490_s12 + $0x70] sm:$0xff]  }
 0xdc9   :  { %1791 = vmatpush3.bf16.msra.mxu0 %v1962_v16  ;;  %v2033_v16 = vmov -1.0  }
 0xdca   :  { %v1310_v37 = vmul.f32 %v1300_v34, %v1279_v21  ;;  %v1311_v38 = vmul.f32 %v1307_v36, %v1280_v4  ;;  %1792 = vmatprep.subr.bf16.mxu0 %v1963_v17 }
 0xdcc   :  { %v1320_v40 = vmul.f32 %v1721_v8, %v1310_v37  ;;  %v1321_v35 = vmul.f32 %v1318_v6, %v1311_v38 }
 0xdcd   :  { %1793 = vmatpush3.bf16.msra.mxu0 %v1964_v45 }
 0xdce   :  { %v1330_v41 = vadd.f32 %v1722_v33, %v1320_v40  ;;  %v1331_v1 = vadd.f32 %v1328_v39, %v1321_v35  ;;  %1794 = vmatprep.subr.bf16.mxu0 %v1965_v46 }
 0xdd0   :  { %v1334_v42 = vcombine.low %v1330_v41, %v1331_v1 }
 0xdd1   :  { %1795 = vmatpush3.bf16.msra.mxu0 %v1966_v47 }
 0xdd2   :  { %v1336_v43 = vpack.c.bf16 %v1334_v42, %v1334_v42  ;;  %1796 = vmatprep.subr.bf16.mxu0 %v1967_v48 }
 0xdd4   :  { %1731 = vmatmul.mubr.msk.bf16.vlgmr.msra.gmra.mxu1 %vm62_vm0, %v1336_v43 }
 0xdd5   :  { %1797 = vmatpush3.bf16.msra.mxu0 %v1968_v49 }
 0xdd6   :  { %1798 = vmatprep.subr.bf16.mxu0 %v1969_v50 }
 0xdd9   :  { %1799 = vmatpush3.bf16.msra.mxu0 %v1970_v55 }
 0xdda   :  { %1800 = vmatprep.subr.bf16.mxu0 %v1971_v52 }
 0xddd   :  { %1801 = vmatpush3.bf16.msra.mxu0 %v1972_v53 }
 0xdde   :  { %1802 = vmatprep.subr.bf16.mxu0 %v1973_v54 }
 0xde1   :  { %1803 = vmatpush3.bf16.msra.mxu0 %v1974_v60 }
 0xde2   :  { %1804 = vmatprep.subr.bf16.mxu0 %v1975_v63 }
 0xde5   :  { %1805 = vmatpush3.bf16.msra.mxu0 %v1976_v2 }
 0xe94   :  { %v1434_v10 = vpop.f32.mrf.mxu1 }
 0xe95   :  { %v1435_v62 = vadd.f32 %v1434_v10, %v1350_v7  ;;  %v1736_v7 = vld [vmem:[%s2492_s13] ss:$0 sm:$0xff] }
 0xe96   :  { %v1436_v0 = vpop.f32.mrf.mxu1 }
 0xe97   :  { %v1441_v12 = vmul.f32 0.70710677, %v1435_v62  ;;  %v1437_v13 = vadd.f32 %v1436_v0, %v1354_v9  ;;  %v1489_v55 = vmul.f32 0.5, %v1435_v62 }
 0xe98   :  { %v1438_v15 = vpop.f32.mrf.mxu1 }
 0xe99   :  { %v1447_v19 = vand.u32 2147483647, %v1441_v12  ;;  %v1442_v20 = vmul.f32 0.70710677, %v1437_v13  ;;  %vm1443_vm8 = vcmp.ge.f32.partialorder %v1441_v12, 0.0  ;;  %v1490_v52 = vmul.f32 0.5, %v1437_v13 }
 0xe9a   :  { %v1439_v21 = vpop.f32.mrf.mxu1  ;;  %v1445_v17 = vsel %vm1443_vm8, 1.0, %v2033_v16 }
 0xe9b   :  { %v1449_v4 = vmul.f32 0.3275911, %v1447_v19  ;;  %v1448_v22 = vand.u32 2147483647, %v1442_v20  ;;  %v1475_v56 = vsub.f32 0.0, %v1447_v19  ;;  %vm1444_vm9 = vcmp.ge.f32.partialorder %v1442_v20, 0.0 }
 0xe9c   :  { %v1446_v49 = vsel %vm1444_vm9, 1.0, %v2033_v16 }
 0xe9d   :  { %v1451_v5 = vadd.f32 1.0, %v1449_v4  ;;  %v1450_v23 = vmul.f32 0.3275911, %v1448_v22  ;;  %v1476_v25 = vsub.f32 0.0, %v1448_v22  ;;  %v1477_v14 = vmul.f32 %v1475_v56, %v1447_v19 }
 0xe9f   :  { %2013 = vrcp.f32 %v1451_v5  ;;  %v1452_v24 = vadd.f32 1.0, %v1450_v23  ;;  %v1478_v26 = vmul.f32 %v1476_v25, %v1448_v22  ;;  %v1479_v28 = vmul.f32 1.442695, %v1477_v14 }
 0xea1   :  { %2015 = vrcp.f32 %v1452_v24  ;;  %v1481_v59 = vmul.f32 1.442695, %v1478_v26 }
 0xea2   :  { %2017 = vpow2.f32 %v1479_v28 }
 0xea3   :  { %2019 = vpow2.f32 %v1481_v59 }
 0xeac   :  { %v2014_v58 = vpop.eup %2013 }
 0xead   :  { %v1457_v27 = vmul.f32 1.0614054, %v2014_v58 }
 0xeae   :  { %v2016_v18 = vpop.eup %2015 }
 0xeaf   :  { %v1732_v29 = vadd.f32 -1.4531521, %v1457_v27  ;;  %v1458_v51 = vmul.f32 1.0614054, %v2016_v18  ;;  %v2018_v35 = vpop.eup %2017 }
 0xeb0   :  { %v2020_v43 = vpop.eup %2019 }
 0xeb1   :  { %v1461_v61 = vmul.f32 %v2014_v58, %v1732_v29  ;;  %v1733_v30 = vadd.f32 -1.4531521, %v1458_v51 }
 0xeb3   :  { %v1463_v31 = vadd.f32 1.4214138, %v1461_v61  ;;  %v1462_v8 = vmul.f32 %v2016_v18, %v1733_v30 }
 0xeb5   :  { %v1465_v32 = vmul.f32 %v2014_v58, %v1463_v31  ;;  %v1464_v33 = vadd.f32 1.4214138, %v1462_v8 }
 0xeb7   :  { %v1734_v34 = vadd.f32 -0.28449672, %v1465_v32  ;;  %v1466_v36 = vmul.f32 %v2016_v18, %v1464_v33 }
 0xeb9   :  { %v1469_v6 = vmul.f32 %v2014_v58, %v1734_v34  ;;  %v1735_v37 = vadd.f32 -0.28449672, %v1466_v36 }
 0xebb   :  { %v1471_v38 = vadd.f32 0.2548296, %v1469_v6  ;;  %v1470_v39 = vmul.f32 %v2016_v18, %v1735_v37 }
 0xebd   :  { %v1473_v40 = vmul.f32 %v2014_v58, %v1471_v38  ;;  %v1472_v41 = vadd.f32 0.2548296, %v1470_v39 }
 0xebf   :  { %v1483_v1 = vmul.f32 %v2018_v35, %v1473_v40  ;;  %v1474_v42 = vmul.f32 %v2016_v18, %v1472_v41 }
 0xec1   :  { %v1485_v44 = vsub.f32 1.0, %v1483_v1  ;;  %v1484_v45 = vmul.f32 %v2020_v43, %v1474_v42 }
 0xec3   :  { %v1487_v46 = vmul.f32 %v1485_v44, %v1445_v17  ;;  %v1486_v47 = vsub.f32 1.0, %v1484_v45 }
 0xec5   :  { %v1491_v48 = vadd.f32 1.0, %v1487_v46  ;;  %v1488_v50 = vmul.f32 %v1486_v47, %v1446_v49 }
 0xec7   :  { %v1492_v53 = vadd.f32 1.0, %v1488_v50  ;;  %v1493_v54 = vmul.f32 %v1491_v48, %v1489_v55 }
 0xec9   :  { %v1494_v60 = vmul.f32 %v1492_v53, %v1490_v52  ;;  %v1495_v2 = vpack.c.bf16 %v1493_v54, %v1493_v54 }
 0xecb   :  { %v1496_v63 = vpack.c.bf16 %v1494_v60, %v1494_v60 }
 0xecd   :  { %1664 = vmatprep.mubr.bf16.mxu0 %v1496_v63 }
 0xece   :  { %1665 = vmatmul.mubr.bf16.vlgmr.msra.gmra.mxu0 %v1495_v2 }
 0xf8e   :  { %v1806_v3 = vpop.f32.mrf.mxu0 }
 0xf90   :  { %v1807_v9 = vpop.f32.mrf.mxu0 }
 0xf91   :  { %v1808_v10 = vadd.f32 %v1807_v9, %v1806_v3 }
 0xf92   :  { %v1809_v0 = vpop.f32.mrf.mxu0 }
 0xf93   :  { %v1667_v12 = vadd.f32 %v1808_v10, %v1736_v7 }
 0xf94   :  { %v1810_v15 = vpop.f32.mrf.mxu0 }
 0xf95   :  { %v1673_v19 = vcombine.high %v1667_v12, %v1667_v12  ;;  %v1675_v62 = vadd.f32 %v1667_v12, %v2370_v11 }
 0xf97   :  { %v1676_v13 = vadd.f32 %v1673_v19, %v2373_v57 }
 0xf99   :  { %v1679_v20 = vcombine.low %v1675_v62, %v1676_v13 }
 0xf9b   :  { %v1681_v21 = vpack.c.bf16 %v1679_v20, %v1679_v20 }
 0xf9d   :  { %1683 = vst.msk [vmem:[%s2493_s14] sm:$0xf] %vm1682_vm10, %v1681_v21 }

</bundles_post_ra>
